<compile_context>
chip_gen: v5e
topology: v5e:2x2
jax: 0.10.0
libtpu: 0.0.40
codegen_flags: <defaults>
</compile_context>

<pallas_src>
import functools

import jax
import jax.numpy as jnp
from jax.experimental import pallas as pl
from jax.experimental.pallas import tpu as pltpu


def _round_up(n, m):
    return ((n + m - 1) // m) * m


def lstm_kernel(x_ref, w0x_ref, b0_ref, whh0_ref, wih1_ref, whh1_ref, b1_ref,
                wfc_ref, bfc_ref, out_ref, xproj_ref, *, batch):
    """2-layer LSTM recurrence + FC head; everything resident in VMEM.

    x_ref     : (T*B, I_pad) f32, time-major (rows [t*B, (t+1)*B) are step t)
    w0x_ref   : (4, I_pad, H) bf16  per-gate W_ih0^T   (gate order i, f, g, o)
    b0_ref    : (4, 1, H)     f32   per-gate b_ih0 + b_hh0
    whh0_ref  : (4, H, H)     bf16  per-gate W_hh0^T
    wih1_ref  : (4, H, H)     bf16  per-gate W_ih1^T
    whh1_ref  : (4, H, H)     bf16  per-gate W_hh1^T
    b1_ref    : (4, 1, H)     f32   per-gate b_ih1 + b_hh1
    wfc_ref   : (O, H)        f32
    bfc_ref   : (1, O)        f32
    out_ref   : (B, O)        f32
    xproj_ref : (4, T*B, H)   f32   scratch: hoisted layer-0 input projection
    """
    TB = x_ref.shape[0]
    T = TB // batch
    H = whh0_ref.shape[-1]
    O = wfc_ref.shape[0]
    f32 = jnp.float32

    # ---- Hoisted layer-0 input projection (+ fused bias): one GEMM per gate
    #      over the whole sequence, off the serial recurrence chain.
    x2d = x_ref[...].astype(jnp.bfloat16)
    for g in range(4):
        xproj_ref[g] = (jnp.dot(x2d, w0x_ref[g], preferred_element_type=f32)
                        + b0_ref[g])

    # ---- Hoist the layer-1 bias broadcast (broadcast_in_dim is not CSE'd).
    b1b = [jnp.broadcast_to(b1_ref[g], (batch, H)) for g in range(4)]

    zeros = jnp.zeros((batch, H), f32)
    h0, c0, h1, c1 = zeros, zeros, zeros, zeros

    def gate_math(zi, zf, zg, zo, c_prev):
        # Trimmed EUP: sigmoid only on i/f/o, tanh only on g; all lane-aligned.
        i = jax.nn.sigmoid(zi)
        f = jax.nn.sigmoid(zf)
        g = jnp.tanh(zg)
        o = jax.nn.sigmoid(zo)
        c_new = f * c_prev + i * g
        h_new = o * jnp.tanh(c_new)
        return h_new, c_new

    # T is a small compile-time constant -> fully unrolled static loop, static
    # sublane-aligned slices only, state carried in vregs (f32).
    for t in range(T):
        r0, r1 = t * batch, (t + 1) * batch

        # Layer 0: z_g = Xproj_g[t] + h0 @ W_hh0_g   (per-gate, no concat).
        h0b = h0.astype(jnp.bfloat16)
        z0 = [xproj_ref[g, r0:r1, :]
              + jnp.dot(h0b, whh0_ref[g], preferred_element_type=f32)
              for g in range(4)]
        h0, c0 = gate_math(z0[0], z0[1], z0[2], z0[3], c0)

        # Layer 1: z_g = h0 @ W_ih1_g + h1 @ W_hh1_g + b1_g   (no concat).
        hin = h0.astype(jnp.bfloat16)
        h1b = h1.astype(jnp.bfloat16)
        z1 = [b1b[g]
              + jnp.dot(hin, wih1_ref[g], preferred_element_type=f32)
              + jnp.dot(h1b, whh1_ref[g], preferred_element_type=f32)
              for g in range(4)]
        h1, c1 = gate_math(z1[0], z1[1], z1[2], z1[3], c1)

    # ---- FC head on the last step's top-layer hidden state.
    if O == 1:
        # O == 1: skip the MXU — VPU multiply + lane reduction.
        out = jnp.sum(h1 * wfc_ref[...], axis=-1, keepdims=True) + bfc_ref[...]
    else:
        out = jax.lax.dot_general(
            h1.astype(jnp.bfloat16), wfc_ref[...].astype(jnp.bfloat16),
            dimension_numbers=(((1,), (1,)), ((), ())),
            preferred_element_type=f32) + bfc_ref[...]
    out_ref[...] = out.astype(out_ref.dtype)


def init_raw_params(key, input_size, hidden_size, output_size):
    """PyTorch-style uniform(-1/sqrt(H), 1/sqrt(H)) init, raw (torch) layout."""
    H, I, O = hidden_size, input_size, output_size
    bound = 1.0 / (H ** 0.5)
    ks = jax.random.split(key, 10)
    u = lambda k, s: jax.random.uniform(k, s, jnp.float32, -bound, bound)
    return {
        "wih0": u(ks[0], (4 * H, I)), "whh0": u(ks[1], (4 * H, H)),
        "bih0": u(ks[2], (4 * H,)),   "bhh0": u(ks[3], (4 * H,)),
        "wih1": u(ks[4], (4 * H, H)), "whh1": u(ks[5], (4 * H, H)),
        "bih1": u(ks[6], (4 * H,)),   "bhh1": u(ks[7], (4 * H,)),
        "wfc":  u(ks[8], (O, H)),     "bfc":  u(ks[9], (O,)),
    }


def pack_params(raw):
    """Pack PyTorch-layout weights into the per-gate, zero-padded, bf16 layout.

    Padded weight rows/cols and bias lanes are zero, so padded hidden lanes stay
    exactly 0 through the recurrence and never leak into real lanes.
    """
    H = raw["whh0"].shape[1]
    I = raw["wih0"].shape[1]
    O = raw["wfc"].shape[0]
    Hp = _round_up(H, 16)   # bf16 sublane packing on the contraction dim
    Ip = _round_up(I, 16)

    def gates_T(w, in_dim, in_pad):
        # w: (4H, in_dim), gate order i,f,g,o -> (4, in_pad, Hp) bf16 (transposed).
        out = jnp.zeros((4, in_pad, Hp), jnp.float32)
        for g in range(4):
            out = out.at[g, :in_dim, :H].set(w[g * H:(g + 1) * H, :].T)
        return out.astype(jnp.bfloat16)

    def gates_b(ba, bb):
        s = ba + bb
        out = jnp.zeros((4, 1, Hp), jnp.float32)
        for g in range(4):
            out = out.at[g, 0, :H].set(s[g * H:(g + 1) * H])
        return out

    w0x  = gates_T(raw["wih0"], I, Ip)
    whh0 = gates_T(raw["whh0"], H, Hp)
    wih1 = gates_T(raw["wih1"], H, Hp)
    whh1 = gates_T(raw["whh1"], H, Hp)
    b0 = gates_b(raw["bih0"], raw["bhh0"])
    b1 = gates_b(raw["bih1"], raw["bhh1"])
    wfc = jnp.zeros((O, Hp), jnp.float32).at[:, :H].set(raw["wfc"])
    bfc = raw["bfc"].reshape(1, O).astype(jnp.float32)
    return (w0x, b0, whh0, wih1, whh1, b1, wfc, bfc)


def lstm_forward(x, packed):
    """x: (B, T, I) float32.  Returns fc(h_top at last step).squeeze()."""
    w0x, b0, whh0, wih1, whh1, b1, wfc, bfc = packed
    B, T, I = x.shape
    Ip = w0x.shape[1]
    Hp = whh0.shape[-1]
    O = wfc.shape[0]
    Bp = _round_up(max(B, 8), 8)        # fill vreg sublanes / MXU rows

    # Zero-pad batch and input features (padded rows/lanes are inert), then lay
    # the sequence out time-major and flattened so each step's rows form one
    # aligned sublane block.  Pure layout plumbing, done once outside the kernel.
    xp = jnp.zeros((Bp, T, Ip), jnp.float32).at[:B, :, :I].set(
        x.astype(jnp.float32))
    x2d = xp.transpose(1, 0, 2).reshape(T * Bp, Ip)

    vmem = pl.BlockSpec(memory_space=pltpu.MemorySpace.VMEM)
    out = pl.pallas_call(
        functools.partial(lstm_kernel, batch=Bp),
        out_shape=jax.ShapeDtypeStruct((Bp, O), jnp.float32),
        in_specs=[vmem] * 9,
        out_specs=vmem,
        scratch_shapes=[pltpu.VMEM((4, T * Bp, Hp), jnp.float32)],
        # NOTE: for large B*T, time-chunk the sequence (grid over T chunks) and
        # set pltpu.CompilerParams(vmem_limit_bytes=...) — v7x has only 64 MiB
        # VMEM per core; irrelevant here (~100 KiB resident).
    )(x2d, w0x, b0, whh0, wih1, whh1, b1, wfc, bfc)
    return jnp.squeeze(out[:B])         # matches PyTorch `out.squeeze()`


def lstm_reference(x, raw):
    """Pure-JAX f32 reference with PyTorch nn.LSTM semantics (raw weights)."""
    B, T, I = x.shape
    H = raw["whh0"].shape[1]

    def cell(inp, h, c, wih, whh, bih, bhh):
        z = inp @ wih.T + h @ whh.T + bih + bhh
        i = jax.nn.sigmoid(z[:, 0 * H:1 * H])
        f = jax.nn.sigmoid(z[:, 1 * H:2 * H])
        g = jnp.tanh(z[:, 2 * H:3 * H])
        o = jax.nn.sigmoid(z[:, 3 * H:4 * H])
        c = f * c + i * g
        h = o * jnp.tanh(c)
        return h, c

    h0 = c0 = h1 = c1 = jnp.zeros((B, H), jnp.float32)
    for t in range(T):
        h0, c0 = cell(x[:, t, :], h0, c0,
                      raw["wih0"], raw["whh0"], raw["bih0"], raw["bhh0"])
        h1, c1 = cell(h0, h1, c1,
                      raw["wih1"], raw["whh1"], raw["bih1"], raw["bhh1"])
    return jnp.squeeze(h1 @ raw["wfc"].T + raw["bfc"])


if __name__ == "__main__":
    # Shapes implied by the module: input_size=1, hidden_size=50, num_layers=2,
    # output_size=1; small batch=2, seq_len=8 for the demo.
    B, T, I, H, O = 2, 8, 1, 50, 1

    key = jax.random.PRNGKey(0)
    kx, kp = jax.random.split(key)
    x = jax.random.normal(kx, (B, T, I), dtype=jnp.float32)

    raw = init_raw_params(kp, I, H, O)
    packed = pack_params(raw)

    out = jax.block_until_ready(jax.jit(lstm_forward)(x, packed))
    ref = jax.block_until_ready(lstm_reference(x, raw))

    assert out.shape == (B,), f"unexpected output shape {out.shape}"
    # bf16 MXU operands (f32 accumulate, f32 state) -> loosened vs pure-f32 ref.
    assert jnp.allclose(out, ref, atol=2e-2, rtol=2e-2), (out, ref)
    print("KERNEL_OK")
</pallas_src>

<mosaic_0001>
module attributes {stable_mosaic.version = 11 : i64} {
  func.func @lstm_kernel(%arg0: memref<64x16xf32, #tpu.memory_space<vmem>>, %arg1: memref<4x16x64xbf16, #tpu.memory_space<vmem>>, %arg2: memref<4x1x64xf32, #tpu.memory_space<vmem>>, %arg3: memref<4x64x64xbf16, #tpu.memory_space<vmem>>, %arg4: memref<4x64x64xbf16, #tpu.memory_space<vmem>>, %arg5: memref<4x64x64xbf16, #tpu.memory_space<vmem>>, %arg6: memref<4x1x64xf32, #tpu.memory_space<vmem>>, %arg7: memref<1x64xf32, #tpu.memory_space<vmem>>, %arg8: memref<1x1xf32, #tpu.memory_space<vmem>>, %arg9: memref<8x1xf32, #tpu.memory_space<vmem>>, %arg10: memref<4x64x64xf32, #tpu.memory_space<vmem>>) attributes {dimension_semantics = [], scalar_prefetch = 0 : i64, scratch_operands = 1 : i64, tpu.core_type = #tpu.core_type<tc>} {
    %c0 = arith.constant 0 : index
    %c0_0 = arith.constant 0 : index
    %0 = vector.load %arg0[%c0, %c0_0] : memref<64x16xf32, #tpu.memory_space<vmem>>, vector<64x16xf32>
    %1 = arith.truncf %0 : vector<64x16xf32> to vector<64x16xbf16>
    %c0_1 = arith.constant 0 : index
    %c0_2 = arith.constant 0 : index
    %c0_3 = arith.constant 0 : index
    %2 = vector.load %arg1[%c0_1, %c0_2, %c0_3] : memref<4x16x64xbf16, #tpu.memory_space<vmem>>, vector<1x16x64xbf16>
    %3 = vector.shape_cast %2 : vector<1x16x64xbf16> to vector<16x64xbf16>
    %cst = arith.constant dense<0.000000e+00> : vector<64x64xf32>
    %4 = tpu.matmul %1, %3, %cst {dimension_numbers = #tpu.dot_dimension_numbers<[1], [0], [0], [1], [0, 0, 1, 1], [], []>} : vector<64x16xbf16>, vector<16x64xbf16>, vector<64x64xf32> -> vector<64x64xf32>
    %c0_4 = arith.constant 0 : index
    %c0_5 = arith.constant 0 : index
    %c0_6 = arith.constant 0 : index
    %5 = vector.load %arg2[%c0_4, %c0_5, %c0_6] : memref<4x1x64xf32, #tpu.memory_space<vmem>>, vector<1x1x64xf32>
    %6 = vector.shape_cast %5 : vector<1x1x64xf32> to vector<1x64xf32>
    %7 = vector.broadcast %6 : vector<1x64xf32> to vector<64x64xf32>
    %8 = arith.addf %4, %7 : vector<64x64xf32>
    %c0_7 = arith.constant 0 : index
    %c0_8 = arith.constant 0 : index
    %c0_9 = arith.constant 0 : index
    %9 = vector.load %arg10[%c0_7, %c0_8, %c0_9] : memref<4x64x64xf32, #tpu.memory_space<vmem>>, vector<1x64x64xf32>
    %10 = vector.shape_cast %9 : vector<1x64x64xf32> to vector<64x64xf32>
    %11 = vector.shape_cast %8 : vector<64x64xf32> to vector<1x64x64xf32>
    tpu.vector_store %arg10[%c0_7, %c0_8, %c0_9], %11 {strides = array<i32>} : memref<4x64x64xf32, #tpu.memory_space<vmem>>, vector<1x64x64xf32>,
    %c1 = arith.constant 1 : index
    %c0_10 = arith.constant 0 : index
    %c0_11 = arith.constant 0 : index
    %12 = vector.load %arg1[%c1, %c0_10, %c0_11] : memref<4x16x64xbf16, #tpu.memory_space<vmem>>, vector<1x16x64xbf16>
    %13 = vector.shape_cast %12 : vector<1x16x64xbf16> to vector<16x64xbf16>
    %cst_12 = arith.constant dense<0.000000e+00> : vector<64x64xf32>
    %14 = tpu.matmul %1, %13, %cst_12 {dimension_numbers = #tpu.dot_dimension_numbers<[1], [0], [0], [1], [0, 0, 1, 1], [], []>} : vector<64x16xbf16>, vector<16x64xbf16>, vector<64x64xf32> -> vector<64x64xf32>
    %c1_13 = arith.constant 1 : index
    %c0_14 = arith.constant 0 : index
    %c0_15 = arith.constant 0 : index
    %15 = vector.load %arg2[%c1_13, %c0_14, %c0_15] : memref<4x1x64xf32, #tpu.memory_space<vmem>>, vector<1x1x64xf32>
    %16 = vector.shape_cast %15 : vector<1x1x64xf32> to vector<1x64xf32>
    %17 = vector.broadcast %16 : vector<1x64xf32> to vector<64x64xf32>
    %18 = arith.addf %14, %17 : vector<64x64xf32>
    %c1_16 = arith.constant 1 : index
    %c0_17 = arith.constant 0 : index
    %c0_18 = arith.constant 0 : index
    %19 = vector.load %arg10[%c1_16, %c0_17, %c0_18] : memref<4x64x64xf32, #tpu.memory_space<vmem>>, vector<1x64x64xf32>
    %20 = vector.shape_cast %19 : vector<1x64x64xf32> to vector<64x64xf32>
    %21 = vector.shape_cast %18 : vector<64x64xf32> to vector<1x64x64xf32>
    tpu.vector_store %arg10[%c1_16, %c0_17, %c0_18], %21 {strides = array<i32>} : memref<4x64x64xf32, #tpu.memory_space<vmem>>, vector<1x64x64xf32>,
    %c2 = arith.constant 2 : index
    %c0_19 = arith.constant 0 : index
    %c0_20 = arith.constant 0 : index
    %22 = vector.load %arg1[%c2, %c0_19, %c0_20] : memref<4x16x64xbf16, #tpu.memory_space<vmem>>, vector<1x16x64xbf16>
    %23 = vector.shape_cast %22 : vector<1x16x64xbf16> to vector<16x64xbf16>
    %cst_21 = arith.constant dense<0.000000e+00> : vector<64x64xf32>
    %24 = tpu.matmul %1, %23, %cst_21 {dimension_numbers = #tpu.dot_dimension_numbers<[1], [0], [0], [1], [0, 0, 1, 1], [], []>} : vector<64x16xbf16>, vector<16x64xbf16>, vector<64x64xf32> -> vector<64x64xf32>
    %c2_22 = arith.constant 2 : index
    %c0_23 = arith.constant 0 : index
    %c0_24 = arith.constant 0 : index
    %25 = vector.load %arg2[%c2_22, %c0_23, %c0_24] : memref<4x1x64xf32, #tpu.memory_space<vmem>>, vector<1x1x64xf32>
    %26 = vector.shape_cast %25 : vector<1x1x64xf32> to vector<1x64xf32>
    %27 = vector.broadcast %26 : vector<1x64xf32> to vector<64x64xf32>
    %28 = arith.addf %24, %27 : vector<64x64xf32>
    %c2_25 = arith.constant 2 : index
    %c0_26 = arith.constant 0 : index
    %c0_27 = arith.constant 0 : index
    %29 = vector.load %arg10[%c2_25, %c0_26, %c0_27] : memref<4x64x64xf32, #tpu.memory_space<vmem>>, vector<1x64x64xf32>
    %30 = vector.shape_cast %29 : vector<1x64x64xf32> to vector<64x64xf32>
    %31 = vector.shape_cast %28 : vector<64x64xf32> to vector<1x64x64xf32>
    tpu.vector_store %arg10[%c2_25, %c0_26, %c0_27], %31 {strides = array<i32>} : memref<4x64x64xf32, #tpu.memory_space<vmem>>, vector<1x64x64xf32>,
    %c3 = arith.constant 3 : index
    %c0_28 = arith.constant 0 : index
    %c0_29 = arith.constant 0 : index
    %32 = vector.load %arg1[%c3, %c0_28, %c0_29] : memref<4x16x64xbf16, #tpu.memory_space<vmem>>, vector<1x16x64xbf16>
    %33 = vector.shape_cast %32 : vector<1x16x64xbf16> to vector<16x64xbf16>
    %cst_30 = arith.constant dense<0.000000e+00> : vector<64x64xf32>
    %34 = tpu.matmul %1, %33, %cst_30 {dimension_numbers = #tpu.dot_dimension_numbers<[1], [0], [0], [1], [0, 0, 1, 1], [], []>} : vector<64x16xbf16>, vector<16x64xbf16>, vector<64x64xf32> -> vector<64x64xf32>
    %c3_31 = arith.constant 3 : index
    %c0_32 = arith.constant 0 : index
    %c0_33 = arith.constant 0 : index
    %35 = vector.load %arg2[%c3_31, %c0_32, %c0_33] : memref<4x1x64xf32, #tpu.memory_space<vmem>>, vector<1x1x64xf32>
    %36 = vector.shape_cast %35 : vector<1x1x64xf32> to vector<1x64xf32>
    %37 = vector.broadcast %36 : vector<1x64xf32> to vector<64x64xf32>
    %38 = arith.addf %34, %37 : vector<64x64xf32>
    %c3_34 = arith.constant 3 : index
    %c0_35 = arith.constant 0 : index
    %c0_36 = arith.constant 0 : index
    %39 = vector.load %arg10[%c3_34, %c0_35, %c0_36] : memref<4x64x64xf32, #tpu.memory_space<vmem>>, vector<1x64x64xf32>
    %40 = vector.shape_cast %39 : vector<1x64x64xf32> to vector<64x64xf32>
    %41 = vector.shape_cast %38 : vector<64x64xf32> to vector<1x64x64xf32>
    tpu.vector_store %arg10[%c3_34, %c0_35, %c0_36], %41 {strides = array<i32>} : memref<4x64x64xf32, #tpu.memory_space<vmem>>, vector<1x64x64xf32>,
    %c0_37 = arith.constant 0 : index
    %c0_38 = arith.constant 0 : index
    %c0_39 = arith.constant 0 : index
    %42 = vector.load %arg6[%c0_37, %c0_38, %c0_39] : memref<4x1x64xf32, #tpu.memory_space<vmem>>, vector<1x1x64xf32>
    %43 = vector.shape_cast %42 : vector<1x1x64xf32> to vector<1x64xf32>
    %44 = vector.shape_cast %43 : vector<1x64xf32> to vector<1x64xf32>
    %45 = vector.broadcast %44 : vector<1x64xf32> to vector<8x64xf32>
    %c1_40 = arith.constant 1 : index
    %c0_41 = arith.constant 0 : index
    %c0_42 = arith.constant 0 : index
    %46 = vector.load %arg6[%c1_40, %c0_41, %c0_42] : memref<4x1x64xf32, #tpu.memory_space<vmem>>, vector<1x1x64xf32>
    %47 = vector.shape_cast %46 : vector<1x1x64xf32> to vector<1x64xf32>
    %48 = vector.shape_cast %47 : vector<1x64xf32> to vector<1x64xf32>
    %49 = vector.broadcast %48 : vector<1x64xf32> to vector<8x64xf32>
    %c2_43 = arith.constant 2 : index
    %c0_44 = arith.constant 0 : index
    %c0_45 = arith.constant 0 : index
    %50 = vector.load %arg6[%c2_43, %c0_44, %c0_45] : memref<4x1x64xf32, #tpu.memory_space<vmem>>, vector<1x1x64xf32>
    %51 = vector.shape_cast %50 : vector<1x1x64xf32> to vector<1x64xf32>
    %52 = vector.shape_cast %51 : vector<1x64xf32> to vector<1x64xf32>
    %53 = vector.broadcast %52 : vector<1x64xf32> to vector<8x64xf32>
    %c3_46 = arith.constant 3 : index
    %c0_47 = arith.constant 0 : index
    %c0_48 = arith.constant 0 : index
    %54 = vector.load %arg6[%c3_46, %c0_47, %c0_48] : memref<4x1x64xf32, #tpu.memory_space<vmem>>, vector<1x1x64xf32>
    %55 = vector.shape_cast %54 : vector<1x1x64xf32> to vector<1x64xf32>
    %56 = vector.shape_cast %55 : vector<1x64xf32> to vector<1x64xf32>
    %57 = vector.broadcast %56 : vector<1x64xf32> to vector<8x64xf32>
    %cst_49 = arith.constant 0.000000e+00 : f32
    %58 = vector.broadcast %cst_49 : f32 to vector<8x64xf32>
    %59 = arith.truncf %58 : vector<8x64xf32> to vector<8x64xbf16>
    %c0_50 = arith.constant 0 : index
    %c0_51 = arith.constant 0 : index
    %c0_52 = arith.constant 0 : index
    %60 = vector.load %arg10[%c0_50, %c0_51, %c0_52] : memref<4x64x64xf32, #tpu.memory_space<vmem>>, vector<1x8x64xf32>
    %61 = vector.shape_cast %60 : vector<1x8x64xf32> to vector<8x64xf32>
    %c0_53 = arith.constant 0 : index
    %c0_54 = arith.constant 0 : index
    %c0_55 = arith.constant 0 : index
    %62 = vector.load %arg3[%c0_53, %c0_54, %c0_55] : memref<4x64x64xbf16, #tpu.memory_space<vmem>>, vector<1x64x64xbf16>
    %63 = vector.shape_cast %62 : vector<1x64x64xbf16> to vector<64x64xbf16>
    %cst_56 = arith.constant dense<0.000000e+00> : vector<8x64xf32>
    %64 = tpu.matmul %59, %63, %cst_56 {dimension_numbers = #tpu.dot_dimension_numbers<[1], [0], [0], [1], [0, 0, 1, 1], [], []>} : vector<8x64xbf16>, vector<64x64xbf16>, vector<8x64xf32> -> vector<8x64xf32>
    %65 = arith.addf %61, %64 : vector<8x64xf32>
    %c1_57 = arith.constant 1 : index
    %c0_58 = arith.constant 0 : index
    %c0_59 = arith.constant 0 : index
    %66 = vector.load %arg10[%c1_57, %c0_58, %c0_59] : memref<4x64x64xf32, #tpu.memory_space<vmem>>, vector<1x8x64xf32>
    %67 = vector.shape_cast %66 : vector<1x8x64xf32> to vector<8x64xf32>
    %c1_60 = arith.constant 1 : index
    %c0_61 = arith.constant 0 : index
    %c0_62 = arith.constant 0 : index
    %68 = vector.load %arg3[%c1_60, %c0_61, %c0_62] : memref<4x64x64xbf16, #tpu.memory_space<vmem>>, vector<1x64x64xbf16>
    %69 = vector.shape_cast %68 : vector<1x64x64xbf16> to vector<64x64xbf16>
    %cst_63 = arith.constant dense<0.000000e+00> : vector<8x64xf32>
    %70 = tpu.matmul %59, %69, %cst_63 {dimension_numbers = #tpu.dot_dimension_numbers<[1], [0], [0], [1], [0, 0, 1, 1], [], []>} : vector<8x64xbf16>, vector<64x64xbf16>, vector<8x64xf32> -> vector<8x64xf32>
    %71 = arith.addf %67, %70 : vector<8x64xf32>
    %c2_64 = arith.constant 2 : index
    %c0_65 = arith.constant 0 : index
    %c0_66 = arith.constant 0 : index
    %72 = vector.load %arg10[%c2_64, %c0_65, %c0_66] : memref<4x64x64xf32, #tpu.memory_space<vmem>>, vector<1x8x64xf32>
    %73 = vector.shape_cast %72 : vector<1x8x64xf32> to vector<8x64xf32>
    %c2_67 = arith.constant 2 : index
    %c0_68 = arith.constant 0 : index
    %c0_69 = arith.constant 0 : index
    %74 = vector.load %arg3[%c2_67, %c0_68, %c0_69] : memref<4x64x64xbf16, #tpu.memory_space<vmem>>, vector<1x64x64xbf16>
    %75 = vector.shape_cast %74 : vector<1x64x64xbf16> to vector<64x64xbf16>
    %cst_70 = arith.constant dense<0.000000e+00> : vector<8x64xf32>
    %76 = tpu.matmul %59, %75, %cst_70 {dimension_numbers = #tpu.dot_dimension_numbers<[1], [0], [0], [1], [0, 0, 1, 1], [], []>} : vector<8x64xbf16>, vector<64x64xbf16>, vector<8x64xf32> -> vector<8x64xf32>
    %77 = arith.addf %73, %76 : vector<8x64xf32>
    %c3_71 = arith.constant 3 : index
    %c0_72 = arith.constant 0 : index
    %c0_73 = arith.constant 0 : index
    %78 = vector.load %arg10[%c3_71, %c0_72, %c0_73] : memref<4x64x64xf32, #tpu.memory_space<vmem>>, vector<1x8x64xf32>
    %79 = vector.shape_cast %78 : vector<1x8x64xf32> to vector<8x64xf32>
    %c3_74 = arith.constant 3 : index
    %c0_75 = arith.constant 0 : index
    %c0_76 = arith.constant 0 : index
    %80 = vector.load %arg3[%c3_74, %c0_75, %c0_76] : memref<4x64x64xbf16, #tpu.memory_space<vmem>>, vector<1x64x64xbf16>
    %81 = vector.shape_cast %80 : vector<1x64x64xbf16> to vector<64x64xbf16>
    %cst_77 = arith.constant dense<0.000000e+00> : vector<8x64xf32>
    %82 = tpu.matmul %59, %81, %cst_77 {dimension_numbers = #tpu.dot_dimension_numbers<[1], [0], [0], [1], [0, 0, 1, 1], [], []>} : vector<8x64xbf16>, vector<64x64xbf16>, vector<8x64xf32> -> vector<8x64xf32>
    %83 = arith.addf %79, %82 : vector<8x64xf32>
    %84 = arith.negf %65 : vector<8x64xf32>
    %85 = math.exp %84 : vector<8x64xf32>
    %cst_78 = arith.constant 1.000000e+00 : f32
    %86 = vector.broadcast %cst_78 : f32 to vector<8x64xf32>
    %87 = arith.addf %86, %85 : vector<8x64xf32>
    %88 = arith.divf %86, %87 : vector<8x64xf32>
    %89 = arith.negf %71 : vector<8x64xf32>
    %90 = math.exp %89 : vector<8x64xf32>
    %cst_79 = arith.constant 1.000000e+00 : f32
    %91 = vector.broadcast %cst_79 : f32 to vector<8x64xf32>
    %92 = arith.addf %91, %90 : vector<8x64xf32>
    %93 = arith.divf %91, %92 : vector<8x64xf32>
    %94 = math.tanh %77 : vector<8x64xf32>
    %95 = arith.negf %83 : vector<8x64xf32>
    %96 = math.exp %95 : vector<8x64xf32>
    %cst_80 = arith.constant 1.000000e+00 : f32
    %97 = vector.broadcast %cst_80 : f32 to vector<8x64xf32>
    %98 = arith.addf %97, %96 : vector<8x64xf32>
    %99 = arith.divf %97, %98 : vector<8x64xf32>
    %100 = arith.mulf %93, %58 : vector<8x64xf32>
    %101 = arith.mulf %88, %94 : vector<8x64xf32>
    %102 = arith.addf %100, %101 : vector<8x64xf32>
    %103 = math.tanh %102 : vector<8x64xf32>
    %104 = arith.mulf %99, %103 : vector<8x64xf32>
    %105 = arith.truncf %104 : vector<8x64xf32> to vector<8x64xbf16>
    %106 = arith.truncf %58 : vector<8x64xf32> to vector<8x64xbf16>
    %c0_81 = arith.constant 0 : index
    %c0_82 = arith.constant 0 : index
    %c0_83 = arith.constant 0 : index
    %107 = vector.load %arg4[%c0_81, %c0_82, %c0_83] : memref<4x64x64xbf16, #tpu.memory_space<vmem>>, vector<1x64x64xbf16>
    %108 = vector.shape_cast %107 : vector<1x64x64xbf16> to vector<64x64xbf16>
    %cst_84 = arith.constant dense<0.000000e+00> : vector<8x64xf32>
    %109 = tpu.matmul %105, %108, %cst_84 {dimension_numbers = #tpu.dot_dimension_numbers<[1], [0], [0], [1], [0, 0, 1, 1], [], []>} : vector<8x64xbf16>, vector<64x64xbf16>, vector<8x64xf32> -> vector<8x64xf32>
    %110 = arith.addf %45, %109 : vector<8x64xf32>
    %c0_85 = arith.constant 0 : index
    %c0_86 = arith.constant 0 : index
    %c0_87 = arith.constant 0 : index
    %111 = vector.load %arg5[%c0_85, %c0_86, %c0_87] : memref<4x64x64xbf16, #tpu.memory_space<vmem>>, vector<1x64x64xbf16>
    %112 = vector.shape_cast %111 : vector<1x64x64xbf16> to vector<64x64xbf16>
    %cst_88 = arith.constant dense<0.000000e+00> : vector<8x64xf32>
    %113 = tpu.matmul %106, %112, %cst_88 {dimension_numbers = #tpu.dot_dimension_numbers<[1], [0], [0], [1], [0, 0, 1, 1], [], []>} : vector<8x64xbf16>, vector<64x64xbf16>, vector<8x64xf32> -> vector<8x64xf32>
    %114 = arith.addf %110, %113 : vector<8x64xf32>
    %c1_89 = arith.constant 1 : index
    %c0_90 = arith.constant 0 : index
    %c0_91 = arith.constant 0 : index
    %115 = vector.load %arg4[%c1_89, %c0_90, %c0_91] : memref<4x64x64xbf16, #tpu.memory_space<vmem>>, vector<1x64x64xbf16>
    %116 = vector.shape_cast %115 : vector<1x64x64xbf16> to vector<64x64xbf16>
    %cst_92 = arith.constant dense<0.000000e+00> : vector<8x64xf32>
    %117 = tpu.matmul %105, %116, %cst_92 {dimension_numbers = #tpu.dot_dimension_numbers<[1], [0], [0], [1], [0, 0, 1, 1], [], []>} : vector<8x64xbf16>, vector<64x64xbf16>, vector<8x64xf32> -> vector<8x64xf32>
    %118 = arith.addf %49, %117 : vector<8x64xf32>
    %c1_93 = arith.constant 1 : index
    %c0_94 = arith.constant 0 : index
    %c0_95 = arith.constant 0 : index
    %119 = vector.load %arg5[%c1_93, %c0_94, %c0_95] : memref<4x64x64xbf16, #tpu.memory_space<vmem>>, vector<1x64x64xbf16>
    %120 = vector.shape_cast %119 : vector<1x64x64xbf16> to vector<64x64xbf16>
    %cst_96 = arith.constant dense<0.000000e+00> : vector<8x64xf32>
    %121 = tpu.matmul %106, %120, %cst_96 {dimension_numbers = #tpu.dot_dimension_numbers<[1], [0], [0], [1], [0, 0, 1, 1], [], []>} : vector<8x64xbf16>, vector<64x64xbf16>, vector<8x64xf32> -> vector<8x64xf32>
    %122 = arith.addf %118, %121 : vector<8x64xf32>
    %c2_97 = arith.constant 2 : index
    %c0_98 = arith.constant 0 : index
    %c0_99 = arith.constant 0 : index
    %123 = vector.load %arg4[%c2_97, %c0_98, %c0_99] : memref<4x64x64xbf16, #tpu.memory_space<vmem>>, vector<1x64x64xbf16>
    %124 = vector.shape_cast %123 : vector<1x64x64xbf16> to vector<64x64xbf16>
    %cst_100 = arith.constant dense<0.000000e+00> : vector<8x64xf32>
    %125 = tpu.matmul %105, %124, %cst_100 {dimension_numbers = #tpu.dot_dimension_numbers<[1], [0], [0], [1], [0, 0, 1, 1], [], []>} : vector<8x64xbf16>, vector<64x64xbf16>, vector<8x64xf32> -> vector<8x64xf32>
    %126 = arith.addf %53, %125 : vector<8x64xf32>
    %c2_101 = arith.constant 2 : index
    %c0_102 = arith.constant 0 : index
    %c0_103 = arith.constant 0 : index
    %127 = vector.load %arg5[%c2_101, %c0_102, %c0_103] : memref<4x64x64xbf16, #tpu.memory_space<vmem>>, vector<1x64x64xbf16>
    %128 = vector.shape_cast %127 : vector<1x64x64xbf16> to vector<64x64xbf16>
    %cst_104 = arith.constant dense<0.000000e+00> : vector<8x64xf32>
    %129 = tpu.matmul %106, %128, %cst_104 {dimension_numbers = #tpu.dot_dimension_numbers<[1], [0], [0], [1], [0, 0, 1, 1], [], []>} : vector<8x64xbf16>, vector<64x64xbf16>, vector<8x64xf32> -> vector<8x64xf32>
    %130 = arith.addf %126, %129 : vector<8x64xf32>
    %c3_105 = arith.constant 3 : index
    %c0_106 = arith.constant 0 : index
    %c0_107 = arith.constant 0 : index
    %131 = vector.load %arg4[%c3_105, %c0_106, %c0_107] : memref<4x64x64xbf16, #tpu.memory_space<vmem>>, vector<1x64x64xbf16>
    %132 = vector.shape_cast %131 : vector<1x64x64xbf16> to vector<64x64xbf16>
    %cst_108 = arith.constant dense<0.000000e+00> : vector<8x64xf32>
    %133 = tpu.matmul %105, %132, %cst_108 {dimension_numbers = #tpu.dot_dimension_numbers<[1], [0], [0], [1], [0, 0, 1, 1], [], []>} : vector<8x64xbf16>, vector<64x64xbf16>, vector<8x64xf32> -> vector<8x64xf32>
    %134 = arith.addf %57, %133 : vector<8x64xf32>
    %c3_109 = arith.constant 3 : index
    %c0_110 = arith.constant 0 : index
    %c0_111 = arith.constant 0 : index
    %135 = vector.load %arg5[%c3_109, %c0_110, %c0_111] : memref<4x64x64xbf16, #tpu.memory_space<vmem>>, vector<1x64x64xbf16>
    %136 = vector.shape_cast %135 : vector<1x64x64xbf16> to vector<64x64xbf16>
    %cst_112 = arith.constant dense<0.000000e+00> : vector<8x64xf32>
    %137 = tpu.matmul %106, %136, %cst_112 {dimension_numbers = #tpu.dot_dimension_numbers<[1], [0], [0], [1], [0, 0, 1, 1], [], []>} : vector<8x64xbf16>, vector<64x64xbf16>, vector<8x64xf32> -> vector<8x64xf32>
    %138 = arith.addf %134, %137 : vector<8x64xf32>
    %139 = arith.negf %114 : vector<8x64xf32>
    %140 = math.exp %139 : vector<8x64xf32>
    %cst_113 = arith.constant 1.000000e+00 : f32
    %141 = vector.broadcast %cst_113 : f32 to vector<8x64xf32>
    %142 = arith.addf %141, %140 : vector<8x64xf32>
    %143 = arith.divf %141, %142 : vector<8x64xf32>
    %144 = arith.negf %122 : vector<8x64xf32>
    %145 = math.exp %144 : vector<8x64xf32>
    %cst_114 = arith.constant 1.000000e+00 : f32
    %146 = vector.broadcast %cst_114 : f32 to vector<8x64xf32>
    %147 = arith.addf %146, %145 : vector<8x64xf32>
    %148 = arith.divf %146, %147 : vector<8x64xf32>
    %149 = math.tanh %130 : vector<8x64xf32>
    %150 = arith.negf %138 : vector<8x64xf32>
    %151 = math.exp %150 : vector<8x64xf32>
    %cst_115 = arith.constant 1.000000e+00 : f32
    %152 = vector.broadcast %cst_115 : f32 to vector<8x64xf32>
    %153 = arith.addf %152, %151 : vector<8x64xf32>
    %154 = arith.divf %152, %153 : vector<8x64xf32>
    %155 = arith.mulf %148, %58 : vector<8x64xf32>
    %156 = arith.mulf %143, %149 : vector<8x64xf32>
    %157 = arith.addf %155, %156 : vector<8x64xf32>
    %158 = math.tanh %157 : vector<8x64xf32>
    %159 = arith.mulf %154, %158 : vector<8x64xf32>
    %160 = arith.truncf %104 : vector<8x64xf32> to vector<8x64xbf16>
    %c0_116 = arith.constant 0 : index
    %c8 = arith.constant 8 : index
    %c0_117 = arith.constant 0 : index
    %161 = vector.load %arg10[%c0_116, %c8, %c0_117] : memref<4x64x64xf32, #tpu.memory_space<vmem>>, vector<1x8x64xf32>
    %162 = vector.shape_cast %161 : vector<1x8x64xf32> to vector<8x64xf32>
    %c0_118 = arith.constant 0 : index
    %c0_119 = arith.constant 0 : index
    %c0_120 = arith.constant 0 : index
    %163 = vector.load %arg3[%c0_118, %c0_119, %c0_120] : memref<4x64x64xbf16, #tpu.memory_space<vmem>>, vector<1x64x64xbf16>
    %164 = vector.shape_cast %163 : vector<1x64x64xbf16> to vector<64x64xbf16>
    %cst_121 = arith.constant dense<0.000000e+00> : vector<8x64xf32>
    %165 = tpu.matmul %160, %164, %cst_121 {dimension_numbers = #tpu.dot_dimension_numbers<[1], [0], [0], [1], [0, 0, 1, 1], [], []>} : vector<8x64xbf16>, vector<64x64xbf16>, vector<8x64xf32> -> vector<8x64xf32>
    %166 = arith.addf %162, %165 : vector<8x64xf32>
    %c1_122 = arith.constant 1 : index
    %c8_123 = arith.constant 8 : index
    %c0_124 = arith.constant 0 : index
    %167 = vector.load %arg10[%c1_122, %c8_123, %c0_124] : memref<4x64x64xf32, #tpu.memory_space<vmem>>, vector<1x8x64xf32>
    %168 = vector.shape_cast %167 : vector<1x8x64xf32> to vector<8x64xf32>
    %c1_125 = arith.constant 1 : index
    %c0_126 = arith.constant 0 : index
    %c0_127 = arith.constant 0 : index
    %169 = vector.load %arg3[%c1_125, %c0_126, %c0_127] : memref<4x64x64xbf16, #tpu.memory_space<vmem>>, vector<1x64x64xbf16>
    %170 = vector.shape_cast %169 : vector<1x64x64xbf16> to vector<64x64xbf16>
    %cst_128 = arith.constant dense<0.000000e+00> : vector<8x64xf32>
    %171 = tpu.matmul %160, %170, %cst_128 {dimension_numbers = #tpu.dot_dimension_numbers<[1], [0], [0], [1], [0, 0, 1, 1], [], []>} : vector<8x64xbf16>, vector<64x64xbf16>, vector<8x64xf32> -> vector<8x64xf32>
    %172 = arith.addf %168, %171 : vector<8x64xf32>
    %c2_129 = arith.constant 2 : index
    %c8_130 = arith.constant 8 : index
    %c0_131 = arith.constant 0 : index
    %173 = vector.load %arg10[%c2_129, %c8_130, %c0_131] : memref<4x64x64xf32, #tpu.memory_space<vmem>>, vector<1x8x64xf32>
    %174 = vector.shape_cast %173 : vector<1x8x64xf32> to vector<8x64xf32>
    %c2_132 = arith.constant 2 : index
    %c0_133 = arith.constant 0 : index
    %c0_134 = arith.constant 0 : index
    %175 = vector.load %arg3[%c2_132, %c0_133, %c0_134] : memref<4x64x64xbf16, #tpu.memory_space<vmem>>, vector<1x64x64xbf16>
    %176 = vector.shape_cast %175 : vector<1x64x64xbf16> to vector<64x64xbf16>
    %cst_135 = arith.constant dense<0.000000e+00> : vector<8x64xf32>
    %177 = tpu.matmul %160, %176, %cst_135 {dimension_numbers = #tpu.dot_dimension_numbers<[1], [0], [0], [1], [0, 0, 1, 1], [], []>} : vector<8x64xbf16>, vector<64x64xbf16>, vector<8x64xf32> -> vector<8x64xf32>
    %178 = arith.addf %174, %177 : vector<8x64xf32>
    %c3_136 = arith.constant 3 : index
    %c8_137 = arith.constant 8 : index
    %c0_138 = arith.constant 0 : index
    %179 = vector.load %arg10[%c3_136, %c8_137, %c0_138] : memref<4x64x64xf32, #tpu.memory_space<vmem>>, vector<1x8x64xf32>
    %180 = vector.shape_cast %179 : vector<1x8x64xf32> to vector<8x64xf32>
    %c3_139 = arith.constant 3 : index
    %c0_140 = arith.constant 0 : index
    %c0_141 = arith.constant 0 : index
    %181 = vector.load %arg3[%c3_139, %c0_140, %c0_141] : memref<4x64x64xbf16, #tpu.memory_space<vmem>>, vector<1x64x64xbf16>
    %182 = vector.shape_cast %181 : vector<1x64x64xbf16> to vector<64x64xbf16>
    %cst_142 = arith.constant dense<0.000000e+00> : vector<8x64xf32>
    %183 = tpu.matmul %160, %182, %cst_142 {dimension_numbers = #tpu.dot_dimension_numbers<[1], [0], [0], [1], [0, 0, 1, 1], [], []>} : vector<8x64xbf16>, vector<64x64xbf16>, vector<8x64xf32> -> vector<8x64xf32>
    %184 = arith.addf %180, %183 : vector<8x64xf32>
    %185 = arith.negf %166 : vector<8x64xf32>
    %186 = math.exp %185 : vector<8x64xf32>
    %cst_143 = arith.constant 1.000000e+00 : f32
    %187 = vector.broadcast %cst_143 : f32 to vector<8x64xf32>
    %188 = arith.addf %187, %186 : vector<8x64xf32>
    %189 = arith.divf %187, %188 : vector<8x64xf32>
    %190 = arith.negf %172 : vector<8x64xf32>
    %191 = math.exp %190 : vector<8x64xf32>
    %cst_144 = arith.constant 1.000000e+00 : f32
    %192 = vector.broadcast %cst_144 : f32 to vector<8x64xf32>
    %193 = arith.addf %192, %191 : vector<8x64xf32>
    %194 = arith.divf %192, %193 : vector<8x64xf32>
    %195 = math.tanh %178 : vector<8x64xf32>
    %196 = arith.negf %184 : vector<8x64xf32>
    %197 = math.exp %196 : vector<8x64xf32>
    %cst_145 = arith.constant 1.000000e+00 : f32
    %198 = vector.broadcast %cst_145 : f32 to vector<8x64xf32>
    %199 = arith.addf %198, %197 : vector<8x64xf32>
    %200 = arith.divf %198, %199 : vector<8x64xf32>
    %201 = arith.mulf %194, %102 : vector<8x64xf32>
    %202 = arith.mulf %189, %195 : vector<8x64xf32>
    %203 = arith.addf %201, %202 : vector<8x64xf32>
    %204 = math.tanh %203 : vector<8x64xf32>
    %205 = arith.mulf %200, %204 : vector<8x64xf32>
    %206 = arith.truncf %205 : vector<8x64xf32> to vector<8x64xbf16>
    %207 = arith.truncf %159 : vector<8x64xf32> to vector<8x64xbf16>
    %c0_146 = arith.constant 0 : index
    %c0_147 = arith.constant 0 : index
    %c0_148 = arith.constant 0 : index
    %208 = vector.load %arg4[%c0_146, %c0_147, %c0_148] : memref<4x64x64xbf16, #tpu.memory_space<vmem>>, vector<1x64x64xbf16>
    %209 = vector.shape_cast %208 : vector<1x64x64xbf16> to vector<64x64xbf16>
    %cst_149 = arith.constant dense<0.000000e+00> : vector<8x64xf32>
    %210 = tpu.matmul %206, %209, %cst_149 {dimension_numbers = #tpu.dot_dimension_numbers<[1], [0], [0], [1], [0, 0, 1, 1], [], []>} : vector<8x64xbf16>, vector<64x64xbf16>, vector<8x64xf32> -> vector<8x64xf32>
    %211 = arith.addf %45, %210 : vector<8x64xf32>
    %c0_150 = arith.constant 0 : index
    %c0_151 = arith.constant 0 : index
    %c0_152 = arith.constant 0 : index
    %212 = vector.load %arg5[%c0_150, %c0_151, %c0_152] : memref<4x64x64xbf16, #tpu.memory_space<vmem>>, vector<1x64x64xbf16>
    %213 = vector.shape_cast %212 : vector<1x64x64xbf16> to vector<64x64xbf16>
    %cst_153 = arith.constant dense<0.000000e+00> : vector<8x64xf32>
    %214 = tpu.matmul %207, %213, %cst_153 {dimension_numbers = #tpu.dot_dimension_numbers<[1], [0], [0], [1], [0, 0, 1, 1], [], []>} : vector<8x64xbf16>, vector<64x64xbf16>, vector<8x64xf32> -> vector<8x64xf32>
    %215 = arith.addf %211, %214 : vector<8x64xf32>
    %c1_154 = arith.constant 1 : index
    %c0_155 = arith.constant 0 : index
    %c0_156 = arith.constant 0 : index
    %216 = vector.load %arg4[%c1_154, %c0_155, %c0_156] : memref<4x64x64xbf16, #tpu.memory_space<vmem>>, vector<1x64x64xbf16>
    %217 = vector.shape_cast %216 : vector<1x64x64xbf16> to vector<64x64xbf16>
    %cst_157 = arith.constant dense<0.000000e+00> : vector<8x64xf32>
    %218 = tpu.matmul %206, %217, %cst_157 {dimension_numbers = #tpu.dot_dimension_numbers<[1], [0], [0], [1], [0, 0, 1, 1], [], []>} : vector<8x64xbf16>, vector<64x64xbf16>, vector<8x64xf32> -> vector<8x64xf32>
    %219 = arith.addf %49, %218 : vector<8x64xf32>
    %c1_158 = arith.constant 1 : index
    %c0_159 = arith.constant 0 : index
    %c0_160 = arith.constant 0 : index
    %220 = vector.load %arg5[%c1_158, %c0_159, %c0_160] : memref<4x64x64xbf16, #tpu.memory_space<vmem>>, vector<1x64x64xbf16>
    %221 = vector.shape_cast %220 : vector<1x64x64xbf16> to vector<64x64xbf16>
    %cst_161 = arith.constant dense<0.000000e+00> : vector<8x64xf32>
    %222 = tpu.matmul %207, %221, %cst_161 {dimension_numbers = #tpu.dot_dimension_numbers<[1], [0], [0], [1], [0, 0, 1, 1], [], []>} : vector<8x64xbf16>, vector<64x64xbf16>, vector<8x64xf32> -> vector<8x64xf32>
    %223 = arith.addf %219, %222 : vector<8x64xf32>
    %c2_162 = arith.constant 2 : index
    %c0_163 = arith.constant 0 : index
    %c0_164 = arith.constant 0 : index
    %224 = vector.load %arg4[%c2_162, %c0_163, %c0_164] : memref<4x64x64xbf16, #tpu.memory_space<vmem>>, vector<1x64x64xbf16>
    %225 = vector.shape_cast %224 : vector<1x64x64xbf16> to vector<64x64xbf16>
    %cst_165 = arith.constant dense<0.000000e+00> : vector<8x64xf32>
    %226 = tpu.matmul %206, %225, %cst_165 {dimension_numbers = #tpu.dot_dimension_numbers<[1], [0], [0], [1], [0, 0, 1, 1], [], []>} : vector<8x64xbf16>, vector<64x64xbf16>, vector<8x64xf32> -> vector<8x64xf32>
    %227 = arith.addf %53, %226 : vector<8x64xf32>
    %c2_166 = arith.constant 2 : index
    %c0_167 = arith.constant 0 : index
    %c0_168 = arith.constant 0 : index
    %228 = vector.load %arg5[%c2_166, %c0_167, %c0_168] : memref<4x64x64xbf16, #tpu.memory_space<vmem>>, vector<1x64x64xbf16>
    %229 = vector.shape_cast %228 : vector<1x64x64xbf16> to vector<64x64xbf16>
    %cst_169 = arith.constant dense<0.000000e+00> : vector<8x64xf32>
    %230 = tpu.matmul %207, %229, %cst_169 {dimension_numbers = #tpu.dot_dimension_numbers<[1], [0], [0], [1], [0, 0, 1, 1], [], []>} : vector<8x64xbf16>, vector<64x64xbf16>, vector<8x64xf32> -> vector<8x64xf32>
    %231 = arith.addf %227, %230 : vector<8x64xf32>
    %c3_170 = arith.constant 3 : index
    %c0_171 = arith.constant 0 : index
    %c0_172 = arith.constant 0 : index
    %232 = vector.load %arg4[%c3_170, %c0_171, %c0_172] : memref<4x64x64xbf16, #tpu.memory_space<vmem>>, vector<1x64x64xbf16>
    %233 = vector.shape_cast %232 : vector<1x64x64xbf16> to vector<64x64xbf16>
    %cst_173 = arith.constant dense<0.000000e+00> : vector<8x64xf32>
    %234 = tpu.matmul %206, %233, %cst_173 {dimension_numbers = #tpu.dot_dimension_numbers<[1], [0], [0], [1], [0, 0, 1, 1], [], []>} : vector<8x64xbf16>, vector<64x64xbf16>, vector<8x64xf32> -> vector<8x64xf32>
    %235 = arith.addf %57, %234 : vector<8x64xf32>
    %c3_174 = arith.constant 3 : index
    %c0_175 = arith.constant 0 : index
    %c0_176 = arith.constant 0 : index
    %236 = vector.load %arg5[%c3_174, %c0_175, %c0_176] : memref<4x64x64xbf16, #tpu.memory_space<vmem>>, vector<1x64x64xbf16>
    %237 = vector.shape_cast %236 : vector<1x64x64xbf16> to vector<64x64xbf16>
    %cst_177 = arith.constant dense<0.000000e+00> : vector<8x64xf32>
    %238 = tpu.matmul %207, %237, %cst_177 {dimension_numbers = #tpu.dot_dimension_numbers<[1], [0], [0], [1], [0, 0, 1, 1], [], []>} : vector<8x64xbf16>, vector<64x64xbf16>, vector<8x64xf32> -> vector<8x64xf32>
    %239 = arith.addf %235, %238 : vector<8x64xf32>
    %240 = arith.negf %215 : vector<8x64xf32>
    %241 = math.exp %240 : vector<8x64xf32>
    %cst_178 = arith.constant 1.000000e+00 : f32
    %242 = vector.broadcast %cst_178 : f32 to vector<8x64xf32>
    %243 = arith.addf %242, %241 : vector<8x64xf32>
    %244 = arith.divf %242, %243 : vector<8x64xf32>
    %245 = arith.negf %223 : vector<8x64xf32>
    %246 = math.exp %245 : vector<8x64xf32>
    %cst_179 = arith.constant 1.000000e+00 : f32
    %247 = vector.broadcast %cst_179 : f32 to vector<8x64xf32>
    %248 = arith.addf %247, %246 : vector<8x64xf32>
    %249 = arith.divf %247, %248 : vector<8x64xf32>
    %250 = math.tanh %231 : vector<8x64xf32>
    %251 = arith.negf %239 : vector<8x64xf32>
    %252 = math.exp %251 : vector<8x64xf32>
    %cst_180 = arith.constant 1.000000e+00 : f32
    %253 = vector.broadcast %cst_180 : f32 to vector<8x64xf32>
    %254 = arith.addf %253, %252 : vector<8x64xf32>
    %255 = arith.divf %253, %254 : vector<8x64xf32>
    %256 = arith.mulf %249, %157 : vector<8x64xf32>
    %257 = arith.mulf %244, %250 : vector<8x64xf32>
    %258 = arith.addf %256, %257 : vector<8x64xf32>
    %259 = math.tanh %258 : vector<8x64xf32>
    %260 = arith.mulf %255, %259 : vector<8x64xf32>
    %261 = arith.truncf %205 : vector<8x64xf32> to vector<8x64xbf16>
    %c0_181 = arith.constant 0 : index
    %c16 = arith.constant 16 : index
    %c0_182 = arith.constant 0 : index
    %262 = vector.load %arg10[%c0_181, %c16, %c0_182] : memref<4x64x64xf32, #tpu.memory_space<vmem>>, vector<1x8x64xf32>
    %263 = vector.shape_cast %262 : vector<1x8x64xf32> to vector<8x64xf32>
    %c0_183 = arith.constant 0 : index
    %c0_184 = arith.constant 0 : index
    %c0_185 = arith.constant 0 : index
    %264 = vector.load %arg3[%c0_183, %c0_184, %c0_185] : memref<4x64x64xbf16, #tpu.memory_space<vmem>>, vector<1x64x64xbf16>
    %265 = vector.shape_cast %264 : vector<1x64x64xbf16> to vector<64x64xbf16>
    %cst_186 = arith.constant dense<0.000000e+00> : vector<8x64xf32>
    %266 = tpu.matmul %261, %265, %cst_186 {dimension_numbers = #tpu.dot_dimension_numbers<[1], [0], [0], [1], [0, 0, 1, 1], [], []>} : vector<8x64xbf16>, vector<64x64xbf16>, vector<8x64xf32> -> vector<8x64xf32>
    %267 = arith.addf %263, %266 : vector<8x64xf32>
    %c1_187 = arith.constant 1 : index
    %c16_188 = arith.constant 16 : index
    %c0_189 = arith.constant 0 : index
    %268 = vector.load %arg10[%c1_187, %c16_188, %c0_189] : memref<4x64x64xf32, #tpu.memory_space<vmem>>, vector<1x8x64xf32>
    %269 = vector.shape_cast %268 : vector<1x8x64xf32> to vector<8x64xf32>
    %c1_190 = arith.constant 1 : index
    %c0_191 = arith.constant 0 : index
    %c0_192 = arith.constant 0 : index
    %270 = vector.load %arg3[%c1_190, %c0_191, %c0_192] : memref<4x64x64xbf16, #tpu.memory_space<vmem>>, vector<1x64x64xbf16>
    %271 = vector.shape_cast %270 : vector<1x64x64xbf16> to vector<64x64xbf16>
    %cst_193 = arith.constant dense<0.000000e+00> : vector<8x64xf32>
    %272 = tpu.matmul %261, %271, %cst_193 {dimension_numbers = #tpu.dot_dimension_numbers<[1], [0], [0], [1], [0, 0, 1, 1], [], []>} : vector<8x64xbf16>, vector<64x64xbf16>, vector<8x64xf32> -> vector<8x64xf32>
    %273 = arith.addf %269, %272 : vector<8x64xf32>
    %c2_194 = arith.constant 2 : index
    %c16_195 = arith.constant 16 : index
    %c0_196 = arith.constant 0 : index
    %274 = vector.load %arg10[%c2_194, %c16_195, %c0_196] : memref<4x64x64xf32, #tpu.memory_space<vmem>>, vector<1x8x64xf32>
    %275 = vector.shape_cast %274 : vector<1x8x64xf32> to vector<8x64xf32>
    %c2_197 = arith.constant 2 : index
    %c0_198 = arith.constant 0 : index
    %c0_199 = arith.constant 0 : index
    %276 = vector.load %arg3[%c2_197, %c0_198, %c0_199] : memref<4x64x64xbf16, #tpu.memory_space<vmem>>, vector<1x64x64xbf16>
    %277 = vector.shape_cast %276 : vector<1x64x64xbf16> to vector<64x64xbf16>
    %cst_200 = arith.constant dense<0.000000e+00> : vector<8x64xf32>
    %278 = tpu.matmul %261, %277, %cst_200 {dimension_numbers = #tpu.dot_dimension_numbers<[1], [0], [0], [1], [0, 0, 1, 1], [], []>} : vector<8x64xbf16>, vector<64x64xbf16>, vector<8x64xf32> -> vector<8x64xf32>
    %279 = arith.addf %275, %278 : vector<8x64xf32>
    %c3_201 = arith.constant 3 : index
    %c16_202 = arith.constant 16 : index
    %c0_203 = arith.constant 0 : index
    %280 = vector.load %arg10[%c3_201, %c16_202, %c0_203] : memref<4x64x64xf32, #tpu.memory_space<vmem>>, vector<1x8x64xf32>
    %281 = vector.shape_cast %280 : vector<1x8x64xf32> to vector<8x64xf32>
    %c3_204 = arith.constant 3 : index
    %c0_205 = arith.constant 0 : index
    %c0_206 = arith.constant 0 : index
    %282 = vector.load %arg3[%c3_204, %c0_205, %c0_206] : memref<4x64x64xbf16, #tpu.memory_space<vmem>>, vector<1x64x64xbf16>
    %283 = vector.shape_cast %282 : vector<1x64x64xbf16> to vector<64x64xbf16>
    %cst_207 = arith.constant dense<0.000000e+00> : vector<8x64xf32>
    %284 = tpu.matmul %261, %283, %cst_207 {dimension_numbers = #tpu.dot_dimension_numbers<[1], [0], [0], [1], [0, 0, 1, 1], [], []>} : vector<8x64xbf16>, vector<64x64xbf16>, vector<8x64xf32> -> vector<8x64xf32>
    %285 = arith.addf %281, %284 : vector<8x64xf32>
    %286 = arith.negf %267 : vector<8x64xf32>
    %287 = math.exp %286 : vector<8x64xf32>
    %cst_208 = arith.constant 1.000000e+00 : f32
    %288 = vector.broadcast %cst_208 : f32 to vector<8x64xf32>
    %289 = arith.addf %288, %287 : vector<8x64xf32>
    %290 = arith.divf %288, %289 : vector<8x64xf32>
    %291 = arith.negf %273 : vector<8x64xf32>
    %292 = math.exp %291 : vector<8x64xf32>
    %cst_209 = arith.constant 1.000000e+00 : f32
    %293 = vector.broadcast %cst_209 : f32 to vector<8x64xf32>
    %294 = arith.addf %293, %292 : vector<8x64xf32>
    %295 = arith.divf %293, %294 : vector<8x64xf32>
    %296 = math.tanh %279 : vector<8x64xf32>
    %297 = arith.negf %285 : vector<8x64xf32>
    %298 = math.exp %297 : vector<8x64xf32>
    %cst_210 = arith.constant 1.000000e+00 : f32
    %299 = vector.broadcast %cst_210 : f32 to vector<8x64xf32>
    %300 = arith.addf %299, %298 : vector<8x64xf32>
    %301 = arith.divf %299, %300 : vector<8x64xf32>
    %302 = arith.mulf %295, %203 : vector<8x64xf32>
    %303 = arith.mulf %290, %296 : vector<8x64xf32>
    %304 = arith.addf %302, %303 : vector<8x64xf32>
    %305 = math.tanh %304 : vector<8x64xf32>
    %306 = arith.mulf %301, %305 : vector<8x64xf32>
    %307 = arith.truncf %306 : vector<8x64xf32> to vector<8x64xbf16>
    %308 = arith.truncf %260 : vector<8x64xf32> to vector<8x64xbf16>
    %c0_211 = arith.constant 0 : index
    %c0_212 = arith.constant 0 : index
    %c0_213 = arith.constant 0 : index
    %309 = vector.load %arg4[%c0_211, %c0_212, %c0_213] : memref<4x64x64xbf16, #tpu.memory_space<vmem>>, vector<1x64x64xbf16>
    %310 = vector.shape_cast %309 : vector<1x64x64xbf16> to vector<64x64xbf16>
    %cst_214 = arith.constant dense<0.000000e+00> : vector<8x64xf32>
    %311 = tpu.matmul %307, %310, %cst_214 {dimension_numbers = #tpu.dot_dimension_numbers<[1], [0], [0], [1], [0, 0, 1, 1], [], []>} : vector<8x64xbf16>, vector<64x64xbf16>, vector<8x64xf32> -> vector<8x64xf32>
    %312 = arith.addf %45, %311 : vector<8x64xf32>
    %c0_215 = arith.constant 0 : index
    %c0_216 = arith.constant 0 : index
    %c0_217 = arith.constant 0 : index
    %313 = vector.load %arg5[%c0_215, %c0_216, %c0_217] : memref<4x64x64xbf16, #tpu.memory_space<vmem>>, vector<1x64x64xbf16>
    %314 = vector.shape_cast %313 : vector<1x64x64xbf16> to vector<64x64xbf16>
    %cst_218 = arith.constant dense<0.000000e+00> : vector<8x64xf32>
    %315 = tpu.matmul %308, %314, %cst_218 {dimension_numbers = #tpu.dot_dimension_numbers<[1], [0], [0], [1], [0, 0, 1, 1], [], []>} : vector<8x64xbf16>, vector<64x64xbf16>, vector<8x64xf32> -> vector<8x64xf32>
    %316 = arith.addf %312, %315 : vector<8x64xf32>
    %c1_219 = arith.constant 1 : index
    %c0_220 = arith.constant 0 : index
    %c0_221 = arith.constant 0 : index
    %317 = vector.load %arg4[%c1_219, %c0_220, %c0_221] : memref<4x64x64xbf16, #tpu.memory_space<vmem>>, vector<1x64x64xbf16>
    %318 = vector.shape_cast %317 : vector<1x64x64xbf16> to vector<64x64xbf16>
    %cst_222 = arith.constant dense<0.000000e+00> : vector<8x64xf32>
    %319 = tpu.matmul %307, %318, %cst_222 {dimension_numbers = #tpu.dot_dimension_numbers<[1], [0], [0], [1], [0, 0, 1, 1], [], []>} : vector<8x64xbf16>, vector<64x64xbf16>, vector<8x64xf32> -> vector<8x64xf32>
    %320 = arith.addf %49, %319 : vector<8x64xf32>
    %c1_223 = arith.constant 1 : index
    %c0_224 = arith.constant 0 : index
    %c0_225 = arith.constant 0 : index
    %321 = vector.load %arg5[%c1_223, %c0_224, %c0_225] : memref<4x64x64xbf16, #tpu.memory_space<vmem>>, vector<1x64x64xbf16>
    %322 = vector.shape_cast %321 : vector<1x64x64xbf16> to vector<64x64xbf16>
    %cst_226 = arith.constant dense<0.000000e+00> : vector<8x64xf32>
    %323 = tpu.matmul %308, %322, %cst_226 {dimension_numbers = #tpu.dot_dimension_numbers<[1], [0], [0], [1], [0, 0, 1, 1], [], []>} : vector<8x64xbf16>, vector<64x64xbf16>, vector<8x64xf32> -> vector<8x64xf32>
    %324 = arith.addf %320, %323 : vector<8x64xf32>
    %c2_227 = arith.constant 2 : index
    %c0_228 = arith.constant 0 : index
    %c0_229 = arith.constant 0 : index
    %325 = vector.load %arg4[%c2_227, %c0_228, %c0_229] : memref<4x64x64xbf16, #tpu.memory_space<vmem>>, vector<1x64x64xbf16>
    %326 = vector.shape_cast %325 : vector<1x64x64xbf16> to vector<64x64xbf16>
    %cst_230 = arith.constant dense<0.000000e+00> : vector<8x64xf32>
    %327 = tpu.matmul %307, %326, %cst_230 {dimension_numbers = #tpu.dot_dimension_numbers<[1], [0], [0], [1], [0, 0, 1, 1], [], []>} : vector<8x64xbf16>, vector<64x64xbf16>, vector<8x64xf32> -> vector<8x64xf32>
    %328 = arith.addf %53, %327 : vector<8x64xf32>
    %c2_231 = arith.constant 2 : index
    %c0_232 = arith.constant 0 : index
    %c0_233 = arith.constant 0 : index
    %329 = vector.load %arg5[%c2_231, %c0_232, %c0_233] : memref<4x64x64xbf16, #tpu.memory_space<vmem>>, vector<1x64x64xbf16>
    %330 = vector.shape_cast %329 : vector<1x64x64xbf16> to vector<64x64xbf16>
    %cst_234 = arith.constant dense<0.000000e+00> : vector<8x64xf32>
    %331 = tpu.matmul %308, %330, %cst_234 {dimension_numbers = #tpu.dot_dimension_numbers<[1], [0], [0], [1], [0, 0, 1, 1], [], []>} : vector<8x64xbf16>, vector<64x64xbf16>, vector<8x64xf32> -> vector<8x64xf32>
    %332 = arith.addf %328, %331 : vector<8x64xf32>
    %c3_235 = arith.constant 3 : index
    %c0_236 = arith.constant 0 : index
    %c0_237 = arith.constant 0 : index
    %333 = vector.load %arg4[%c3_235, %c0_236, %c0_237] : memref<4x64x64xbf16, #tpu.memory_space<vmem>>, vector<1x64x64xbf16>
    %334 = vector.shape_cast %333 : vector<1x64x64xbf16> to vector<64x64xbf16>
    %cst_238 = arith.constant dense<0.000000e+00> : vector<8x64xf32>
    %335 = tpu.matmul %307, %334, %cst_238 {dimension_numbers = #tpu.dot_dimension_numbers<[1], [0], [0], [1], [0, 0, 1, 1], [], []>} : vector<8x64xbf16>, vector<64x64xbf16>, vector<8x64xf32> -> vector<8x64xf32>
    %336 = arith.addf %57, %335 : vector<8x64xf32>
    %c3_239 = arith.constant 3 : index
    %c0_240 = arith.constant 0 : index
    %c0_241 = arith.constant 0 : index
    %337 = vector.load %arg5[%c3_239, %c0_240, %c0_241] : memref<4x64x64xbf16, #tpu.memory_space<vmem>>, vector<1x64x64xbf16>
    %338 = vector.shape_cast %337 : vector<1x64x64xbf16> to vector<64x64xbf16>
    %cst_242 = arith.constant dense<0.000000e+00> : vector<8x64xf32>
    %339 = tpu.matmul %308, %338, %cst_242 {dimension_numbers = #tpu.dot_dimension_numbers<[1], [0], [0], [1], [0, 0, 1, 1], [], []>} : vector<8x64xbf16>, vector<64x64xbf16>, vector<8x64xf32> -> vector<8x64xf32>
    %340 = arith.addf %336, %339 : vector<8x64xf32>
    %341 = arith.negf %316 : vector<8x64xf32>
    %342 = math.exp %341 : vector<8x64xf32>
    %cst_243 = arith.constant 1.000000e+00 : f32
    %343 = vector.broadcast %cst_243 : f32 to vector<8x64xf32>
    %344 = arith.addf %343, %342 : vector<8x64xf32>
    %345 = arith.divf %343, %344 : vector<8x64xf32>
    %346 = arith.negf %324 : vector<8x64xf32>
    %347 = math.exp %346 : vector<8x64xf32>
    %cst_244 = arith.constant 1.000000e+00 : f32
    %348 = vector.broadcast %cst_244 : f32 to vector<8x64xf32>
    %349 = arith.addf %348, %347 : vector<8x64xf32>
    %350 = arith.divf %348, %349 : vector<8x64xf32>
    %351 = math.tanh %332 : vector<8x64xf32>
    %352 = arith.negf %340 : vector<8x64xf32>
    %353 = math.exp %352 : vector<8x64xf32>
    %cst_245 = arith.constant 1.000000e+00 : f32
    %354 = vector.broadcast %cst_245 : f32 to vector<8x64xf32>
    %355 = arith.addf %354, %353 : vector<8x64xf32>
    %356 = arith.divf %354, %355 : vector<8x64xf32>
    %357 = arith.mulf %350, %258 : vector<8x64xf32>
    %358 = arith.mulf %345, %351 : vector<8x64xf32>
    %359 = arith.addf %357, %358 : vector<8x64xf32>
    %360 = math.tanh %359 : vector<8x64xf32>
    %361 = arith.mulf %356, %360 : vector<8x64xf32>
    %362 = arith.truncf %306 : vector<8x64xf32> to vector<8x64xbf16>
    %c0_246 = arith.constant 0 : index
    %c24 = arith.constant 24 : index
    %c0_247 = arith.constant 0 : index
    %363 = vector.load %arg10[%c0_246, %c24, %c0_247] : memref<4x64x64xf32, #tpu.memory_space<vmem>>, vector<1x8x64xf32>
    %364 = vector.shape_cast %363 : vector<1x8x64xf32> to vector<8x64xf32>
    %c0_248 = arith.constant 0 : index
    %c0_249 = arith.constant 0 : index
    %c0_250 = arith.constant 0 : index
    %365 = vector.load %arg3[%c0_248, %c0_249, %c0_250] : memref<4x64x64xbf16, #tpu.memory_space<vmem>>, vector<1x64x64xbf16>
    %366 = vector.shape_cast %365 : vector<1x64x64xbf16> to vector<64x64xbf16>
    %cst_251 = arith.constant dense<0.000000e+00> : vector<8x64xf32>
    %367 = tpu.matmul %362, %366, %cst_251 {dimension_numbers = #tpu.dot_dimension_numbers<[1], [0], [0], [1], [0, 0, 1, 1], [], []>} : vector<8x64xbf16>, vector<64x64xbf16>, vector<8x64xf32> -> vector<8x64xf32>
    %368 = arith.addf %364, %367 : vector<8x64xf32>
    %c1_252 = arith.constant 1 : index
    %c24_253 = arith.constant 24 : index
    %c0_254 = arith.constant 0 : index
    %369 = vector.load %arg10[%c1_252, %c24_253, %c0_254] : memref<4x64x64xf32, #tpu.memory_space<vmem>>, vector<1x8x64xf32>
    %370 = vector.shape_cast %369 : vector<1x8x64xf32> to vector<8x64xf32>
    %c1_255 = arith.constant 1 : index
    %c0_256 = arith.constant 0 : index
    %c0_257 = arith.constant 0 : index
    %371 = vector.load %arg3[%c1_255, %c0_256, %c0_257] : memref<4x64x64xbf16, #tpu.memory_space<vmem>>, vector<1x64x64xbf16>
    %372 = vector.shape_cast %371 : vector<1x64x64xbf16> to vector<64x64xbf16>
    %cst_258 = arith.constant dense<0.000000e+00> : vector<8x64xf32>
    %373 = tpu.matmul %362, %372, %cst_258 {dimension_numbers = #tpu.dot_dimension_numbers<[1], [0], [0], [1], [0, 0, 1, 1], [], []>} : vector<8x64xbf16>, vector<64x64xbf16>, vector<8x64xf32> -> vector<8x64xf32>
    %374 = arith.addf %370, %373 : vector<8x64xf32>
    %c2_259 = arith.constant 2 : index
    %c24_260 = arith.constant 24 : index
    %c0_261 = arith.constant 0 : index
    %375 = vector.load %arg10[%c2_259, %c24_260, %c0_261] : memref<4x64x64xf32, #tpu.memory_space<vmem>>, vector<1x8x64xf32>
    %376 = vector.shape_cast %375 : vector<1x8x64xf32> to vector<8x64xf32>
    %c2_262 = arith.constant 2 : index
    %c0_263 = arith.constant 0 : index
    %c0_264 = arith.constant 0 : index
    %377 = vector.load %arg3[%c2_262, %c0_263, %c0_264] : memref<4x64x64xbf16, #tpu.memory_space<vmem>>, vector<1x64x64xbf16>
    %378 = vector.shape_cast %377 : vector<1x64x64xbf16> to vector<64x64xbf16>
    %cst_265 = arith.constant dense<0.000000e+00> : vector<8x64xf32>
    %379 = tpu.matmul %362, %378, %cst_265 {dimension_numbers = #tpu.dot_dimension_numbers<[1], [0], [0], [1], [0, 0, 1, 1], [], []>} : vector<8x64xbf16>, vector<64x64xbf16>, vector<8x64xf32> -> vector<8x64xf32>
    %380 = arith.addf %376, %379 : vector<8x64xf32>
    %c3_266 = arith.constant 3 : index
    %c24_267 = arith.constant 24 : index
    %c0_268 = arith.constant 0 : index
    %381 = vector.load %arg10[%c3_266, %c24_267, %c0_268] : memref<4x64x64xf32, #tpu.memory_space<vmem>>, vector<1x8x64xf32>
    %382 = vector.shape_cast %381 : vector<1x8x64xf32> to vector<8x64xf32>
    %c3_269 = arith.constant 3 : index
    %c0_270 = arith.constant 0 : index
    %c0_271 = arith.constant 0 : index
    %383 = vector.load %arg3[%c3_269, %c0_270, %c0_271] : memref<4x64x64xbf16, #tpu.memory_space<vmem>>, vector<1x64x64xbf16>
    %384 = vector.shape_cast %383 : vector<1x64x64xbf16> to vector<64x64xbf16>
    %cst_272 = arith.constant dense<0.000000e+00> : vector<8x64xf32>
    %385 = tpu.matmul %362, %384, %cst_272 {dimension_numbers = #tpu.dot_dimension_numbers<[1], [0], [0], [1], [0, 0, 1, 1], [], []>} : vector<8x64xbf16>, vector<64x64xbf16>, vector<8x64xf32> -> vector<8x64xf32>
    %386 = arith.addf %382, %385 : vector<8x64xf32>
    %387 = arith.negf %368 : vector<8x64xf32>
    %388 = math.exp %387 : vector<8x64xf32>
    %cst_273 = arith.constant 1.000000e+00 : f32
    %389 = vector.broadcast %cst_273 : f32 to vector<8x64xf32>
    %390 = arith.addf %389, %388 : vector<8x64xf32>
    %391 = arith.divf %389, %390 : vector<8x64xf32>
    %392 = arith.negf %374 : vector<8x64xf32>
    %393 = math.exp %392 : vector<8x64xf32>
    %cst_274 = arith.constant 1.000000e+00 : f32
    %394 = vector.broadcast %cst_274 : f32 to vector<8x64xf32>
    %395 = arith.addf %394, %393 : vector<8x64xf32>
    %396 = arith.divf %394, %395 : vector<8x64xf32>
    %397 = math.tanh %380 : vector<8x64xf32>
    %398 = arith.negf %386 : vector<8x64xf32>
    %399 = math.exp %398 : vector<8x64xf32>
    %cst_275 = arith.constant 1.000000e+00 : f32
    %400 = vector.broadcast %cst_275 : f32 to vector<8x64xf32>
    %401 = arith.addf %400, %399 : vector<8x64xf32>
    %402 = arith.divf %400, %401 : vector<8x64xf32>
    %403 = arith.mulf %396, %304 : vector<8x64xf32>
    %404 = arith.mulf %391, %397 : vector<8x64xf32>
    %405 = arith.addf %403, %404 : vector<8x64xf32>
    %406 = math.tanh %405 : vector<8x64xf32>
    %407 = arith.mulf %402, %406 : vector<8x64xf32>
    %408 = arith.truncf %407 : vector<8x64xf32> to vector<8x64xbf16>
    %409 = arith.truncf %361 : vector<8x64xf32> to vector<8x64xbf16>
    %c0_276 = arith.constant 0 : index
    %c0_277 = arith.constant 0 : index
    %c0_278 = arith.constant 0 : index
    %410 = vector.load %arg4[%c0_276, %c0_277, %c0_278] : memref<4x64x64xbf16, #tpu.memory_space<vmem>>, vector<1x64x64xbf16>
    %411 = vector.shape_cast %410 : vector<1x64x64xbf16> to vector<64x64xbf16>
    %cst_279 = arith.constant dense<0.000000e+00> : vector<8x64xf32>
    %412 = tpu.matmul %408, %411, %cst_279 {dimension_numbers = #tpu.dot_dimension_numbers<[1], [0], [0], [1], [0, 0, 1, 1], [], []>} : vector<8x64xbf16>, vector<64x64xbf16>, vector<8x64xf32> -> vector<8x64xf32>
    %413 = arith.addf %45, %412 : vector<8x64xf32>
    %c0_280 = arith.constant 0 : index
    %c0_281 = arith.constant 0 : index
    %c0_282 = arith.constant 0 : index
    %414 = vector.load %arg5[%c0_280, %c0_281, %c0_282] : memref<4x64x64xbf16, #tpu.memory_space<vmem>>, vector<1x64x64xbf16>
    %415 = vector.shape_cast %414 : vector<1x64x64xbf16> to vector<64x64xbf16>
    %cst_283 = arith.constant dense<0.000000e+00> : vector<8x64xf32>
    %416 = tpu.matmul %409, %415, %cst_283 {dimension_numbers = #tpu.dot_dimension_numbers<[1], [0], [0], [1], [0, 0, 1, 1], [], []>} : vector<8x64xbf16>, vector<64x64xbf16>, vector<8x64xf32> -> vector<8x64xf32>
    %417 = arith.addf %413, %416 : vector<8x64xf32>
    %c1_284 = arith.constant 1 : index
    %c0_285 = arith.constant 0 : index
    %c0_286 = arith.constant 0 : index
    %418 = vector.load %arg4[%c1_284, %c0_285, %c0_286] : memref<4x64x64xbf16, #tpu.memory_space<vmem>>, vector<1x64x64xbf16>
    %419 = vector.shape_cast %418 : vector<1x64x64xbf16> to vector<64x64xbf16>
    %cst_287 = arith.constant dense<0.000000e+00> : vector<8x64xf32>
    %420 = tpu.matmul %408, %419, %cst_287 {dimension_numbers = #tpu.dot_dimension_numbers<[1], [0], [0], [1], [0, 0, 1, 1], [], []>} : vector<8x64xbf16>, vector<64x64xbf16>, vector<8x64xf32> -> vector<8x64xf32>
    %421 = arith.addf %49, %420 : vector<8x64xf32>
    %c1_288 = arith.constant 1 : index
    %c0_289 = arith.constant 0 : index
    %c0_290 = arith.constant 0 : index
    %422 = vector.load %arg5[%c1_288, %c0_289, %c0_290] : memref<4x64x64xbf16, #tpu.memory_space<vmem>>, vector<1x64x64xbf16>
    %423 = vector.shape_cast %422 : vector<1x64x64xbf16> to vector<64x64xbf16>
    %cst_291 = arith.constant dense<0.000000e+00> : vector<8x64xf32>
    %424 = tpu.matmul %409, %423, %cst_291 {dimension_numbers = #tpu.dot_dimension_numbers<[1], [0], [0], [1], [0, 0, 1, 1], [], []>} : vector<8x64xbf16>, vector<64x64xbf16>, vector<8x64xf32> -> vector<8x64xf32>
    %425 = arith.addf %421, %424 : vector<8x64xf32>
    %c2_292 = arith.constant 2 : index
    %c0_293 = arith.constant 0 : index
    %c0_294 = arith.constant 0 : index
    %426 = vector.load %arg4[%c2_292, %c0_293, %c0_294] : memref<4x64x64xbf16, #tpu.memory_space<vmem>>, vector<1x64x64xbf16>
    %427 = vector.shape_cast %426 : vector<1x64x64xbf16> to vector<64x64xbf16>
    %cst_295 = arith.constant dense<0.000000e+00> : vector<8x64xf32>
    %428 = tpu.matmul %408, %427, %cst_295 {dimension_numbers = #tpu.dot_dimension_numbers<[1], [0], [0], [1], [0, 0, 1, 1], [], []>} : vector<8x64xbf16>, vector<64x64xbf16>, vector<8x64xf32> -> vector<8x64xf32>
    %429 = arith.addf %53, %428 : vector<8x64xf32>
    %c2_296 = arith.constant 2 : index
    %c0_297 = arith.constant 0 : index
    %c0_298 = arith.constant 0 : index
    %430 = vector.load %arg5[%c2_296, %c0_297, %c0_298] : memref<4x64x64xbf16, #tpu.memory_space<vmem>>, vector<1x64x64xbf16>
    %431 = vector.shape_cast %430 : vector<1x64x64xbf16> to vector<64x64xbf16>
    %cst_299 = arith.constant dense<0.000000e+00> : vector<8x64xf32>
    %432 = tpu.matmul %409, %431, %cst_299 {dimension_numbers = #tpu.dot_dimension_numbers<[1], [0], [0], [1], [0, 0, 1, 1], [], []>} : vector<8x64xbf16>, vector<64x64xbf16>, vector<8x64xf32> -> vector<8x64xf32>
    %433 = arith.addf %429, %432 : vector<8x64xf32>
    %c3_300 = arith.constant 3 : index
    %c0_301 = arith.constant 0 : index
    %c0_302 = arith.constant 0 : index
    %434 = vector.load %arg4[%c3_300, %c0_301, %c0_302] : memref<4x64x64xbf16, #tpu.memory_space<vmem>>, vector<1x64x64xbf16>
    %435 = vector.shape_cast %434 : vector<1x64x64xbf16> to vector<64x64xbf16>
    %cst_303 = arith.constant dense<0.000000e+00> : vector<8x64xf32>
    %436 = tpu.matmul %408, %435, %cst_303 {dimension_numbers = #tpu.dot_dimension_numbers<[1], [0], [0], [1], [0, 0, 1, 1], [], []>} : vector<8x64xbf16>, vector<64x64xbf16>, vector<8x64xf32> -> vector<8x64xf32>
    %437 = arith.addf %57, %436 : vector<8x64xf32>
    %c3_304 = arith.constant 3 : index
    %c0_305 = arith.constant 0 : index
    %c0_306 = arith.constant 0 : index
    %438 = vector.load %arg5[%c3_304, %c0_305, %c0_306] : memref<4x64x64xbf16, #tpu.memory_space<vmem>>, vector<1x64x64xbf16>
    %439 = vector.shape_cast %438 : vector<1x64x64xbf16> to vector<64x64xbf16>
    %cst_307 = arith.constant dense<0.000000e+00> : vector<8x64xf32>
    %440 = tpu.matmul %409, %439, %cst_307 {dimension_numbers = #tpu.dot_dimension_numbers<[1], [0], [0], [1], [0, 0, 1, 1], [], []>} : vector<8x64xbf16>, vector<64x64xbf16>, vector<8x64xf32> -> vector<8x64xf32>
    %441 = arith.addf %437, %440 : vector<8x64xf32>
    %442 = arith.negf %417 : vector<8x64xf32>
    %443 = math.exp %442 : vector<8x64xf32>
    %cst_308 = arith.constant 1.000000e+00 : f32
    %444 = vector.broadcast %cst_308 : f32 to vector<8x64xf32>
    %445 = arith.addf %444, %443 : vector<8x64xf32>
    %446 = arith.divf %444, %445 : vector<8x64xf32>
    %447 = arith.negf %425 : vector<8x64xf32>
    %448 = math.exp %447 : vector<8x64xf32>
    %cst_309 = arith.constant 1.000000e+00 : f32
    %449 = vector.broadcast %cst_309 : f32 to vector<8x64xf32>
    %450 = arith.addf %449, %448 : vector<8x64xf32>
    %451 = arith.divf %449, %450 : vector<8x64xf32>
    %452 = math.tanh %433 : vector<8x64xf32>
    %453 = arith.negf %441 : vector<8x64xf32>
    %454 = math.exp %453 : vector<8x64xf32>
    %cst_310 = arith.constant 1.000000e+00 : f32
    %455 = vector.broadcast %cst_310 : f32 to vector<8x64xf32>
    %456 = arith.addf %455, %454 : vector<8x64xf32>
    %457 = arith.divf %455, %456 : vector<8x64xf32>
    %458 = arith.mulf %451, %359 : vector<8x64xf32>
    %459 = arith.mulf %446, %452 : vector<8x64xf32>
    %460 = arith.addf %458, %459 : vector<8x64xf32>
    %461 = math.tanh %460 : vector<8x64xf32>
    %462 = arith.mulf %457, %461 : vector<8x64xf32>
    %463 = arith.truncf %407 : vector<8x64xf32> to vector<8x64xbf16>
    %c0_311 = arith.constant 0 : index
    %c32 = arith.constant 32 : index
    %c0_312 = arith.constant 0 : index
    %464 = vector.load %arg10[%c0_311, %c32, %c0_312] : memref<4x64x64xf32, #tpu.memory_space<vmem>>, vector<1x8x64xf32>
    %465 = vector.shape_cast %464 : vector<1x8x64xf32> to vector<8x64xf32>
    %c0_313 = arith.constant 0 : index
    %c0_314 = arith.constant 0 : index
    %c0_315 = arith.constant 0 : index
    %466 = vector.load %arg3[%c0_313, %c0_314, %c0_315] : memref<4x64x64xbf16, #tpu.memory_space<vmem>>, vector<1x64x64xbf16>
    %467 = vector.shape_cast %466 : vector<1x64x64xbf16> to vector<64x64xbf16>
    %cst_316 = arith.constant dense<0.000000e+00> : vector<8x64xf32>
    %468 = tpu.matmul %463, %467, %cst_316 {dimension_numbers = #tpu.dot_dimension_numbers<[1], [0], [0], [1], [0, 0, 1, 1], [], []>} : vector<8x64xbf16>, vector<64x64xbf16>, vector<8x64xf32> -> vector<8x64xf32>
    %469 = arith.addf %465, %468 : vector<8x64xf32>
    %c1_317 = arith.constant 1 : index
    %c32_318 = arith.constant 32 : index
    %c0_319 = arith.constant 0 : index
    %470 = vector.load %arg10[%c1_317, %c32_318, %c0_319] : memref<4x64x64xf32, #tpu.memory_space<vmem>>, vector<1x8x64xf32>
    %471 = vector.shape_cast %470 : vector<1x8x64xf32> to vector<8x64xf32>
    %c1_320 = arith.constant 1 : index
    %c0_321 = arith.constant 0 : index
    %c0_322 = arith.constant 0 : index
    %472 = vector.load %arg3[%c1_320, %c0_321, %c0_322] : memref<4x64x64xbf16, #tpu.memory_space<vmem>>, vector<1x64x64xbf16>
    %473 = vector.shape_cast %472 : vector<1x64x64xbf16> to vector<64x64xbf16>
    %cst_323 = arith.constant dense<0.000000e+00> : vector<8x64xf32>
    %474 = tpu.matmul %463, %473, %cst_323 {dimension_numbers = #tpu.dot_dimension_numbers<[1], [0], [0], [1], [0, 0, 1, 1], [], []>} : vector<8x64xbf16>, vector<64x64xbf16>, vector<8x64xf32> -> vector<8x64xf32>
    %475 = arith.addf %471, %474 : vector<8x64xf32>
    %c2_324 = arith.constant 2 : index
    %c32_325 = arith.constant 32 : index
    %c0_326 = arith.constant 0 : index
    %476 = vector.load %arg10[%c2_324, %c32_325, %c0_326] : memref<4x64x64xf32, #tpu.memory_space<vmem>>, vector<1x8x64xf32>
    %477 = vector.shape_cast %476 : vector<1x8x64xf32> to vector<8x64xf32>
    %c2_327 = arith.constant 2 : index
    %c0_328 = arith.constant 0 : index
    %c0_329 = arith.constant 0 : index
    %478 = vector.load %arg3[%c2_327, %c0_328, %c0_329] : memref<4x64x64xbf16, #tpu.memory_space<vmem>>, vector<1x64x64xbf16>
    %479 = vector.shape_cast %478 : vector<1x64x64xbf16> to vector<64x64xbf16>
    %cst_330 = arith.constant dense<0.000000e+00> : vector<8x64xf32>
    %480 = tpu.matmul %463, %479, %cst_330 {dimension_numbers = #tpu.dot_dimension_numbers<[1], [0], [0], [1], [0, 0, 1, 1], [], []>} : vector<8x64xbf16>, vector<64x64xbf16>, vector<8x64xf32> -> vector<8x64xf32>
    %481 = arith.addf %477, %480 : vector<8x64xf32>
    %c3_331 = arith.constant 3 : index
    %c32_332 = arith.constant 32 : index
    %c0_333 = arith.constant 0 : index
    %482 = vector.load %arg10[%c3_331, %c32_332, %c0_333] : memref<4x64x64xf32, #tpu.memory_space<vmem>>, vector<1x8x64xf32>
    %483 = vector.shape_cast %482 : vector<1x8x64xf32> to vector<8x64xf32>
    %c3_334 = arith.constant 3 : index
    %c0_335 = arith.constant 0 : index
    %c0_336 = arith.constant 0 : index
    %484 = vector.load %arg3[%c3_334, %c0_335, %c0_336] : memref<4x64x64xbf16, #tpu.memory_space<vmem>>, vector<1x64x64xbf16>
    %485 = vector.shape_cast %484 : vector<1x64x64xbf16> to vector<64x64xbf16>
    %cst_337 = arith.constant dense<0.000000e+00> : vector<8x64xf32>
    %486 = tpu.matmul %463, %485, %cst_337 {dimension_numbers = #tpu.dot_dimension_numbers<[1], [0], [0], [1], [0, 0, 1, 1], [], []>} : vector<8x64xbf16>, vector<64x64xbf16>, vector<8x64xf32> -> vector<8x64xf32>
    %487 = arith.addf %483, %486 : vector<8x64xf32>
    %488 = arith.negf %469 : vector<8x64xf32>
    %489 = math.exp %488 : vector<8x64xf32>
    %cst_338 = arith.constant 1.000000e+00 : f32
    %490 = vector.broadcast %cst_338 : f32 to vector<8x64xf32>
    %491 = arith.addf %490, %489 : vector<8x64xf32>
    %492 = arith.divf %490, %491 : vector<8x64xf32>
    %493 = arith.negf %475 : vector<8x64xf32>
    %494 = math.exp %493 : vector<8x64xf32>
    %cst_339 = arith.constant 1.000000e+00 : f32
    %495 = vector.broadcast %cst_339 : f32 to vector<8x64xf32>
    %496 = arith.addf %495, %494 : vector<8x64xf32>
    %497 = arith.divf %495, %496 : vector<8x64xf32>
    %498 = math.tanh %481 : vector<8x64xf32>
    %499 = arith.negf %487 : vector<8x64xf32>
    %500 = math.exp %499 : vector<8x64xf32>
    %cst_340 = arith.constant 1.000000e+00 : f32
    %501 = vector.broadcast %cst_340 : f32 to vector<8x64xf32>
    %502 = arith.addf %501, %500 : vector<8x64xf32>
    %503 = arith.divf %501, %502 : vector<8x64xf32>
    %504 = arith.mulf %497, %405 : vector<8x64xf32>
    %505 = arith.mulf %492, %498 : vector<8x64xf32>
    %506 = arith.addf %504, %505 : vector<8x64xf32>
    %507 = math.tanh %506 : vector<8x64xf32>
    %508 = arith.mulf %503, %507 : vector<8x64xf32>
    %509 = arith.truncf %508 : vector<8x64xf32> to vector<8x64xbf16>
    %510 = arith.truncf %462 : vector<8x64xf32> to vector<8x64xbf16>
    %c0_341 = arith.constant 0 : index
    %c0_342 = arith.constant 0 : index
    %c0_343 = arith.constant 0 : index
    %511 = vector.load %arg4[%c0_341, %c0_342, %c0_343] : memref<4x64x64xbf16, #tpu.memory_space<vmem>>, vector<1x64x64xbf16>
    %512 = vector.shape_cast %511 : vector<1x64x64xbf16> to vector<64x64xbf16>
    %cst_344 = arith.constant dense<0.000000e+00> : vector<8x64xf32>
    %513 = tpu.matmul %509, %512, %cst_344 {dimension_numbers = #tpu.dot_dimension_numbers<[1], [0], [0], [1], [0, 0, 1, 1], [], []>} : vector<8x64xbf16>, vector<64x64xbf16>, vector<8x64xf32> -> vector<8x64xf32>
    %514 = arith.addf %45, %513 : vector<8x64xf32>
    %c0_345 = arith.constant 0 : index
    %c0_346 = arith.constant 0 : index
    %c0_347 = arith.constant 0 : index
    %515 = vector.load %arg5[%c0_345, %c0_346, %c0_347] : memref<4x64x64xbf16, #tpu.memory_space<vmem>>, vector<1x64x64xbf16>
    %516 = vector.shape_cast %515 : vector<1x64x64xbf16> to vector<64x64xbf16>
    %cst_348 = arith.constant dense<0.000000e+00> : vector<8x64xf32>
    %517 = tpu.matmul %510, %516, %cst_348 {dimension_numbers = #tpu.dot_dimension_numbers<[1], [0], [0], [1], [0, 0, 1, 1], [], []>} : vector<8x64xbf16>, vector<64x64xbf16>, vector<8x64xf32> -> vector<8x64xf32>
    %518 = arith.addf %514, %517 : vector<8x64xf32>
    %c1_349 = arith.constant 1 : index
    %c0_350 = arith.constant 0 : index
    %c0_351 = arith.constant 0 : index
    %519 = vector.load %arg4[%c1_349, %c0_350, %c0_351] : memref<4x64x64xbf16, #tpu.memory_space<vmem>>, vector<1x64x64xbf16>
    %520 = vector.shape_cast %519 : vector<1x64x64xbf16> to vector<64x64xbf16>
    %cst_352 = arith.constant dense<0.000000e+00> : vector<8x64xf32>
    %521 = tpu.matmul %509, %520, %cst_352 {dimension_numbers = #tpu.dot_dimension_numbers<[1], [0], [0], [1], [0, 0, 1, 1], [], []>} : vector<8x64xbf16>, vector<64x64xbf16>, vector<8x64xf32> -> vector<8x64xf32>
    %522 = arith.addf %49, %521 : vector<8x64xf32>
    %c1_353 = arith.constant 1 : index
    %c0_354 = arith.constant 0 : index
    %c0_355 = arith.constant 0 : index
    %523 = vector.load %arg5[%c1_353, %c0_354, %c0_355] : memref<4x64x64xbf16, #tpu.memory_space<vmem>>, vector<1x64x64xbf16>
    %524 = vector.shape_cast %523 : vector<1x64x64xbf16> to vector<64x64xbf16>
    %cst_356 = arith.constant dense<0.000000e+00> : vector<8x64xf32>
    %525 = tpu.matmul %510, %524, %cst_356 {dimension_numbers = #tpu.dot_dimension_numbers<[1], [0], [0], [1], [0, 0, 1, 1], [], []>} : vector<8x64xbf16>, vector<64x64xbf16>, vector<8x64xf32> -> vector<8x64xf32>
    %526 = arith.addf %522, %525 : vector<8x64xf32>
    %c2_357 = arith.constant 2 : index
    %c0_358 = arith.constant 0 : index
    %c0_359 = arith.constant 0 : index
    %527 = vector.load %arg4[%c2_357, %c0_358, %c0_359] : memref<4x64x64xbf16, #tpu.memory_space<vmem>>, vector<1x64x64xbf16>
    %528 = vector.shape_cast %527 : vector<1x64x64xbf16> to vector<64x64xbf16>
    %cst_360 = arith.constant dense<0.000000e+00> : vector<8x64xf32>
    %529 = tpu.matmul %509, %528, %cst_360 {dimension_numbers = #tpu.dot_dimension_numbers<[1], [0], [0], [1], [0, 0, 1, 1], [], []>} : vector<8x64xbf16>, vector<64x64xbf16>, vector<8x64xf32> -> vector<8x64xf32>
    %530 = arith.addf %53, %529 : vector<8x64xf32>
    %c2_361 = arith.constant 2 : index
    %c0_362 = arith.constant 0 : index
    %c0_363 = arith.constant 0 : index
    %531 = vector.load %arg5[%c2_361, %c0_362, %c0_363] : memref<4x64x64xbf16, #tpu.memory_space<vmem>>, vector<1x64x64xbf16>
    %532 = vector.shape_cast %531 : vector<1x64x64xbf16> to vector<64x64xbf16>
    %cst_364 = arith.constant dense<0.000000e+00> : vector<8x64xf32>
    %533 = tpu.matmul %510, %532, %cst_364 {dimension_numbers = #tpu.dot_dimension_numbers<[1], [0], [0], [1], [0, 0, 1, 1], [], []>} : vector<8x64xbf16>, vector<64x64xbf16>, vector<8x64xf32> -> vector<8x64xf32>
    %534 = arith.addf %530, %533 : vector<8x64xf32>
    %c3_365 = arith.constant 3 : index
    %c0_366 = arith.constant 0 : index
    %c0_367 = arith.constant 0 : index
    %535 = vector.load %arg4[%c3_365, %c0_366, %c0_367] : memref<4x64x64xbf16, #tpu.memory_space<vmem>>, vector<1x64x64xbf16>
    %536 = vector.shape_cast %535 : vector<1x64x64xbf16> to vector<64x64xbf16>
    %cst_368 = arith.constant dense<0.000000e+00> : vector<8x64xf32>
    %537 = tpu.matmul %509, %536, %cst_368 {dimension_numbers = #tpu.dot_dimension_numbers<[1], [0], [0], [1], [0, 0, 1, 1], [], []>} : vector<8x64xbf16>, vector<64x64xbf16>, vector<8x64xf32> -> vector<8x64xf32>
    %538 = arith.addf %57, %537 : vector<8x64xf32>
    %c3_369 = arith.constant 3 : index
    %c0_370 = arith.constant 0 : index
    %c0_371 = arith.constant 0 : index
    %539 = vector.load %arg5[%c3_369, %c0_370, %c0_371] : memref<4x64x64xbf16, #tpu.memory_space<vmem>>, vector<1x64x64xbf16>
    %540 = vector.shape_cast %539 : vector<1x64x64xbf16> to vector<64x64xbf16>
    %cst_372 = arith.constant dense<0.000000e+00> : vector<8x64xf32>
    %541 = tpu.matmul %510, %540, %cst_372 {dimension_numbers = #tpu.dot_dimension_numbers<[1], [0], [0], [1], [0, 0, 1, 1], [], []>} : vector<8x64xbf16>, vector<64x64xbf16>, vector<8x64xf32> -> vector<8x64xf32>
    %542 = arith.addf %538, %541 : vector<8x64xf32>
    %543 = arith.negf %518 : vector<8x64xf32>
    %544 = math.exp %543 : vector<8x64xf32>
    %cst_373 = arith.constant 1.000000e+00 : f32
    %545 = vector.broadcast %cst_373 : f32 to vector<8x64xf32>
    %546 = arith.addf %545, %544 : vector<8x64xf32>
    %547 = arith.divf %545, %546 : vector<8x64xf32>
    %548 = arith.negf %526 : vector<8x64xf32>
    %549 = math.exp %548 : vector<8x64xf32>
    %cst_374 = arith.constant 1.000000e+00 : f32
    %550 = vector.broadcast %cst_374 : f32 to vector<8x64xf32>
    %551 = arith.addf %550, %549 : vector<8x64xf32>
    %552 = arith.divf %550, %551 : vector<8x64xf32>
    %553 = math.tanh %534 : vector<8x64xf32>
    %554 = arith.negf %542 : vector<8x64xf32>
    %555 = math.exp %554 : vector<8x64xf32>
    %cst_375 = arith.constant 1.000000e+00 : f32
    %556 = vector.broadcast %cst_375 : f32 to vector<8x64xf32>
    %557 = arith.addf %556, %555 : vector<8x64xf32>
    %558 = arith.divf %556, %557 : vector<8x64xf32>
    %559 = arith.mulf %552, %460 : vector<8x64xf32>
    %560 = arith.mulf %547, %553 : vector<8x64xf32>
    %561 = arith.addf %559, %560 : vector<8x64xf32>
    %562 = math.tanh %561 : vector<8x64xf32>
    %563 = arith.mulf %558, %562 : vector<8x64xf32>
    %564 = arith.truncf %508 : vector<8x64xf32> to vector<8x64xbf16>
    %c0_376 = arith.constant 0 : index
    %c40 = arith.constant 40 : index
    %c0_377 = arith.constant 0 : index
    %565 = vector.load %arg10[%c0_376, %c40, %c0_377] : memref<4x64x64xf32, #tpu.memory_space<vmem>>, vector<1x8x64xf32>
    %566 = vector.shape_cast %565 : vector<1x8x64xf32> to vector<8x64xf32>
    %c0_378 = arith.constant 0 : index
    %c0_379 = arith.constant 0 : index
    %c0_380 = arith.constant 0 : index
    %567 = vector.load %arg3[%c0_378, %c0_379, %c0_380] : memref<4x64x64xbf16, #tpu.memory_space<vmem>>, vector<1x64x64xbf16>
    %568 = vector.shape_cast %567 : vector<1x64x64xbf16> to vector<64x64xbf16>
    %cst_381 = arith.constant dense<0.000000e+00> : vector<8x64xf32>
    %569 = tpu.matmul %564, %568, %cst_381 {dimension_numbers = #tpu.dot_dimension_numbers<[1], [0], [0], [1], [0, 0, 1, 1], [], []>} : vector<8x64xbf16>, vector<64x64xbf16>, vector<8x64xf32> -> vector<8x64xf32>
    %570 = arith.addf %566, %569 : vector<8x64xf32>
    %c1_382 = arith.constant 1 : index
    %c40_383 = arith.constant 40 : index
    %c0_384 = arith.constant 0 : index
    %571 = vector.load %arg10[%c1_382, %c40_383, %c0_384] : memref<4x64x64xf32, #tpu.memory_space<vmem>>, vector<1x8x64xf32>
    %572 = vector.shape_cast %571 : vector<1x8x64xf32> to vector<8x64xf32>
    %c1_385 = arith.constant 1 : index
    %c0_386 = arith.constant 0 : index
    %c0_387 = arith.constant 0 : index
    %573 = vector.load %arg3[%c1_385, %c0_386, %c0_387] : memref<4x64x64xbf16, #tpu.memory_space<vmem>>, vector<1x64x64xbf16>
    %574 = vector.shape_cast %573 : vector<1x64x64xbf16> to vector<64x64xbf16>
    %cst_388 = arith.constant dense<0.000000e+00> : vector<8x64xf32>
    %575 = tpu.matmul %564, %574, %cst_388 {dimension_numbers = #tpu.dot_dimension_numbers<[1], [0], [0], [1], [0, 0, 1, 1], [], []>} : vector<8x64xbf16>, vector<64x64xbf16>, vector<8x64xf32> -> vector<8x64xf32>
    %576 = arith.addf %572, %575 : vector<8x64xf32>
    %c2_389 = arith.constant 2 : index
    %c40_390 = arith.constant 40 : index
    %c0_391 = arith.constant 0 : index
    %577 = vector.load %arg10[%c2_389, %c40_390, %c0_391] : memref<4x64x64xf32, #tpu.memory_space<vmem>>, vector<1x8x64xf32>
    %578 = vector.shape_cast %577 : vector<1x8x64xf32> to vector<8x64xf32>
    %c2_392 = arith.constant 2 : index
    %c0_393 = arith.constant 0 : index
    %c0_394 = arith.constant 0 : index
    %579 = vector.load %arg3[%c2_392, %c0_393, %c0_394] : memref<4x64x64xbf16, #tpu.memory_space<vmem>>, vector<1x64x64xbf16>
    %580 = vector.shape_cast %579 : vector<1x64x64xbf16> to vector<64x64xbf16>
    %cst_395 = arith.constant dense<0.000000e+00> : vector<8x64xf32>
    %581 = tpu.matmul %564, %580, %cst_395 {dimension_numbers = #tpu.dot_dimension_numbers<[1], [0], [0], [1], [0, 0, 1, 1], [], []>} : vector<8x64xbf16>, vector<64x64xbf16>, vector<8x64xf32> -> vector<8x64xf32>
    %582 = arith.addf %578, %581 : vector<8x64xf32>
    %c3_396 = arith.constant 3 : index
    %c40_397 = arith.constant 40 : index
    %c0_398 = arith.constant 0 : index
    %583 = vector.load %arg10[%c3_396, %c40_397, %c0_398] : memref<4x64x64xf32, #tpu.memory_space<vmem>>, vector<1x8x64xf32>
    %584 = vector.shape_cast %583 : vector<1x8x64xf32> to vector<8x64xf32>
    %c3_399 = arith.constant 3 : index
    %c0_400 = arith.constant 0 : index
    %c0_401 = arith.constant 0 : index
    %585 = vector.load %arg3[%c3_399, %c0_400, %c0_401] : memref<4x64x64xbf16, #tpu.memory_space<vmem>>, vector<1x64x64xbf16>
    %586 = vector.shape_cast %585 : vector<1x64x64xbf16> to vector<64x64xbf16>
    %cst_402 = arith.constant dense<0.000000e+00> : vector<8x64xf32>
    %587 = tpu.matmul %564, %586, %cst_402 {dimension_numbers = #tpu.dot_dimension_numbers<[1], [0], [0], [1], [0, 0, 1, 1], [], []>} : vector<8x64xbf16>, vector<64x64xbf16>, vector<8x64xf32> -> vector<8x64xf32>
    %588 = arith.addf %584, %587 : vector<8x64xf32>
    %589 = arith.negf %570 : vector<8x64xf32>
    %590 = math.exp %589 : vector<8x64xf32>
    %cst_403 = arith.constant 1.000000e+00 : f32
    %591 = vector.broadcast %cst_403 : f32 to vector<8x64xf32>
    %592 = arith.addf %591, %590 : vector<8x64xf32>
    %593 = arith.divf %591, %592 : vector<8x64xf32>
    %594 = arith.negf %576 : vector<8x64xf32>
    %595 = math.exp %594 : vector<8x64xf32>
    %cst_404 = arith.constant 1.000000e+00 : f32
    %596 = vector.broadcast %cst_404 : f32 to vector<8x64xf32>
    %597 = arith.addf %596, %595 : vector<8x64xf32>
    %598 = arith.divf %596, %597 : vector<8x64xf32>
    %599 = math.tanh %582 : vector<8x64xf32>
    %600 = arith.negf %588 : vector<8x64xf32>
    %601 = math.exp %600 : vector<8x64xf32>
    %cst_405 = arith.constant 1.000000e+00 : f32
    %602 = vector.broadcast %cst_405 : f32 to vector<8x64xf32>
    %603 = arith.addf %602, %601 : vector<8x64xf32>
    %604 = arith.divf %602, %603 : vector<8x64xf32>
    %605 = arith.mulf %598, %506 : vector<8x64xf32>
    %606 = arith.mulf %593, %599 : vector<8x64xf32>
    %607 = arith.addf %605, %606 : vector<8x64xf32>
    %608 = math.tanh %607 : vector<8x64xf32>
    %609 = arith.mulf %604, %608 : vector<8x64xf32>
    %610 = arith.truncf %609 : vector<8x64xf32> to vector<8x64xbf16>
    %611 = arith.truncf %563 : vector<8x64xf32> to vector<8x64xbf16>
    %c0_406 = arith.constant 0 : index
    %c0_407 = arith.constant 0 : index
    %c0_408 = arith.constant 0 : index
    %612 = vector.load %arg4[%c0_406, %c0_407, %c0_408] : memref<4x64x64xbf16, #tpu.memory_space<vmem>>, vector<1x64x64xbf16>
    %613 = vector.shape_cast %612 : vector<1x64x64xbf16> to vector<64x64xbf16>
    %cst_409 = arith.constant dense<0.000000e+00> : vector<8x64xf32>
    %614 = tpu.matmul %610, %613, %cst_409 {dimension_numbers = #tpu.dot_dimension_numbers<[1], [0], [0], [1], [0, 0, 1, 1], [], []>} : vector<8x64xbf16>, vector<64x64xbf16>, vector<8x64xf32> -> vector<8x64xf32>
    %615 = arith.addf %45, %614 : vector<8x64xf32>
    %c0_410 = arith.constant 0 : index
    %c0_411 = arith.constant 0 : index
    %c0_412 = arith.constant 0 : index
    %616 = vector.load %arg5[%c0_410, %c0_411, %c0_412] : memref<4x64x64xbf16, #tpu.memory_space<vmem>>, vector<1x64x64xbf16>
    %617 = vector.shape_cast %616 : vector<1x64x64xbf16> to vector<64x64xbf16>
    %cst_413 = arith.constant dense<0.000000e+00> : vector<8x64xf32>
    %618 = tpu.matmul %611, %617, %cst_413 {dimension_numbers = #tpu.dot_dimension_numbers<[1], [0], [0], [1], [0, 0, 1, 1], [], []>} : vector<8x64xbf16>, vector<64x64xbf16>, vector<8x64xf32> -> vector<8x64xf32>
    %619 = arith.addf %615, %618 : vector<8x64xf32>
    %c1_414 = arith.constant 1 : index
    %c0_415 = arith.constant 0 : index
    %c0_416 = arith.constant 0 : index
    %620 = vector.load %arg4[%c1_414, %c0_415, %c0_416] : memref<4x64x64xbf16, #tpu.memory_space<vmem>>, vector<1x64x64xbf16>
    %621 = vector.shape_cast %620 : vector<1x64x64xbf16> to vector<64x64xbf16>
    %cst_417 = arith.constant dense<0.000000e+00> : vector<8x64xf32>
    %622 = tpu.matmul %610, %621, %cst_417 {dimension_numbers = #tpu.dot_dimension_numbers<[1], [0], [0], [1], [0, 0, 1, 1], [], []>} : vector<8x64xbf16>, vector<64x64xbf16>, vector<8x64xf32> -> vector<8x64xf32>
    %623 = arith.addf %49, %622 : vector<8x64xf32>
    %c1_418 = arith.constant 1 : index
    %c0_419 = arith.constant 0 : index
    %c0_420 = arith.constant 0 : index
    %624 = vector.load %arg5[%c1_418, %c0_419, %c0_420] : memref<4x64x64xbf16, #tpu.memory_space<vmem>>, vector<1x64x64xbf16>
    %625 = vector.shape_cast %624 : vector<1x64x64xbf16> to vector<64x64xbf16>
    %cst_421 = arith.constant dense<0.000000e+00> : vector<8x64xf32>
    %626 = tpu.matmul %611, %625, %cst_421 {dimension_numbers = #tpu.dot_dimension_numbers<[1], [0], [0], [1], [0, 0, 1, 1], [], []>} : vector<8x64xbf16>, vector<64x64xbf16>, vector<8x64xf32> -> vector<8x64xf32>
    %627 = arith.addf %623, %626 : vector<8x64xf32>
    %c2_422 = arith.constant 2 : index
    %c0_423 = arith.constant 0 : index
    %c0_424 = arith.constant 0 : index
    %628 = vector.load %arg4[%c2_422, %c0_423, %c0_424] : memref<4x64x64xbf16, #tpu.memory_space<vmem>>, vector<1x64x64xbf16>
    %629 = vector.shape_cast %628 : vector<1x64x64xbf16> to vector<64x64xbf16>
    %cst_425 = arith.constant dense<0.000000e+00> : vector<8x64xf32>
    %630 = tpu.matmul %610, %629, %cst_425 {dimension_numbers = #tpu.dot_dimension_numbers<[1], [0], [0], [1], [0, 0, 1, 1], [], []>} : vector<8x64xbf16>, vector<64x64xbf16>, vector<8x64xf32> -> vector<8x64xf32>
    %631 = arith.addf %53, %630 : vector<8x64xf32>
    %c2_426 = arith.constant 2 : index
    %c0_427 = arith.constant 0 : index
    %c0_428 = arith.constant 0 : index
    %632 = vector.load %arg5[%c2_426, %c0_427, %c0_428] : memref<4x64x64xbf16, #tpu.memory_space<vmem>>, vector<1x64x64xbf16>
    %633 = vector.shape_cast %632 : vector<1x64x64xbf16> to vector<64x64xbf16>
    %cst_429 = arith.constant dense<0.000000e+00> : vector<8x64xf32>
    %634 = tpu.matmul %611, %633, %cst_429 {dimension_numbers = #tpu.dot_dimension_numbers<[1], [0], [0], [1], [0, 0, 1, 1], [], []>} : vector<8x64xbf16>, vector<64x64xbf16>, vector<8x64xf32> -> vector<8x64xf32>
    %635 = arith.addf %631, %634 : vector<8x64xf32>
    %c3_430 = arith.constant 3 : index
    %c0_431 = arith.constant 0 : index
    %c0_432 = arith.constant 0 : index
    %636 = vector.load %arg4[%c3_430, %c0_431, %c0_432] : memref<4x64x64xbf16, #tpu.memory_space<vmem>>, vector<1x64x64xbf16>
    %637 = vector.shape_cast %636 : vector<1x64x64xbf16> to vector<64x64xbf16>
    %cst_433 = arith.constant dense<0.000000e+00> : vector<8x64xf32>
    %638 = tpu.matmul %610, %637, %cst_433 {dimension_numbers = #tpu.dot_dimension_numbers<[1], [0], [0], [1], [0, 0, 1, 1], [], []>} : vector<8x64xbf16>, vector<64x64xbf16>, vector<8x64xf32> -> vector<8x64xf32>
    %639 = arith.addf %57, %638 : vector<8x64xf32>
    %c3_434 = arith.constant 3 : index
    %c0_435 = arith.constant 0 : index
    %c0_436 = arith.constant 0 : index
    %640 = vector.load %arg5[%c3_434, %c0_435, %c0_436] : memref<4x64x64xbf16, #tpu.memory_space<vmem>>, vector<1x64x64xbf16>
    %641 = vector.shape_cast %640 : vector<1x64x64xbf16> to vector<64x64xbf16>
    %cst_437 = arith.constant dense<0.000000e+00> : vector<8x64xf32>
    %642 = tpu.matmul %611, %641, %cst_437 {dimension_numbers = #tpu.dot_dimension_numbers<[1], [0], [0], [1], [0, 0, 1, 1], [], []>} : vector<8x64xbf16>, vector<64x64xbf16>, vector<8x64xf32> -> vector<8x64xf32>
    %643 = arith.addf %639, %642 : vector<8x64xf32>
    %644 = arith.negf %619 : vector<8x64xf32>
    %645 = math.exp %644 : vector<8x64xf32>
    %cst_438 = arith.constant 1.000000e+00 : f32
    %646 = vector.broadcast %cst_438 : f32 to vector<8x64xf32>
    %647 = arith.addf %646, %645 : vector<8x64xf32>
    %648 = arith.divf %646, %647 : vector<8x64xf32>
    %649 = arith.negf %627 : vector<8x64xf32>
    %650 = math.exp %649 : vector<8x64xf32>
    %cst_439 = arith.constant 1.000000e+00 : f32
    %651 = vector.broadcast %cst_439 : f32 to vector<8x64xf32>
    %652 = arith.addf %651, %650 : vector<8x64xf32>
    %653 = arith.divf %651, %652 : vector<8x64xf32>
    %654 = math.tanh %635 : vector<8x64xf32>
    %655 = arith.negf %643 : vector<8x64xf32>
    %656 = math.exp %655 : vector<8x64xf32>
    %cst_440 = arith.constant 1.000000e+00 : f32
    %657 = vector.broadcast %cst_440 : f32 to vector<8x64xf32>
    %658 = arith.addf %657, %656 : vector<8x64xf32>
    %659 = arith.divf %657, %658 : vector<8x64xf32>
    %660 = arith.mulf %653, %561 : vector<8x64xf32>
    %661 = arith.mulf %648, %654 : vector<8x64xf32>
    %662 = arith.addf %660, %661 : vector<8x64xf32>
    %663 = math.tanh %662 : vector<8x64xf32>
    %664 = arith.mulf %659, %663 : vector<8x64xf32>
    %665 = arith.truncf %609 : vector<8x64xf32> to vector<8x64xbf16>
    %c0_441 = arith.constant 0 : index
    %c48 = arith.constant 48 : index
    %c0_442 = arith.constant 0 : index
    %666 = vector.load %arg10[%c0_441, %c48, %c0_442] : memref<4x64x64xf32, #tpu.memory_space<vmem>>, vector<1x8x64xf32>
    %667 = vector.shape_cast %666 : vector<1x8x64xf32> to vector<8x64xf32>
    %c0_443 = arith.constant 0 : index
    %c0_444 = arith.constant 0 : index
    %c0_445 = arith.constant 0 : index
    %668 = vector.load %arg3[%c0_443, %c0_444, %c0_445] : memref<4x64x64xbf16, #tpu.memory_space<vmem>>, vector<1x64x64xbf16>
    %669 = vector.shape_cast %668 : vector<1x64x64xbf16> to vector<64x64xbf16>
    %cst_446 = arith.constant dense<0.000000e+00> : vector<8x64xf32>
    %670 = tpu.matmul %665, %669, %cst_446 {dimension_numbers = #tpu.dot_dimension_numbers<[1], [0], [0], [1], [0, 0, 1, 1], [], []>} : vector<8x64xbf16>, vector<64x64xbf16>, vector<8x64xf32> -> vector<8x64xf32>
    %671 = arith.addf %667, %670 : vector<8x64xf32>
    %c1_447 = arith.constant 1 : index
    %c48_448 = arith.constant 48 : index
    %c0_449 = arith.constant 0 : index
    %672 = vector.load %arg10[%c1_447, %c48_448, %c0_449] : memref<4x64x64xf32, #tpu.memory_space<vmem>>, vector<1x8x64xf32>
    %673 = vector.shape_cast %672 : vector<1x8x64xf32> to vector<8x64xf32>
    %c1_450 = arith.constant 1 : index
    %c0_451 = arith.constant 0 : index
    %c0_452 = arith.constant 0 : index
    %674 = vector.load %arg3[%c1_450, %c0_451, %c0_452] : memref<4x64x64xbf16, #tpu.memory_space<vmem>>, vector<1x64x64xbf16>
    %675 = vector.shape_cast %674 : vector<1x64x64xbf16> to vector<64x64xbf16>
    %cst_453 = arith.constant dense<0.000000e+00> : vector<8x64xf32>
    %676 = tpu.matmul %665, %675, %cst_453 {dimension_numbers = #tpu.dot_dimension_numbers<[1], [0], [0], [1], [0, 0, 1, 1], [], []>} : vector<8x64xbf16>, vector<64x64xbf16>, vector<8x64xf32> -> vector<8x64xf32>
    %677 = arith.addf %673, %676 : vector<8x64xf32>
    %c2_454 = arith.constant 2 : index
    %c48_455 = arith.constant 48 : index
    %c0_456 = arith.constant 0 : index
    %678 = vector.load %arg10[%c2_454, %c48_455, %c0_456] : memref<4x64x64xf32, #tpu.memory_space<vmem>>, vector<1x8x64xf32>
    %679 = vector.shape_cast %678 : vector<1x8x64xf32> to vector<8x64xf32>
    %c2_457 = arith.constant 2 : index
    %c0_458 = arith.constant 0 : index
    %c0_459 = arith.constant 0 : index
    %680 = vector.load %arg3[%c2_457, %c0_458, %c0_459] : memref<4x64x64xbf16, #tpu.memory_space<vmem>>, vector<1x64x64xbf16>
    %681 = vector.shape_cast %680 : vector<1x64x64xbf16> to vector<64x64xbf16>
    %cst_460 = arith.constant dense<0.000000e+00> : vector<8x64xf32>
    %682 = tpu.matmul %665, %681, %cst_460 {dimension_numbers = #tpu.dot_dimension_numbers<[1], [0], [0], [1], [0, 0, 1, 1], [], []>} : vector<8x64xbf16>, vector<64x64xbf16>, vector<8x64xf32> -> vector<8x64xf32>
    %683 = arith.addf %679, %682 : vector<8x64xf32>
    %c3_461 = arith.constant 3 : index
    %c48_462 = arith.constant 48 : index
    %c0_463 = arith.constant 0 : index
    %684 = vector.load %arg10[%c3_461, %c48_462, %c0_463] : memref<4x64x64xf32, #tpu.memory_space<vmem>>, vector<1x8x64xf32>
    %685 = vector.shape_cast %684 : vector<1x8x64xf32> to vector<8x64xf32>
    %c3_464 = arith.constant 3 : index
    %c0_465 = arith.constant 0 : index
    %c0_466 = arith.constant 0 : index
    %686 = vector.load %arg3[%c3_464, %c0_465, %c0_466] : memref<4x64x64xbf16, #tpu.memory_space<vmem>>, vector<1x64x64xbf16>
    %687 = vector.shape_cast %686 : vector<1x64x64xbf16> to vector<64x64xbf16>
    %cst_467 = arith.constant dense<0.000000e+00> : vector<8x64xf32>
    %688 = tpu.matmul %665, %687, %cst_467 {dimension_numbers = #tpu.dot_dimension_numbers<[1], [0], [0], [1], [0, 0, 1, 1], [], []>} : vector<8x64xbf16>, vector<64x64xbf16>, vector<8x64xf32> -> vector<8x64xf32>
    %689 = arith.addf %685, %688 : vector<8x64xf32>
    %690 = arith.negf %671 : vector<8x64xf32>
    %691 = math.exp %690 : vector<8x64xf32>
    %cst_468 = arith.constant 1.000000e+00 : f32
    %692 = vector.broadcast %cst_468 : f32 to vector<8x64xf32>
    %693 = arith.addf %692, %691 : vector<8x64xf32>
    %694 = arith.divf %692, %693 : vector<8x64xf32>
    %695 = arith.negf %677 : vector<8x64xf32>
    %696 = math.exp %695 : vector<8x64xf32>
    %cst_469 = arith.constant 1.000000e+00 : f32
    %697 = vector.broadcast %cst_469 : f32 to vector<8x64xf32>
    %698 = arith.addf %697, %696 : vector<8x64xf32>
    %699 = arith.divf %697, %698 : vector<8x64xf32>
    %700 = math.tanh %683 : vector<8x64xf32>
    %701 = arith.negf %689 : vector<8x64xf32>
    %702 = math.exp %701 : vector<8x64xf32>
    %cst_470 = arith.constant 1.000000e+00 : f32
    %703 = vector.broadcast %cst_470 : f32 to vector<8x64xf32>
    %704 = arith.addf %703, %702 : vector<8x64xf32>
    %705 = arith.divf %703, %704 : vector<8x64xf32>
    %706 = arith.mulf %699, %607 : vector<8x64xf32>
    %707 = arith.mulf %694, %700 : vector<8x64xf32>
    %708 = arith.addf %706, %707 : vector<8x64xf32>
    %709 = math.tanh %708 : vector<8x64xf32>
    %710 = arith.mulf %705, %709 : vector<8x64xf32>
    %711 = arith.truncf %710 : vector<8x64xf32> to vector<8x64xbf16>
    %712 = arith.truncf %664 : vector<8x64xf32> to vector<8x64xbf16>
    %c0_471 = arith.constant 0 : index
    %c0_472 = arith.constant 0 : index
    %c0_473 = arith.constant 0 : index
    %713 = vector.load %arg4[%c0_471, %c0_472, %c0_473] : memref<4x64x64xbf16, #tpu.memory_space<vmem>>, vector<1x64x64xbf16>
    %714 = vector.shape_cast %713 : vector<1x64x64xbf16> to vector<64x64xbf16>
    %cst_474 = arith.constant dense<0.000000e+00> : vector<8x64xf32>
    %715 = tpu.matmul %711, %714, %cst_474 {dimension_numbers = #tpu.dot_dimension_numbers<[1], [0], [0], [1], [0, 0, 1, 1], [], []>} : vector<8x64xbf16>, vector<64x64xbf16>, vector<8x64xf32> -> vector<8x64xf32>
    %716 = arith.addf %45, %715 : vector<8x64xf32>
    %c0_475 = arith.constant 0 : index
    %c0_476 = arith.constant 0 : index
    %c0_477 = arith.constant 0 : index
    %717 = vector.load %arg5[%c0_475, %c0_476, %c0_477] : memref<4x64x64xbf16, #tpu.memory_space<vmem>>, vector<1x64x64xbf16>
    %718 = vector.shape_cast %717 : vector<1x64x64xbf16> to vector<64x64xbf16>
    %cst_478 = arith.constant dense<0.000000e+00> : vector<8x64xf32>
    %719 = tpu.matmul %712, %718, %cst_478 {dimension_numbers = #tpu.dot_dimension_numbers<[1], [0], [0], [1], [0, 0, 1, 1], [], []>} : vector<8x64xbf16>, vector<64x64xbf16>, vector<8x64xf32> -> vector<8x64xf32>
    %720 = arith.addf %716, %719 : vector<8x64xf32>
    %c1_479 = arith.constant 1 : index
    %c0_480 = arith.constant 0 : index
    %c0_481 = arith.constant 0 : index
    %721 = vector.load %arg4[%c1_479, %c0_480, %c0_481] : memref<4x64x64xbf16, #tpu.memory_space<vmem>>, vector<1x64x64xbf16>
    %722 = vector.shape_cast %721 : vector<1x64x64xbf16> to vector<64x64xbf16>
    %cst_482 = arith.constant dense<0.000000e+00> : vector<8x64xf32>
    %723 = tpu.matmul %711, %722, %cst_482 {dimension_numbers = #tpu.dot_dimension_numbers<[1], [0], [0], [1], [0, 0, 1, 1], [], []>} : vector<8x64xbf16>, vector<64x64xbf16>, vector<8x64xf32> -> vector<8x64xf32>
    %724 = arith.addf %49, %723 : vector<8x64xf32>
    %c1_483 = arith.constant 1 : index
    %c0_484 = arith.constant 0 : index
    %c0_485 = arith.constant 0 : index
    %725 = vector.load %arg5[%c1_483, %c0_484, %c0_485] : memref<4x64x64xbf16, #tpu.memory_space<vmem>>, vector<1x64x64xbf16>
    %726 = vector.shape_cast %725 : vector<1x64x64xbf16> to vector<64x64xbf16>
    %cst_486 = arith.constant dense<0.000000e+00> : vector<8x64xf32>
    %727 = tpu.matmul %712, %726, %cst_486 {dimension_numbers = #tpu.dot_dimension_numbers<[1], [0], [0], [1], [0, 0, 1, 1], [], []>} : vector<8x64xbf16>, vector<64x64xbf16>, vector<8x64xf32> -> vector<8x64xf32>
    %728 = arith.addf %724, %727 : vector<8x64xf32>
    %c2_487 = arith.constant 2 : index
    %c0_488 = arith.constant 0 : index
    %c0_489 = arith.constant 0 : index
    %729 = vector.load %arg4[%c2_487, %c0_488, %c0_489] : memref<4x64x64xbf16, #tpu.memory_space<vmem>>, vector<1x64x64xbf16>
    %730 = vector.shape_cast %729 : vector<1x64x64xbf16> to vector<64x64xbf16>
    %cst_490 = arith.constant dense<0.000000e+00> : vector<8x64xf32>
    %731 = tpu.matmul %711, %730, %cst_490 {dimension_numbers = #tpu.dot_dimension_numbers<[1], [0], [0], [1], [0, 0, 1, 1], [], []>} : vector<8x64xbf16>, vector<64x64xbf16>, vector<8x64xf32> -> vector<8x64xf32>
    %732 = arith.addf %53, %731 : vector<8x64xf32>
    %c2_491 = arith.constant 2 : index
    %c0_492 = arith.constant 0 : index
    %c0_493 = arith.constant 0 : index
    %733 = vector.load %arg5[%c2_491, %c0_492, %c0_493] : memref<4x64x64xbf16, #tpu.memory_space<vmem>>, vector<1x64x64xbf16>
    %734 = vector.shape_cast %733 : vector<1x64x64xbf16> to vector<64x64xbf16>
    %cst_494 = arith.constant dense<0.000000e+00> : vector<8x64xf32>
    %735 = tpu.matmul %712, %734, %cst_494 {dimension_numbers = #tpu.dot_dimension_numbers<[1], [0], [0], [1], [0, 0, 1, 1], [], []>} : vector<8x64xbf16>, vector<64x64xbf16>, vector<8x64xf32> -> vector<8x64xf32>
    %736 = arith.addf %732, %735 : vector<8x64xf32>
    %c3_495 = arith.constant 3 : index
    %c0_496 = arith.constant 0 : index
    %c0_497 = arith.constant 0 : index
    %737 = vector.load %arg4[%c3_495, %c0_496, %c0_497] : memref<4x64x64xbf16, #tpu.memory_space<vmem>>, vector<1x64x64xbf16>
    %738 = vector.shape_cast %737 : vector<1x64x64xbf16> to vector<64x64xbf16>
    %cst_498 = arith.constant dense<0.000000e+00> : vector<8x64xf32>
    %739 = tpu.matmul %711, %738, %cst_498 {dimension_numbers = #tpu.dot_dimension_numbers<[1], [0], [0], [1], [0, 0, 1, 1], [], []>} : vector<8x64xbf16>, vector<64x64xbf16>, vector<8x64xf32> -> vector<8x64xf32>
    %740 = arith.addf %57, %739 : vector<8x64xf32>
    %c3_499 = arith.constant 3 : index
    %c0_500 = arith.constant 0 : index
    %c0_501 = arith.constant 0 : index
    %741 = vector.load %arg5[%c3_499, %c0_500, %c0_501] : memref<4x64x64xbf16, #tpu.memory_space<vmem>>, vector<1x64x64xbf16>
    %742 = vector.shape_cast %741 : vector<1x64x64xbf16> to vector<64x64xbf16>
    %cst_502 = arith.constant dense<0.000000e+00> : vector<8x64xf32>
    %743 = tpu.matmul %712, %742, %cst_502 {dimension_numbers = #tpu.dot_dimension_numbers<[1], [0], [0], [1], [0, 0, 1, 1], [], []>} : vector<8x64xbf16>, vector<64x64xbf16>, vector<8x64xf32> -> vector<8x64xf32>
    %744 = arith.addf %740, %743 : vector<8x64xf32>
    %745 = arith.negf %720 : vector<8x64xf32>
    %746 = math.exp %745 : vector<8x64xf32>
    %cst_503 = arith.constant 1.000000e+00 : f32
    %747 = vector.broadcast %cst_503 : f32 to vector<8x64xf32>
    %748 = arith.addf %747, %746 : vector<8x64xf32>
    %749 = arith.divf %747, %748 : vector<8x64xf32>
    %750 = arith.negf %728 : vector<8x64xf32>
    %751 = math.exp %750 : vector<8x64xf32>
    %cst_504 = arith.constant 1.000000e+00 : f32
    %752 = vector.broadcast %cst_504 : f32 to vector<8x64xf32>
    %753 = arith.addf %752, %751 : vector<8x64xf32>
    %754 = arith.divf %752, %753 : vector<8x64xf32>
    %755 = math.tanh %736 : vector<8x64xf32>
    %756 = arith.negf %744 : vector<8x64xf32>
    %757 = math.exp %756 : vector<8x64xf32>
    %cst_505 = arith.constant 1.000000e+00 : f32
    %758 = vector.broadcast %cst_505 : f32 to vector<8x64xf32>
    %759 = arith.addf %758, %757 : vector<8x64xf32>
    %760 = arith.divf %758, %759 : vector<8x64xf32>
    %761 = arith.mulf %754, %662 : vector<8x64xf32>
    %762 = arith.mulf %749, %755 : vector<8x64xf32>
    %763 = arith.addf %761, %762 : vector<8x64xf32>
    %764 = math.tanh %763 : vector<8x64xf32>
    %765 = arith.mulf %760, %764 : vector<8x64xf32>
    %766 = arith.truncf %710 : vector<8x64xf32> to vector<8x64xbf16>
    %c0_506 = arith.constant 0 : index
    %c56 = arith.constant 56 : index
    %c0_507 = arith.constant 0 : index
    %767 = vector.load %arg10[%c0_506, %c56, %c0_507] : memref<4x64x64xf32, #tpu.memory_space<vmem>>, vector<1x8x64xf32>
    %768 = vector.shape_cast %767 : vector<1x8x64xf32> to vector<8x64xf32>
    %c0_508 = arith.constant 0 : index
    %c0_509 = arith.constant 0 : index
    %c0_510 = arith.constant 0 : index
    %769 = vector.load %arg3[%c0_508, %c0_509, %c0_510] : memref<4x64x64xbf16, #tpu.memory_space<vmem>>, vector<1x64x64xbf16>
    %770 = vector.shape_cast %769 : vector<1x64x64xbf16> to vector<64x64xbf16>
    %cst_511 = arith.constant dense<0.000000e+00> : vector<8x64xf32>
    %771 = tpu.matmul %766, %770, %cst_511 {dimension_numbers = #tpu.dot_dimension_numbers<[1], [0], [0], [1], [0, 0, 1, 1], [], []>} : vector<8x64xbf16>, vector<64x64xbf16>, vector<8x64xf32> -> vector<8x64xf32>
    %772 = arith.addf %768, %771 : vector<8x64xf32>
    %c1_512 = arith.constant 1 : index
    %c56_513 = arith.constant 56 : index
    %c0_514 = arith.constant 0 : index
    %773 = vector.load %arg10[%c1_512, %c56_513, %c0_514] : memref<4x64x64xf32, #tpu.memory_space<vmem>>, vector<1x8x64xf32>
    %774 = vector.shape_cast %773 : vector<1x8x64xf32> to vector<8x64xf32>
    %c1_515 = arith.constant 1 : index
    %c0_516 = arith.constant 0 : index
    %c0_517 = arith.constant 0 : index
    %775 = vector.load %arg3[%c1_515, %c0_516, %c0_517] : memref<4x64x64xbf16, #tpu.memory_space<vmem>>, vector<1x64x64xbf16>
    %776 = vector.shape_cast %775 : vector<1x64x64xbf16> to vector<64x64xbf16>
    %cst_518 = arith.constant dense<0.000000e+00> : vector<8x64xf32>
    %777 = tpu.matmul %766, %776, %cst_518 {dimension_numbers = #tpu.dot_dimension_numbers<[1], [0], [0], [1], [0, 0, 1, 1], [], []>} : vector<8x64xbf16>, vector<64x64xbf16>, vector<8x64xf32> -> vector<8x64xf32>
    %778 = arith.addf %774, %777 : vector<8x64xf32>
    %c2_519 = arith.constant 2 : index
    %c56_520 = arith.constant 56 : index
    %c0_521 = arith.constant 0 : index
    %779 = vector.load %arg10[%c2_519, %c56_520, %c0_521] : memref<4x64x64xf32, #tpu.memory_space<vmem>>, vector<1x8x64xf32>
    %780 = vector.shape_cast %779 : vector<1x8x64xf32> to vector<8x64xf32>
    %c2_522 = arith.constant 2 : index
    %c0_523 = arith.constant 0 : index
    %c0_524 = arith.constant 0 : index
    %781 = vector.load %arg3[%c2_522, %c0_523, %c0_524] : memref<4x64x64xbf16, #tpu.memory_space<vmem>>, vector<1x64x64xbf16>
    %782 = vector.shape_cast %781 : vector<1x64x64xbf16> to vector<64x64xbf16>
    %cst_525 = arith.constant dense<0.000000e+00> : vector<8x64xf32>
    %783 = tpu.matmul %766, %782, %cst_525 {dimension_numbers = #tpu.dot_dimension_numbers<[1], [0], [0], [1], [0, 0, 1, 1], [], []>} : vector<8x64xbf16>, vector<64x64xbf16>, vector<8x64xf32> -> vector<8x64xf32>
    %784 = arith.addf %780, %783 : vector<8x64xf32>
    %c3_526 = arith.constant 3 : index
    %c56_527 = arith.constant 56 : index
    %c0_528 = arith.constant 0 : index
    %785 = vector.load %arg10[%c3_526, %c56_527, %c0_528] : memref<4x64x64xf32, #tpu.memory_space<vmem>>, vector<1x8x64xf32>
    %786 = vector.shape_cast %785 : vector<1x8x64xf32> to vector<8x64xf32>
    %c3_529 = arith.constant 3 : index
    %c0_530 = arith.constant 0 : index
    %c0_531 = arith.constant 0 : index
    %787 = vector.load %arg3[%c3_529, %c0_530, %c0_531] : memref<4x64x64xbf16, #tpu.memory_space<vmem>>, vector<1x64x64xbf16>
    %788 = vector.shape_cast %787 : vector<1x64x64xbf16> to vector<64x64xbf16>
    %cst_532 = arith.constant dense<0.000000e+00> : vector<8x64xf32>
    %789 = tpu.matmul %766, %788, %cst_532 {dimension_numbers = #tpu.dot_dimension_numbers<[1], [0], [0], [1], [0, 0, 1, 1], [], []>} : vector<8x64xbf16>, vector<64x64xbf16>, vector<8x64xf32> -> vector<8x64xf32>
    %790 = arith.addf %786, %789 : vector<8x64xf32>
    %791 = arith.negf %772 : vector<8x64xf32>
    %792 = math.exp %791 : vector<8x64xf32>
    %cst_533 = arith.constant 1.000000e+00 : f32
    %793 = vector.broadcast %cst_533 : f32 to vector<8x64xf32>
    %794 = arith.addf %793, %792 : vector<8x64xf32>
    %795 = arith.divf %793, %794 : vector<8x64xf32>
    %796 = arith.negf %778 : vector<8x64xf32>
    %797 = math.exp %796 : vector<8x64xf32>
    %cst_534 = arith.constant 1.000000e+00 : f32
    %798 = vector.broadcast %cst_534 : f32 to vector<8x64xf32>
    %799 = arith.addf %798, %797 : vector<8x64xf32>
    %800 = arith.divf %798, %799 : vector<8x64xf32>
    %801 = math.tanh %784 : vector<8x64xf32>
    %802 = arith.negf %790 : vector<8x64xf32>
    %803 = math.exp %802 : vector<8x64xf32>
    %cst_535 = arith.constant 1.000000e+00 : f32
    %804 = vector.broadcast %cst_535 : f32 to vector<8x64xf32>
    %805 = arith.addf %804, %803 : vector<8x64xf32>
    %806 = arith.divf %804, %805 : vector<8x64xf32>
    %807 = arith.mulf %800, %708 : vector<8x64xf32>
    %808 = arith.mulf %795, %801 : vector<8x64xf32>
    %809 = arith.addf %807, %808 : vector<8x64xf32>
    %810 = math.tanh %809 : vector<8x64xf32>
    %811 = arith.mulf %806, %810 : vector<8x64xf32>
    %812 = arith.truncf %811 : vector<8x64xf32> to vector<8x64xbf16>
    %813 = arith.truncf %765 : vector<8x64xf32> to vector<8x64xbf16>
    %c0_536 = arith.constant 0 : index
    %c0_537 = arith.constant 0 : index
    %c0_538 = arith.constant 0 : index
    %814 = vector.load %arg4[%c0_536, %c0_537, %c0_538] : memref<4x64x64xbf16, #tpu.memory_space<vmem>>, vector<1x64x64xbf16>
    %815 = vector.shape_cast %814 : vector<1x64x64xbf16> to vector<64x64xbf16>
    %cst_539 = arith.constant dense<0.000000e+00> : vector<8x64xf32>
    %816 = tpu.matmul %812, %815, %cst_539 {dimension_numbers = #tpu.dot_dimension_numbers<[1], [0], [0], [1], [0, 0, 1, 1], [], []>} : vector<8x64xbf16>, vector<64x64xbf16>, vector<8x64xf32> -> vector<8x64xf32>
    %817 = arith.addf %45, %816 : vector<8x64xf32>
    %c0_540 = arith.constant 0 : index
    %c0_541 = arith.constant 0 : index
    %c0_542 = arith.constant 0 : index
    %818 = vector.load %arg5[%c0_540, %c0_541, %c0_542] : memref<4x64x64xbf16, #tpu.memory_space<vmem>>, vector<1x64x64xbf16>
    %819 = vector.shape_cast %818 : vector<1x64x64xbf16> to vector<64x64xbf16>
    %cst_543 = arith.constant dense<0.000000e+00> : vector<8x64xf32>
    %820 = tpu.matmul %813, %819, %cst_543 {dimension_numbers = #tpu.dot_dimension_numbers<[1], [0], [0], [1], [0, 0, 1, 1], [], []>} : vector<8x64xbf16>, vector<64x64xbf16>, vector<8x64xf32> -> vector<8x64xf32>
    %821 = arith.addf %817, %820 : vector<8x64xf32>
    %c1_544 = arith.constant 1 : index
    %c0_545 = arith.constant 0 : index
    %c0_546 = arith.constant 0 : index
    %822 = vector.load %arg4[%c1_544, %c0_545, %c0_546] : memref<4x64x64xbf16, #tpu.memory_space<vmem>>, vector<1x64x64xbf16>
    %823 = vector.shape_cast %822 : vector<1x64x64xbf16> to vector<64x64xbf16>
    %cst_547 = arith.constant dense<0.000000e+00> : vector<8x64xf32>
    %824 = tpu.matmul %812, %823, %cst_547 {dimension_numbers = #tpu.dot_dimension_numbers<[1], [0], [0], [1], [0, 0, 1, 1], [], []>} : vector<8x64xbf16>, vector<64x64xbf16>, vector<8x64xf32> -> vector<8x64xf32>
    %825 = arith.addf %49, %824 : vector<8x64xf32>
    %c1_548 = arith.constant 1 : index
    %c0_549 = arith.constant 0 : index
    %c0_550 = arith.constant 0 : index
    %826 = vector.load %arg5[%c1_548, %c0_549, %c0_550] : memref<4x64x64xbf16, #tpu.memory_space<vmem>>, vector<1x64x64xbf16>
    %827 = vector.shape_cast %826 : vector<1x64x64xbf16> to vector<64x64xbf16>
    %cst_551 = arith.constant dense<0.000000e+00> : vector<8x64xf32>
    %828 = tpu.matmul %813, %827, %cst_551 {dimension_numbers = #tpu.dot_dimension_numbers<[1], [0], [0], [1], [0, 0, 1, 1], [], []>} : vector<8x64xbf16>, vector<64x64xbf16>, vector<8x64xf32> -> vector<8x64xf32>
    %829 = arith.addf %825, %828 : vector<8x64xf32>
    %c2_552 = arith.constant 2 : index
    %c0_553 = arith.constant 0 : index
    %c0_554 = arith.constant 0 : index
    %830 = vector.load %arg4[%c2_552, %c0_553, %c0_554] : memref<4x64x64xbf16, #tpu.memory_space<vmem>>, vector<1x64x64xbf16>
    %831 = vector.shape_cast %830 : vector<1x64x64xbf16> to vector<64x64xbf16>
    %cst_555 = arith.constant dense<0.000000e+00> : vector<8x64xf32>
    %832 = tpu.matmul %812, %831, %cst_555 {dimension_numbers = #tpu.dot_dimension_numbers<[1], [0], [0], [1], [0, 0, 1, 1], [], []>} : vector<8x64xbf16>, vector<64x64xbf16>, vector<8x64xf32> -> vector<8x64xf32>
    %833 = arith.addf %53, %832 : vector<8x64xf32>
    %c2_556 = arith.constant 2 : index
    %c0_557 = arith.constant 0 : index
    %c0_558 = arith.constant 0 : index
    %834 = vector.load %arg5[%c2_556, %c0_557, %c0_558] : memref<4x64x64xbf16, #tpu.memory_space<vmem>>, vector<1x64x64xbf16>
    %835 = vector.shape_cast %834 : vector<1x64x64xbf16> to vector<64x64xbf16>
    %cst_559 = arith.constant dense<0.000000e+00> : vector<8x64xf32>
    %836 = tpu.matmul %813, %835, %cst_559 {dimension_numbers = #tpu.dot_dimension_numbers<[1], [0], [0], [1], [0, 0, 1, 1], [], []>} : vector<8x64xbf16>, vector<64x64xbf16>, vector<8x64xf32> -> vector<8x64xf32>
    %837 = arith.addf %833, %836 : vector<8x64xf32>
    %c3_560 = arith.constant 3 : index
    %c0_561 = arith.constant 0 : index
    %c0_562 = arith.constant 0 : index
    %838 = vector.load %arg4[%c3_560, %c0_561, %c0_562] : memref<4x64x64xbf16, #tpu.memory_space<vmem>>, vector<1x64x64xbf16>
    %839 = vector.shape_cast %838 : vector<1x64x64xbf16> to vector<64x64xbf16>
    %cst_563 = arith.constant dense<0.000000e+00> : vector<8x64xf32>
    %840 = tpu.matmul %812, %839, %cst_563 {dimension_numbers = #tpu.dot_dimension_numbers<[1], [0], [0], [1], [0, 0, 1, 1], [], []>} : vector<8x64xbf16>, vector<64x64xbf16>, vector<8x64xf32> -> vector<8x64xf32>
    %841 = arith.addf %57, %840 : vector<8x64xf32>
    %c3_564 = arith.constant 3 : index
    %c0_565 = arith.constant 0 : index
    %c0_566 = arith.constant 0 : index
    %842 = vector.load %arg5[%c3_564, %c0_565, %c0_566] : memref<4x64x64xbf16, #tpu.memory_space<vmem>>, vector<1x64x64xbf16>
    %843 = vector.shape_cast %842 : vector<1x64x64xbf16> to vector<64x64xbf16>
    %cst_567 = arith.constant dense<0.000000e+00> : vector<8x64xf32>
    %844 = tpu.matmul %813, %843, %cst_567 {dimension_numbers = #tpu.dot_dimension_numbers<[1], [0], [0], [1], [0, 0, 1, 1], [], []>} : vector<8x64xbf16>, vector<64x64xbf16>, vector<8x64xf32> -> vector<8x64xf32>
    %845 = arith.addf %841, %844 : vector<8x64xf32>
    %846 = arith.negf %821 : vector<8x64xf32>
    %847 = math.exp %846 : vector<8x64xf32>
    %cst_568 = arith.constant 1.000000e+00 : f32
    %848 = vector.broadcast %cst_568 : f32 to vector<8x64xf32>
    %849 = arith.addf %848, %847 : vector<8x64xf32>
    %850 = arith.divf %848, %849 : vector<8x64xf32>
    %851 = arith.negf %829 : vector<8x64xf32>
    %852 = math.exp %851 : vector<8x64xf32>
    %cst_569 = arith.constant 1.000000e+00 : f32
    %853 = vector.broadcast %cst_569 : f32 to vector<8x64xf32>
    %854 = arith.addf %853, %852 : vector<8x64xf32>
    %855 = arith.divf %853, %854 : vector<8x64xf32>
    %856 = math.tanh %837 : vector<8x64xf32>
    %857 = arith.negf %845 : vector<8x64xf32>
    %858 = math.exp %857 : vector<8x64xf32>
    %cst_570 = arith.constant 1.000000e+00 : f32
    %859 = vector.broadcast %cst_570 : f32 to vector<8x64xf32>
    %860 = arith.addf %859, %858 : vector<8x64xf32>
    %861 = arith.divf %859, %860 : vector<8x64xf32>
    %862 = arith.mulf %855, %763 : vector<8x64xf32>
    %863 = arith.mulf %850, %856 : vector<8x64xf32>
    %864 = arith.addf %862, %863 : vector<8x64xf32>
    %865 = math.tanh %864 : vector<8x64xf32>
    %866 = arith.mulf %861, %865 : vector<8x64xf32>
    %c0_571 = arith.constant 0 : index
    %c0_572 = arith.constant 0 : index
    %867 = vector.load %arg7[%c0_571, %c0_572] : memref<1x64xf32, #tpu.memory_space<vmem>>, vector<1x64xf32>
    %868 = vector.broadcast %867 : vector<1x64xf32> to vector<8x64xf32>
    %869 = arith.mulf %866, %868 : vector<8x64xf32>
    %cst_573 = arith.constant dense<0.000000e+00> : vector<8xf32>
    %870 = vector.multi_reduction <add>, %869, %cst_573 [1] : vector<8x64xf32> to vector<8xf32>
    %871 = vector.shape_cast %870 : vector<8xf32> to vector<8x1xf32>
    %c0_574 = arith.constant 0 : index
    %c0_575 = arith.constant 0 : index
    %872 = vector.load %arg8[%c0_574, %c0_575] : memref<1x1xf32, #tpu.memory_space<vmem>>, vector<1x1xf32>
    %873 = vector.broadcast %872 : vector<1x1xf32> to vector<8x1xf32>
    %874 = arith.addf %871, %873 : vector<8x1xf32>
    %c0_576 = arith.constant 0 : index
    %c0_577 = arith.constant 0 : index
    %875 = vector.load %arg9[%c0_576, %c0_577] : memref<8x1xf32, #tpu.memory_space<vmem>>, vector<8x1xf32>
    tpu.vector_store %arg9[%c0_576, %c0_577], %874 {strides = array<i32>} : memref<8x1xf32, #tpu.memory_space<vmem>>, vector<8x1xf32>,
    return
  }
}

</mosaic_0001>

<bundles_post_ra>
// kernel: lstm_forward.1
= control target key start
LH: loop header
LB: loop body
LE: loop exit
PB: predicated region body
PF: predicated region fallthrough
CT: control target
= control target key end

     0   :  { %s5783_s0 = inlined_call_operand.vmem [shape: f32[64,16], index: 0, kind: input, shape index: {}]   ;;  %s5784_s1 = inlined_call_operand.vmem [shape: bf16[4,16,64], index: 1, kind: input, shape index: {}]   ;;  %s5785_s2 = inlined_call_operand.vmem [shape: f32[4,1,64], index: 2, kind: input, shape index: {}]   ;;  %s5786_s3 = inlined_call_operand.vmem [shape: bf16[4,64,64], index: 3, kind: input, shape index: {}]   ;;  %s5787_s4 = inlined_call_operand.vmem [shape: bf16[4,64,64], index: 4, kind: input, shape index: {}]   ;;  %s5788_s5 = inlined_call_operand.hbm [shape: bf16[4,64,64], index: 5, kind: input, shape index: {}]   ;;  %s5789_s6 = inlined_call_operand.vmem [shape: f32[4,1,64], index: 6, kind: input, shape index: {}]   ;;  %s5790_s7 = inlined_call_operand.vmem [shape: f32[1,64], index: 7, kind: input, shape index: {}]   ;;  %s5791_s8 = inlined_call_operand.<no memory space> [shape: f32[1,1], index: 8, kind: input, shape index: {}]   ;;  %s5792_s9 = inlined_call_operand.vmem [shape: f32[8,1], index: 9, kind: output, shape index: {}]  }
   0x1   :  { %v14_v0 = vstv %s5791_s8 }
   0x2   :  { %15 = vst [vmem:[#allocation3] sm:$0x1] %v14_v0 }
   0x3   :  { %16 = vsyncpa [#allocation5], 0  ;;  %s31_s13 = sshll.u32 %s5788_s5, 4  ;;  %s4033_s14 = smov [#allocation4]   ;;  %s32_s13 = int_to_ptr.hbm [resolvable:$true] %s31_s13 }
   0x4   :  { %s33_s15 = sshll.u32 %s4033_s14, 4  ;;  %s4034_s16 = smov 64   ;;  %s34_s15 = int_to_ptr.vmem [resolvable:$true] %s33_s15 }
   0x5   :  { %s4035_s17 = smov 4  }
   0x6   :  { %39 = dma.hbm_to_vmem [thread:$0]  %s32_s13, 2048, %s34_s15, [#allocation5], %s4034_s16, %s4034_s16, %s4035_s17  }
   0x7   :  { %4031 = dma.done.wait [#allocation5], 2048  }
   0x8   :  { %4032 = vsyncadd [#allocation5], 4294965248  ;;  %v3581_v1 = vld [vmem:[%s5784_s1] sm:$0xff]  ;;  %v3582_v2 = vld [vmem:[%s5784_s1 + $0x8] sm:$0xff]  ;;  %vm75_vm0 = vcmask 130048   ;;  %v4036_v33 = vmov 0  }
   0x9   :  { %v3583_v3 = vld [vmem:[%s5784_s1 + $0x10] sm:$0xff]  ;;  %v3584_v4 = vld [vmem:[%s5784_s1 + $0x18] sm:$0xff]  ;;  %v51_v5 = vld [vmem:[%s5783_s0] sm:$0xff]  ;;  %95 = vmatpush.bf16.msra.mxu0 %v3581_v1  ;;  %147 = vmatpush.bf16.msra.mxu1 %v3582_v2  ;;  %vm117_vm1 = vcmask 523264  }
   0xa   :  { %v52_v6 = vld [vmem:[%s5783_s0 + $0x8] sm:$0xff]  ;;  %v4114_v8 = vld [vmem:[%s5786_s3 + $0x18] sm:$0xff]  ;;  %199 = vmatpush.bf16.msra.mxu2 %v3583_v3  ;;  %251 = vmatpush.bf16.msra.mxu3 %v3584_v4  ;;  %v4136_v12 = vld [vmem:[%s5786_s3 + $0x10] sm:$0xff] }
   0xb   :  { %v59_v7 = vpack.c.bf16 %v52_v6, %v51_v5  ;;  %v4119_v9 = vld [vmem:[%s5786_s3 + $0x38] sm:$0xff]  ;;  %v4141_v13 = vld [vmem:[%s5786_s3 + $0x30] sm:$0xff]  ;;  %v4162_v16 = vld [vmem:[%s5786_s3 + $0x8] sm:$0xff] }
   0xc   :  { %v4124_v10 = vld [vmem:[%s5786_s3 + $0x78] sm:$0xff]  ;;  %v4150_v14 = vld [vmem:[%s5786_s3 + $0x70] sm:$0xff]  ;;  %v4167_v17 = vld [vmem:[%s5786_s3 + $0x28] sm:$0xff] }
   0xd   :  { %v4129_v11 = vld [vmem:[%s5786_s3 + $0x58] sm:$0xff]  ;;  %341 = vmatpush.bf16.msrb.mxu0 %v4114_v8  ;;  %389 = vmatpush.bf16.msrb.mxu1 %v4119_v9  ;;  %v4157_v15 = vld [vmem:[%s5786_s3 + $0x50] sm:$0xff]  ;;  %v4176_v18 = vld [vmem:[%s5786_s3 + $0x68] sm:$0xff] }
   0xe   :  { %3165 = vmatmul.msk.bf16.vlgmr.msra.gmra.mxu0 %vm75_vm0, %v59_v7  ;;  %3176 = vmatmul.msk.bf16.vlgmr.msra.gmra.mxu1 %vm75_vm0, %v59_v7  ;;  %v4181_v19 = vld [vmem:[%s5786_s3 + $0x48] sm:$0xff]  ;;  %v53_v20 = vld [vmem:[%s5783_s0 + $0x10] sm:$0xff]  ;;  %v54_v21 = vld [vmem:[%s5783_s0 + $0x18] sm:$0xff] }
   0xf   :  { %3187 = vmatmul.msk.bf16.vlgmr.msra.gmra.mxu2 %vm75_vm0, %v59_v7  ;;  %3198 = vmatmul.msk.bf16.vlgmr.msra.gmra.mxu3 %vm75_vm0, %v59_v7  ;;  %v60_v22 = vpack.c.bf16 %v54_v21, %v53_v20  ;;  %v4200_v23 = vld [vmem:[%s5786_s3] sm:$0xff]  ;;  %v56_v28 = vld [vmem:[%s5783_s0 + $0x28] sm:$0xff]  ;;  %v57_v30 = vld [vmem:[%s5783_s0 + $0x30] sm:$0xff] }
  0x10   :  { %485 = vmatpush.bf16.msrb.mxu3 %v4124_v10  ;;  %437 = vmatpush.bf16.msrb.mxu2 %v4129_v11  ;;  %v4205_v24 = vld [vmem:[%s5786_s3 + $0x20] sm:$0xff]  ;;  %v58_v31 = vld [vmem:[%s5783_s0 + $0x38] sm:$0xff] }
  0x11   :  { %342 = vmatpush.bf16.msrb.mxu0 %v4136_v12  ;;  %390 = vmatpush.bf16.msrb.mxu1 %v4141_v13  ;;  %v4210_v25 = vld [vmem:[%s5786_s3 + $0x60] sm:$0xff]  ;;  %v62_v32 = vpack.c.bf16 %v58_v31, %v57_v30 }
  0x12   :  { %v4215_v26 = vld [vmem:[%s5786_s3 + $0x40] sm:$0xff] }
  0x13   :  { %v55_v27 = vld [vmem:[%s5783_s0 + $0x20] sm:$0xff] }
  0x14   :  { %486 = vmatpush.bf16.msrb.mxu3 %v4150_v14  ;;  %438 = vmatpush.bf16.msrb.mxu2 %v4157_v15  ;;  %v61_v29 = vpack.c.bf16 %v56_v28, %v55_v27  ;;  %v4248_v34 = vld [vmem:[%s5785_s2] ss:$0 sm:$0xff]  ;;  %v4253_v35 = vld [vmem:[%s5785_s2 + $0x1] ss:$0 sm:$0xff]  ;;  %v4262_v40 = vld [vmem:[%s5785_s2 + $0x2] ss:$0 sm:$0xff] }
  0x15   :  { %343 = vmatpush.bf16.msrb.mxu0 %v4162_v16  ;;  %391 = vmatpush.bf16.msrb.mxu1 %v4167_v17  ;;  %v4267_v41 = vld [vmem:[%s5785_s2 + $0x3] ss:$0 sm:$0xff]  ;;  %v4293_v4 = vld [vmem:[#allocation4 + $0x18] sm:$0xff]  ;;  %v4305_v28 = vld [vmem:[#allocation4 + $0x10] sm:$0xff] }
  0x16   :  { %v4295_v5 = vld [vmem:[#allocation4 + $0x38] sm:$0xff] }
  0x18   :  { %487 = vmatpush.bf16.msrb.mxu3 %v4176_v18  ;;  %439 = vmatpush.bf16.msrb.mxu2 %v4181_v19 }
  0x19   :  { %344 = vmatpush.bf16.msrb.mxu0 %v4200_v23  ;;  %392 = vmatpush.bf16.msrb.mxu1 %v4205_v24 }
  0x1c   :  { %488 = vmatpush.bf16.msrb.mxu3 %v4210_v25  ;;  %440 = vmatpush.bf16.msrb.mxu2 %v4215_v26 }
  0x1d   :  { %644 = vmatpush.bf16.msra.mxu1 %v4293_v4 }
  0x1e   :  { %3166 = vmatmul.msk.bf16.gmra.mxu0 %vm75_vm0, %v60_v22  ;;  %3177 = vmatmul.msk.bf16.gmra.mxu1 %vm75_vm0, %v60_v22 }
  0x1f   :  { %3188 = vmatmul.msk.bf16.gmra.mxu2 %vm75_vm0, %v60_v22  ;;  %3199 = vmatmul.msk.bf16.gmra.mxu3 %vm75_vm0, %v60_v22 }
  0x20   :  { %738 = vmatpush.bf16.msra.mxu3 %v4295_v5 }
  0x21   :  { %645 = vmatpush.bf16.msra.mxu1 %v4305_v28 }
  0x2e   :  { %3167 = vmatmul.msk.bf16.gmra.mxu0 %vm75_vm0, %v61_v29  ;;  %3178 = vmatmul.msk.bf16.gmra.mxu1 %vm75_vm0, %v61_v29 }
  0x2f   :  { %3189 = vmatmul.msk.bf16.gmra.mxu2 %vm75_vm0, %v61_v29  ;;  %3200 = vmatmul.msk.bf16.gmra.mxu3 %vm75_vm0, %v61_v29  ;;  %v4307_v29 = vld [vmem:[#allocation4 + $0x30] sm:$0xff] }
  0x30   :  { %739 = vmatpush.bf16.msra.mxu3 %v4307_v29 }
  0x3e   :  { %3168 = vmatmul.msk.bf16.gmra.mxu0 %vm75_vm0, %v62_v32  ;;  %3179 = vmatmul.msk.bf16.gmra.mxu1 %vm75_vm0, %v62_v32 }
  0x3f   :  { %3190 = vmatmul.msk.bf16.gmra.mxu2 %vm75_vm0, %v62_v32  ;;  %3201 = vmatmul.msk.bf16.gmra.mxu3 %vm75_vm0, %v62_v32  ;;  %v4313_v32 = vld [vmem:[#allocation4 + $0x8] sm:$0xff] }
  0x40   :  { %646 = vmatpush.bf16.msra.mxu1 %v4313_v32 }
  0x4e   :  { %345 = vmatmul.bf16.vlgmr.msrb.gmra.mxu0 %v4036_v33  ;;  %393 = vmatmul.bf16.vlgmr.msrb.gmra.mxu1 %v4036_v33 }
  0x4f   :  { %441 = vmatmul.bf16.vlgmr.msrb.gmra.mxu2 %v4036_v33  ;;  %489 = vmatmul.bf16.vlgmr.msrb.gmra.mxu3 %v4036_v33 }
  0x8b   :  { %v97_v36 = vpop.f32.mrf.mxu0  ;;  %v149_v37 = vpop.f32.mrf.mxu1 }
  0x8c   :  { %v98_v38 = vadd.f32 %v4248_v34, %v97_v36  ;;  %v150_v39 = vadd.f32 %v4253_v35, %v149_v37  ;;  %v4315_v36 = vld [vmem:[#allocation4 + $0x28] sm:$0xff] }
  0x8d   :  { %740 = vmatpush.bf16.msra.mxu3 %v4315_v36 }
  0x8e   :  { %118 = vst.msk [vmem:[#allocation2] sm:$0xff] %vm117_vm1, %v98_v38 }
  0x8f   :  { %170 = vst.msk [vmem:[#allocation2 + $0x40] sm:$0xff] %vm117_vm1, %v150_v39 }
  0x92   :  { %v201_v42 = vpop.f32.mrf.mxu2  ;;  %v253_v43 = vpop.f32.mrf.mxu3 }
  0x93   :  { %v202_v44 = vadd.f32 %v4262_v40, %v201_v42  ;;  %v254_v45 = vadd.f32 %v4267_v41, %v253_v43  ;;  %v99_v46 = vpop.f32.mrf.mxu0  ;;  %v151_v47 = vpop.f32.mrf.mxu1 }
  0x94   :  { %v100_v48 = vadd.f32 %v4248_v34, %v99_v46  ;;  %v152_v49 = vadd.f32 %v4253_v35, %v151_v47  ;;  %v4327_v46 = vld [vmem:[#allocation4 + $0x20] sm:$0xff] }
  0x95   :  { %222 = vst.msk [vmem:[#allocation2 + $0x80] sm:$0xff] %vm117_vm1, %v202_v44  ;;  %741 = vmatpush.bf16.msra.mxu3 %v4327_v46 }
  0x96   :  { %274 = vst.msk [vmem:[#allocation2 + $0xc0] sm:$0xff] %vm117_vm1, %v254_v45  ;;  %v4325_v45 = vld [vmem:[#allocation4] sm:$0xff] }
  0x97   :  { %119 = vst.msk [vmem:[#allocation2 + $0x8] sm:$0xff] %vm117_vm1, %v100_v48  ;;  %647 = vmatpush.bf16.msra.mxu1 %v4325_v45 }
  0x98   :  { %171 = vst.msk [vmem:[#allocation2 + $0x48] sm:$0xff] %vm117_vm1, %v152_v49  ;;  %v4333_v49 = vld [vmem:[#allocation4 + $0x58] sm:$0xff]  ;;  %742 = vmatmul.bf16.vlgmr.msra.gmra.mxu3 %v4036_v33 }
  0x9a   :  { %v203_v50 = vpop.f32.mrf.mxu2  ;;  %v255_v51 = vpop.f32.mrf.mxu3  ;;  %648 = vmatmul.bf16.vlgmr.msra.gmra.mxu1 %v4036_v33 }
  0x9b   :  { %v204_v52 = vadd.f32 %v4262_v40, %v203_v50  ;;  %v256_v53 = vadd.f32 %v4267_v41, %v255_v51  ;;  %v102_v54 = vpop.f32.mrf.mxu0  ;;  %v154_v55 = vpop.f32.mrf.mxu1  ;;  %v4335_v50 = vld [vmem:[#allocation4 + $0x78] sm:$0xff]  ;;  %832 = vmatpush.bf16.msrb.mxu1 %v4333_v49 }
  0x9c   :  { %v103_v56 = vadd.f32 %v4248_v34, %v102_v54  ;;  %v155_v57 = vadd.f32 %v4253_v35, %v154_v55  ;;  %926 = vmatpush.bf16.msrb.mxu3 %v4335_v50 }
  0x9d   :  { %223 = vst.msk [vmem:[#allocation2 + $0x88] sm:$0xff] %vm117_vm1, %v204_v52 }
  0x9e   :  { %275 = vst.msk [vmem:[#allocation2 + $0xc8] sm:$0xff] %vm117_vm1, %v256_v53 }
  0x9f   :  { %120 = vst.msk [vmem:[#allocation2 + $0x10] sm:$0xff] %vm117_vm1, %v103_v56 }
  0xa0   :  { %172 = vst.msk [vmem:[#allocation2 + $0x50] sm:$0xff] %vm117_vm1, %v155_v57  ;;  %v4347_v57 = vld [vmem:[#allocation4 + $0x50] sm:$0xff] }
  0xa1   :  { %833 = vmatpush.bf16.msrb.mxu1 %v4347_v57 }
  0xa2   :  { %v206_v58 = vpop.f32.mrf.mxu2  ;;  %v258_v59 = vpop.f32.mrf.mxu3 }
  0xa3   :  { %v207_v60 = vadd.f32 %v4262_v40, %v206_v58  ;;  %v259_v61 = vadd.f32 %v4267_v41, %v258_v59  ;;  %v104_v62 = vpop.f32.mrf.mxu0  ;;  %v156_v63 = vpop.f32.mrf.mxu1  ;;  %v4349_v58 = vld [vmem:[#allocation4 + $0x70] sm:$0xff] }
  0xa4   :  { %v105_v0 = vadd.f32 %v4248_v34, %v104_v62  ;;  %v157_v1 = vadd.f32 %v4253_v35, %v156_v63  ;;  %927 = vmatpush.bf16.msrb.mxu3 %v4349_v58  ;;  %v4357_v62 = vld [vmem:[#allocation4 + $0x68] sm:$0xff] }
  0xa5   :  { %224 = vst.msk [vmem:[#allocation2 + $0x90] sm:$0xff] %vm117_vm1, %v207_v60 }
  0xa6   :  { %276 = vst.msk [vmem:[#allocation2 + $0xd0] sm:$0xff] %vm117_vm1, %v259_v61  ;;  %v4355_v61 = vld [vmem:[#allocation4 + $0x48] sm:$0xff] }
  0xa7   :  { %121 = vst.msk [vmem:[#allocation2 + $0x18] sm:$0xff] %vm117_vm1, %v105_v0  ;;  %834 = vmatpush.bf16.msrb.mxu1 %v4355_v61 }
  0xa8   :  { %173 = vst.msk [vmem:[#allocation2 + $0x58] sm:$0xff] %vm117_vm1, %v157_v1  ;;  %928 = vmatpush.bf16.msrb.mxu3 %v4357_v62 }
  0xaa   :  { %v208_v2 = vpop.f32.mrf.mxu2  ;;  %v260_v3 = vpop.f32.mrf.mxu3 }
  0xab   :  { %v209_v6 = vadd.f32 %v4262_v40, %v208_v2  ;;  %v261_v7 = vadd.f32 %v4267_v41, %v260_v3  ;;  %v107_v20 = vpop.f32.mrf.mxu0  ;;  %v159_v21 = vpop.f32.mrf.mxu1 }
  0xac   :  { %v108_v22 = vadd.f32 %v4248_v34, %v107_v20  ;;  %v160_v27 = vadd.f32 %v4253_v35, %v159_v21  ;;  %v4369_v20 = vld [vmem:[#allocation4 + $0x60] sm:$0xff]  ;;  %v4380_v21 = vld [vmem:[%s5787_s4 + $0x18] sm:$0xff] }
  0xad   :  { %225 = vst.msk [vmem:[#allocation2 + $0x98] sm:$0xff] %vm117_vm1, %v209_v6  ;;  %929 = vmatpush.bf16.msrb.mxu3 %v4369_v20  ;;  %598 = vmatpush.bf16.msra.mxu0 %v4380_v21 }
  0xae   :  { %277 = vst.msk [vmem:[#allocation2 + $0xd8] sm:$0xff] %vm117_vm1, %v261_v7  ;;  %v4367_v7 = vld [vmem:[#allocation4 + $0x40] sm:$0xff] }
  0xaf   :  { %122 = vst.msk [vmem:[#allocation2 + $0x20] sm:$0xff] %vm117_vm1, %v108_v22  ;;  %835 = vmatpush.bf16.msrb.mxu1 %v4367_v7  ;;  %v4385_v22 = vld [vmem:[%s5787_s4 + $0x38] sm:$0xff] }
  0xb0   :  { %174 = vst.msk [vmem:[#allocation2 + $0x60] sm:$0xff] %vm117_vm1, %v160_v27  ;;  %930 = vmatmul.bf16.vlgmr.msrb.gmra.mxu3 %v4036_v33  ;;  %691 = vmatpush.bf16.msra.mxu2 %v4385_v22 }
  0xb1   :  { %1049 = vmatpush.bf16.msra.mxu3 %v4124_v10 }
  0xb2   :  { %v211_v30 = vpop.f32.mrf.mxu2  ;;  %v263_v31 = vpop.f32.mrf.mxu3  ;;  %836 = vmatmul.bf16.vlgmr.msrb.gmra.mxu1 %v4036_v33  ;;  %v4400_v33 = vld [vmem:[%s5787_s4 + $0x10] sm:$0xff] }
  0xb3   :  { %v212_v37 = vadd.f32 %v4262_v40, %v211_v30  ;;  %v264_v38 = vadd.f32 %v4267_v41, %v263_v31  ;;  %v109_v39 = vpop.f32.mrf.mxu0  ;;  %v161_v42 = vpop.f32.mrf.mxu1  ;;  %1019 = vmatpush.bf16.msra.mxu1 %v4119_v9  ;;  %v301_v31 = vld [vmem:[#allocation2] sm:$0xff]  ;;  %599 = vmatpush.bf16.msra.mxu0 %v4400_v33 }
  0xb4   :  { %v110_v43 = vadd.f32 %v4248_v34, %v109_v39  ;;  %v162_v44 = vadd.f32 %v4253_v35, %v161_v42  ;;  %v4405_v42 = vld [vmem:[%s5787_s4 + $0x30] sm:$0xff] }
  0xb5   :  { %226 = vst.msk [vmem:[#allocation2 + $0xa0] sm:$0xff] %vm117_vm1, %v212_v37  ;;  %v351_v37 = vld [vmem:[#allocation2 + $0x40] sm:$0xff]  ;;  %1050 = vmatpush.bf16.msra.mxu3 %v4150_v14  ;;  %692 = vmatpush.bf16.msra.mxu2 %v4405_v42 }
  0xb6   :  { %278 = vst.msk [vmem:[#allocation2 + $0xe0] sm:$0xff] %vm117_vm1, %v264_v38  ;;  %v447_v14 = vld [vmem:[#allocation2 + $0xc0] sm:$0xff] }
  0xb7   :  { %123 = vst.msk [vmem:[#allocation2 + $0x28] sm:$0xff] %vm117_vm1, %v110_v43  ;;  %1020 = vmatpush.bf16.msra.mxu1 %v4141_v13 }
  0xb8   :  { %175 = vst.msk [vmem:[#allocation2 + $0x68] sm:$0xff] %vm117_vm1, %v162_v44  ;;  %v4413_v44 = vld [vmem:[%s5787_s4 + $0x8] sm:$0xff] }
  0xb9   :  { %1051 = vmatpush.bf16.msra.mxu3 %v4176_v18  ;;  %600 = vmatpush.bf16.msra.mxu0 %v4413_v44  ;;  %v4432_v18 = vld [vmem:[%s5787_s4 + $0x20] sm:$0xff] }
  0xba   :  { %v213_v47 = vpop.f32.mrf.mxu2  ;;  %v265_v48 = vpop.f32.mrf.mxu3 }
  0xbb   :  { %v214_v51 = vadd.f32 %v4262_v40, %v213_v47  ;;  %v266_v52 = vadd.f32 %v4267_v41, %v265_v48  ;;  %v112_v53 = vpop.f32.mrf.mxu0  ;;  %v164_v54 = vpop.f32.mrf.mxu1  ;;  %1021 = vmatpush.bf16.msra.mxu1 %v4167_v17  ;;  %v4418_v47 = vld [vmem:[%s5787_s4 + $0x28] sm:$0xff] }
  0xbc   :  { %v113_v55 = vadd.f32 %v4248_v34, %v112_v53  ;;  %v165_v56 = vadd.f32 %v4253_v35, %v164_v54  ;;  %693 = vmatpush.bf16.msra.mxu2 %v4418_v47  ;;  %v4427_v54 = vld [vmem:[%s5787_s4] sm:$0xff] }
  0xbd   :  { %227 = vst.msk [vmem:[#allocation2 + $0xa8] sm:$0xff] %vm117_vm1, %v214_v51  ;;  %1052 = vmatpush.bf16.msra.mxu3 %v4210_v25  ;;  %601 = vmatpush.bf16.msra.mxu0 %v4427_v54  ;;  %v4445_v25 = vld [vmem:[%s5787_s4 + $0x58] sm:$0xff] }
  0xbe   :  { %279 = vst.msk [vmem:[#allocation2 + $0xe8] sm:$0xff] %vm117_vm1, %v266_v52 }
  0xbf   :  { %124 = vst.msk [vmem:[#allocation2 + $0x30] sm:$0xff] %vm117_vm1, %v113_v55  ;;  %1022 = vmatpush.bf16.msra.mxu1 %v4205_v24 }
  0xc0   :  { %176 = vst.msk [vmem:[#allocation2 + $0x70] sm:$0xff] %vm117_vm1, %v165_v56  ;;  %694 = vmatpush.bf16.msra.mxu2 %v4432_v18 }
  0xc1   :  { %1176 = vmatpush.bf16.msrb.mxu3 %v4295_v5  ;;  %785 = vmatpush.bf16.msrb.mxu0 %v4445_v25 }
  0xc2   :  { %v216_v59 = vpop.f32.mrf.mxu2  ;;  %v268_v60 = vpop.f32.mrf.mxu3 }
  0xc3   :  { %v217_v63 = vadd.f32 %v4262_v40, %v216_v59  ;;  %v269_v0 = vadd.f32 %v4267_v41, %v268_v60  ;;  %v114_v1 = vpop.f32.mrf.mxu0  ;;  %v166_v2 = vpop.f32.mrf.mxu1  ;;  %1148 = vmatpush.bf16.msrb.mxu1 %v4293_v4 }
  0xc4   :  { %v115_v3 = vadd.f32 %v4248_v34, %v114_v1  ;;  %v167_v6 = vadd.f32 %v4253_v35, %v166_v2  ;;  %v4464_v1 = vld [vmem:[%s5787_s4 + $0x70] sm:$0xff] }
  0xc5   :  { %228 = vst.msk [vmem:[#allocation2 + $0xb0] sm:$0xff] %vm117_vm1, %v217_v63  ;;  %v4450_v63 = vld [vmem:[%s5787_s4 + $0x78] sm:$0xff]  ;;  %1177 = vmatpush.bf16.msrb.mxu3 %v4307_v29 }
  0xc6   :  { %280 = vst.msk [vmem:[#allocation2 + $0xf0] sm:$0xff] %vm117_vm1, %v269_v0  ;;  %879 = vmatpush.bf16.msrb.mxu2 %v4450_v63  ;;  %v4459_v0 = vld [vmem:[%s5787_s4 + $0x50] sm:$0xff] }
  0xc7   :  { %125 = vst.msk [vmem:[#allocation2 + $0x38] sm:$0xff] %vm117_vm1, %v115_v3  ;;  %1149 = vmatpush.bf16.msrb.mxu1 %v4305_v28  ;;  %v399_v3 = vld [vmem:[#allocation2 + $0x80] sm:$0xff]  ;;  %786 = vmatpush.bf16.msrb.mxu0 %v4459_v0 }
  0xc8   :  { %177 = vst.msk [vmem:[#allocation2 + $0x78] sm:$0xff] %vm117_vm1, %v167_v6 }
  0xc9   :  { %1178 = vmatpush.bf16.msrb.mxu3 %v4315_v36 }
  0xca   :  { %v218_v34 = vpop.f32.mrf.mxu2  ;;  %v270_v35 = vpop.f32.mrf.mxu3  ;;  %880 = vmatpush.bf16.msrb.mxu2 %v4464_v1 }
  0xcb   :  { %v219_v27 = vadd.f32 %v4262_v40, %v218_v34  ;;  %v271_v30 = vadd.f32 %v4267_v41, %v270_v35  ;;  %v346_v9 = vpop.f32.mrf.mxu0  ;;  %v394_v10 = vpop.f32.mrf.mxu1  ;;  %1150 = vmatpush.bf16.msrb.mxu1 %v4313_v32 }
  0xcc   :  { %v350_v38 = vadd.f32 %v346_v9, %v301_v31  ;;  %v398_v39 = vadd.f32 %v394_v10, %v351_v37  ;;  %v4476_v31 = vld [vmem:[%s5787_s4 + $0x48] sm:$0xff] }
  0xcd   :  { %229 = vst.msk [vmem:[#allocation2 + $0xb8] sm:$0xff] %vm117_vm1, %v219_v27  ;;  %v4481_v9 = vld [vmem:[%s5787_s4 + $0x68] sm:$0xff]  ;;  %1179 = vmatpush.bf16.msrb.mxu3 %v4327_v46  ;;  %787 = vmatpush.bf16.msrb.mxu0 %v4476_v31 }
  0xce   :  { %281 = vst.msk [vmem:[#allocation2 + $0xf8] sm:$0xff] %vm117_vm1, %v271_v30  ;;  %v3293_v40 = vmul.f32 -1.442695, %v350_v38  ;;  %v3294_v41 = vmul.f32 -1.442695, %v398_v39  ;;  %881 = vmatpush.bf16.msrb.mxu2 %v4481_v9 }
  0xcf   :  { %1151 = vmatpush.bf16.msrb.mxu1 %v4325_v45 }
  0xd0   :  { %3647 = vpow2.f32 %v3293_v40 }
  0xd1   :  { %3649 = vpow2.f32 %v3294_v41 }
  0xd2   :  { %v442_v13 = vpop.f32.mrf.mxu2  ;;  %v490_v43 = vpop.f32.mrf.mxu3 }
  0xd3   :  { %v494_v48 = vadd.f32 %v490_v43, %v447_v14  ;;  %v348_v51 = vpop.f32.mrf.mxu0  ;;  %v396_v52 = vpop.f32.mrf.mxu1  ;;  %v446_v35 = vadd.f32 %v442_v13, %v399_v3  ;;  %v4492_v14 = vld [vmem:[%s5787_s4 + $0x40] sm:$0xff] }
  0xd4   :  { %v4497_v43 = vld [vmem:[%s5787_s4 + $0x60] sm:$0xff]  ;;  %788 = vmatpush.bf16.msrb.mxu0 %v4492_v14 }
  0xd5   :  { %v3295_v17 = vmul.f32 -1.442695, %v494_v48  ;;  %882 = vmatpush.bf16.msrb.mxu2 %v4497_v43 }
  0xd6   :  { %v3648_v53 = vpop.eup %3647 }
  0xd7   :  { %v3650_v55 = vpop.eup %3649  ;;  %v498_v56 = vadd.f32 1.0, %v3648_v53  ;;  %3651 = vpow2.f32 %v3295_v17 }
  0xd8   :  { %v4437_v24 = vadd.f32 1.0, %v3650_v55 }
  0xd9   :  { %3653 = vrcp.f32 %v498_v56  ;;  %v510_v39 = vand.u32 2147483648, %v498_v56  ;;  %v508_v13 = vand.u32 2147483647, %v498_v56  ;;  %vm504_vm4 = vweird.f32 %v498_v56 }
  0xda   :  { %3655 = vrcp.f32 %v4437_v24  ;;  %v492_v59 = vpop.f32.mrf.mxu3  ;;  %v444_v60 = vpop.f32.mrf.mxu2  ;;  %v529_v40 = vand.u32 2147483648, %v4437_v24  ;;  %v527_v51 = vand.u32 2147483647, %v4437_v24  ;;  %vm523_vm5 = vweird.f32 %v4437_v24 }
  0xdb   :  { %v511_v53 = vor.u32 1.1754944e-38, %v510_v39  ;;  %vm509_vm7 = vcmp.eq.f32.partialorder %v508_v13, 8.507059e+37 }
  0xdc   :  { %v530_v60 = vor.u32 1.1754944e-38, %v529_v40  ;;  %vm528_vm9 = vcmp.eq.f32.partialorder %v527_v51, 8.507059e+37 }
  0xdd   :  { %v3652_v2 = vpop.eup %3651 }
  0xde   :  { %v4466_v6 = vadd.f32 1.0, %v3652_v2 }
  0xdf   :  { %v3654_v34 = vpop.eup %3653 }
  0xe0   :  { %v3656_v27 = vpop.eup %3655  ;;  %v500_v30 = vmul.f32 %v3654_v34, %v498_v56  ;;  %3657 = vrcp.f32 %v4466_v6  ;;  %vm505_vm2 = vweird.f32 %v3654_v34  ;;  %vm543_vm11 = vweird.f32 %v4466_v6 }
  0xe1   :  { %v519_v37 = vmul.f32 %v3656_v27, %v4437_v24  ;;  %3659 = vtanh.f32 %v446_v35  ;;  %vm524_vm3 = vweird.f32 %v3656_v27  ;;  %vm506_vm6 = vmor %vm504_vm4, %vm505_vm2  ;;  %v547_v40 = vand.u32 2147483647, %v4466_v6 }
  0xe2   :  { %v501_v10 = vsub.f32 1.0, %v500_v30  ;;  %vm525_vm8 = vmor %vm523_vm5, %vm524_vm3 }
  0xe3   :  { %v520_v38 = vsub.f32 1.0, %v519_v37  ;;  %vm548_vm13 = vcmp.eq.f32.partialorder %v547_v40, 8.507059e+37 }
  0xe4   :  { %v502_v41 = vmul.f32 %v3654_v34, %v501_v10 }
  0xe5   :  { %v521_v48 = vmul.f32 %v3656_v27, %v520_v38 }
  0xe6   :  { %v3658_v52 = vpop.eup %3657  ;;  %v503_v17 = vadd.f32 %v3654_v34, %v502_v41 }
  0xe7   :  { %v522_v55 = vadd.f32 %v3656_v27, %v521_v48  ;;  %v539_v59 = vmul.f32 %v3658_v52, %v4466_v6  ;;  %v3660_v3 = vpop.eup %3659  ;;  %vm544_vm10 = vweird.f32 %v3658_v52 }
  0xe8   :  { %v507_v2 = vsel %vm506_vm6, %v3654_v34, %v503_v17  ;;  %v549_v34 = vand.u32 2147483648, %v4466_v6  ;;  %vm545_vm12 = vmor %vm543_vm11, %vm544_vm10  ;;  %v4553_v6 = vld [vmem:[%s5789_s6] ss:$0 sm:$0xff] }
  0xe9   :  { %v512_v35 = vsel %vm509_vm7, %v511_v53, %v507_v2  ;;  %v526_v30 = vsel %vm525_vm8, %v3656_v27, %v522_v55  ;;  %v540_v56 = vsub.f32 1.0, %v539_v59  ;;  %v4559_v2 = vld [vmem:[%s5789_s6 + $0x1] ss:$0 sm:$0xff] }
  0xea   :  { %v531_v37 = vsel %vm528_vm9, %v530_v60, %v526_v30  ;;  %v554_v24 = vmul.f32 %v3660_v3, %v512_v35  ;;  %v550_v13 = vor.u32 1.1754944e-38, %v549_v34 }
  0xeb   :  { %v553_v10 = vmul.f32 0.0, %v531_v37  ;;  %v541_v38 = vmul.f32 %v3658_v52, %v540_v56  ;;  %v1014_v37 = vld [vmem:[#allocation2 + $0x48] sm:$0xff] }
  0xed   :  { %v4504_v39 = vadd.f32 %v554_v24, %v553_v10  ;;  %v542_v41 = vadd.f32 %v3658_v52, %v541_v38 }
  0xef   :  { %3661 = vtanh.f32 %v4504_v39  ;;  %v546_v27 = vsel %vm545_vm12, %v3658_v52, %v542_v41 }
  0xf0   :  { %v551_v51 = vsel %vm548_vm13, %v550_v13, %v546_v27 }
  0xf5   :  { %v3662_v48 = vpop.eup %3661 }
  0xf6   :  { %v557_v17 = vmul.f32 %v3662_v48, %v551_v51  ;;  %v4565_v51 = vld [vmem:[%s5789_s6 + $0x2] ss:$0 sm:$0xff] }
  0xf7   :  { %5840 = vst [vmem:[#allocation7_spill] sm:$0xff] %v4565_v51 }
  0xf8   :  { %v558_v53 = vpack.c.bf16 %v557_v17, %v557_v17 }
  0xfa   :  { %3312 = vmatmul.msk.bf16.vlgmr.msra.gmra.mxu0 %vm117_vm1, %v558_v53  ;;  %3353 = vmatmul.msk.bf16.vlgmr.msra.gmra.mxu2 %vm117_vm1, %v558_v53 }
  0xfb   :  { %3456 = vmatmul.msk.bf16.vlgmr.msra.gmra.mxu1 %vm117_vm1, %v558_v53  ;;  %3458 = vmatmul.msk.bf16.vlgmr.msra.gmra.mxu3 %vm117_vm1, %v558_v53 }
  0xfc   :  { %1004 = vmatpush.bf16.msra.mxu0 %v4114_v8  ;;  %1034 = vmatpush.bf16.msra.mxu2 %v4129_v11 }
  0xfd   :  { %1204 = vmatpush.bf16.msra.mxu1 %v4333_v49  ;;  %1232 = vmatpush.bf16.msra.mxu3 %v4335_v50 }
 0x100   :  { %1005 = vmatpush.bf16.msra.mxu0 %v4136_v12  ;;  %1035 = vmatpush.bf16.msra.mxu2 %v4157_v15 }
 0x101   :  { %1205 = vmatpush.bf16.msra.mxu1 %v4347_v57  ;;  %1233 = vmatpush.bf16.msra.mxu3 %v4349_v58 }
 0x104   :  { %1006 = vmatpush.bf16.msra.mxu0 %v4162_v16  ;;  %1036 = vmatpush.bf16.msra.mxu2 %v4181_v19 }
 0x105   :  { %1206 = vmatpush.bf16.msra.mxu1 %v4355_v61  ;;  %1234 = vmatpush.bf16.msra.mxu3 %v4357_v62 }
 0x108   :  { %1007 = vmatpush.bf16.msra.mxu0 %v4200_v23  ;;  %1037 = vmatpush.bf16.msra.mxu2 %v4215_v26 }
 0x109   :  { %1207 = vmatpush.bf16.msra.mxu1 %v4367_v7  ;;  %1235 = vmatpush.bf16.msra.mxu3 %v4369_v20 }
 0x10a   :  { %3394 = vmatmul.msk.bf16.vlgmr.msrb.gmra.mxu0 %vm117_vm1, %v558_v53  ;;  %3435 = vmatmul.msk.bf16.vlgmr.msrb.gmra.mxu2 %vm117_vm1, %v558_v53 }
 0x10c   :  { %1131 = vmatpush.bf16.msrb.mxu0 %v4380_v21  ;;  %1162 = vmatpush.bf16.msrb.mxu2 %v4385_v22 }
 0x110   :  { %1132 = vmatpush.bf16.msrb.mxu0 %v4400_v33  ;;  %1163 = vmatpush.bf16.msrb.mxu2 %v4405_v42 }
 0x114   :  { %1133 = vmatpush.bf16.msrb.mxu0 %v4413_v44  ;;  %1164 = vmatpush.bf16.msrb.mxu2 %v4418_v47 }
 0x117   :  { %v649_v8 = vpop.f32.mrf.mxu1 }
 0x118   :  { %1134 = vmatpush.bf16.msrb.mxu0 %v4427_v54  ;;  %1165 = vmatpush.bf16.msrb.mxu2 %v4432_v18 }
 0x11a   :  { %3455 = vmatmul.msk.bf16.vlgmr.msra.gmra.mxu0 %vm117_vm1, %v558_v53  ;;  %3457 = vmatmul.msk.bf16.vlgmr.msra.gmra.mxu2 %vm117_vm1, %v558_v53 }
 0x11b   :  { %v743_v11 = vpop.f32.mrf.mxu3 }
 0x11c   :  { %1190 = vmatpush.bf16.msra.mxu0 %v4445_v25  ;;  %1218 = vmatpush.bf16.msra.mxu2 %v4450_v63 }
 0x11f   :  { %v651_v12 = vpop.f32.mrf.mxu1 }
 0x120   :  { %1191 = vmatpush.bf16.msra.mxu0 %v4459_v0  ;;  %1219 = vmatpush.bf16.msra.mxu2 %v4464_v1 }
 0x123   :  { %v745_v15 = vpop.f32.mrf.mxu3 }
 0x124   :  { %1192 = vmatpush.bf16.msra.mxu0 %v4476_v31  ;;  %1220 = vmatpush.bf16.msra.mxu2 %v4481_v9  ;;  %v4571_v15 = vld [vmem:[%s5789_s6 + $0x3] ss:$0 sm:$0xff] }
 0x125   :  { %5841 = vst [vmem:[#allocation8_spill] sm:$0xff] %v4571_v15 }
 0x128   :  { %1193 = vmatpush.bf16.msra.mxu0 %v4492_v14  ;;  %1221 = vmatpush.bf16.msra.mxu2 %v4497_v43 }
 0x12f   :  { %v837_v16 = vpop.f32.mrf.mxu1 }
 0x133   :  { %v931_v19 = vpop.f32.mrf.mxu3 }
 0x137   :  { %v839_v23 = vpop.f32.mrf.mxu1 }
 0x13b   :  { %v933_v26 = vpop.f32.mrf.mxu3 }
 0x177   :  { %v603_v52 = vpop.f32.mrf.mxu0 }
 0x178   :  { %v607_v55 = vadd.f32 %v4553_v6, %v603_v52  ;;  %v1024_v59 = vpop.f32.mrf.mxu1 }
 0x179   :  { %v1028_v10 = vadd.f32 %v1024_v59, %v1014_v37 }
 0x17a   :  { %v653_v60 = vadd.f32 %v649_v8, %v607_v55 }
 0x17b   :  { %v3460_v27 = vmul.f32 -1.442695, %v1028_v10 }
 0x17c   :  { %v3452_v3 = vmul.f32 -1.442695, %v653_v60  ;;  %v1044_v60 = vld [vmem:[#allocation2 + $0xc8] sm:$0xff] }
 0x17d   :  { %v696_v35 = vpop.f32.mrf.mxu2 }
 0x17e   :  { %3663 = vpow2.f32 %v3452_v3  ;;  %v700_v30 = vadd.f32 %v4559_v2, %v696_v35  ;;  %v1054_v56 = vpop.f32.mrf.mxu3 }
 0x17f   :  { %v605_v24 = vpop.f32.mrf.mxu0  ;;  %v1058_v3 = vadd.f32 %v1054_v56, %v1044_v60 }
 0x180   :  { %v747_v38 = vadd.f32 %v743_v11, %v700_v30  ;;  %v1026_v41 = vpop.f32.mrf.mxu1 }
 0x182   :  { %v3453_v34 = vmul.f32 -1.442695, %v747_v38 }
 0x184   :  { %v3664_v40 = vpop.eup %3663  ;;  %3665 = vpow2.f32 %v3453_v34 }
 0x185   :  { %v939_v13 = vadd.f32 1.0, %v3664_v40  ;;  %v698_v48 = vpop.f32.mrf.mxu2 }
 0x186   :  { %v1056_v17 = vpop.f32.mrf.mxu3 }
 0x187   :  { %3667 = vrcp.f32 %v939_v13  ;;  %v790_v53 = vpop.f32.mrf.mxu0  ;;  %v951_v10 = vand.u32 2147483648, %v939_v13  ;;  %v949_v41 = vand.u32 2147483647, %v939_v13  ;;  %vm945_vm15 = vweird.f32 %v939_v13 }
 0x188   :  { %3669 = vpow2.f32 %v3460_v27  ;;  %v794_v8 = vadd.f32 %v4565_v51, %v790_v53  ;;  %v3461_v27 = vmul.f32 -1.442695, %v1058_v3 }
 0x189   :  { %v952_v56 = vor.u32 1.1754944e-38, %v951_v10  ;;  %vm950_vm2 = vcmp.eq.f32.partialorder %v949_v41, 8.507059e+37 }
 0x18a   :  { %v3666_v12 = vpop.eup %3665  ;;  %v841_v26 = vadd.f32 %v837_v16, %v794_v8 }
 0x18b   :  { %v958_v11 = vadd.f32 1.0, %v3666_v12 }
 0x18d   :  { %v3668_v23 = vpop.eup %3667  ;;  %3671 = vrcp.f32 %v958_v11  ;;  %v884_v52 = vpop.f32.mrf.mxu2  ;;  %vm964_vm4 = vweird.f32 %v958_v11 }
 0x18e   :  { %v3670_v55 = vpop.eup %3669  ;;  %v941_v59 = vmul.f32 %v3668_v23, %v939_v13  ;;  %v888_v37 = vadd.f32 %v4571_v15, %v884_v52  ;;  %3673 = vtanh.f32 %v841_v26  ;;  %vm946_vm14 = vweird.f32 %v3668_v23 }
 0x18f   :  { %v792_v35 = vpop.f32.mrf.mxu0  ;;  %v4574_v24 = vadd.f32 1.0, %v3670_v55  ;;  %vm947_vm0 = vmor %vm945_vm15, %vm946_vm14  ;;  %v970_v52 = vand.u32 2147483648, %v958_v11 }
 0x190   :  { %v942_v30 = vsub.f32 1.0, %v941_v59  ;;  %v935_v34 = vadd.f32 %v931_v19, %v888_v37  ;;  %v968_v19 = vand.u32 2147483647, %v958_v11  ;;  %v999_v59 = vld [vmem:[#allocation2 + $0x8] sm:$0xff] }
 0x191   :  { %3675 = vrcp.f32 %v4574_v24  ;;  %vm1087_vm10 = vweird.f32 %v4574_v24 }
 0x192   :  { %v943_v38 = vmul.f32 %v3668_v23, %v942_v30  ;;  %v3454_v17 = vmul.f32 -1.442695, %v935_v34  ;;  %vm969_vm6 = vcmp.eq.f32.partialorder %v968_v19, 8.507059e+37 }
 0x193   :  { %v3672_v40 = vpop.eup %3671 }
 0x194   :  { %v960_v16 = vmul.f32 %v3672_v40, %v958_v11  ;;  %v944_v48 = vadd.f32 %v3668_v23, %v943_v38  ;;  %3677 = vpow2.f32 %v3454_v17  ;;  %v3674_v26 = vpop.eup %3673  ;;  %vm965_vm3 = vweird.f32 %v3672_v40 }
 0x195   :  { %v886_v53 = vpop.f32.mrf.mxu2  ;;  %3679 = vpow2.f32 %v3461_v27  ;;  %v971_v38 = vor.u32 1.1754944e-38, %v970_v52  ;;  %vm966_vm5 = vmor %vm964_vm4, %vm965_vm3 }
 0x196   :  { %v961_v8 = vsub.f32 1.0, %v960_v16  ;;  %v948_v12 = vsel %vm947_vm0, %v3668_v23, %v944_v48 }
 0x197   :  { %v953_v55 = vsel %vm950_vm2, %v952_v56, %v948_v12  ;;  %v1009_v60 = vpop.f32.mrf.mxu0  ;;  %v4577_v10 = vpop.eup %3675 }
 0x198   :  { %v962_v3 = vmul.f32 %v3672_v40, %v961_v8  ;;  %v995_v13 = vmul.f32 %v3674_v26, %v953_v55  ;;  %v1013_v35 = vadd.f32 %v1009_v60, %v999_v59  ;;  %v1083_v56 = vmul.f32 %v4577_v10, %v4574_v24 }
 0x199   :  { %vm1088_vm8 = vweird.f32 %v4577_v10 }
 0x19a   :  { %v963_v30 = vadd.f32 %v3672_v40, %v962_v3  ;;  %v3459_v37 = vmul.f32 -1.442695, %v1013_v35  ;;  %v3678_v23 = vpop.eup %3677  ;;  %v1084_v26 = vsub.f32 1.0, %v1083_v56  ;;  %vm4596_vm12 = vmor %vm1087_vm10, %vm1088_vm8 }
 0x19b   :  { %v3680_v34 = vpop.eup %3679  ;;  %v978_v16 = vadd.f32 1.0, %v3678_v23 }
 0x19c   :  { %v967_v41 = vsel %vm966_vm5, %v3672_v40, %v963_v30  ;;  %3681 = vpow2.f32 %v3459_v37  ;;  %v4581_v53 = vadd.f32 1.0, %v3680_v34  ;;  %v1085_v59 = vmul.f32 %v4577_v10, %v1084_v26 }
 0x19d   :  { %v972_v27 = vsel %vm969_vm6, %v971_v38, %v967_v41  ;;  %v1039_v48 = vpop.f32.mrf.mxu2  ;;  %3683 = vrcp.f32 %v978_v16  ;;  %v990_v3 = vand.u32 2147483648, %v978_v16  ;;  %v988_v37 = vand.u32 2147483647, %v978_v16 }
 0x19e   :  { %v994_v17 = vmul.f32 0.0, %v972_v27  ;;  %3685 = vrcp.f32 %v4581_v53  ;;  %v1086_v41 = vadd.f32 %v4577_v10, %v1085_v59  ;;  %vm984_vm9 = vweird.f32 %v978_v16 }
 0x19f   :  { %v1011_v11 = vpop.f32.mrf.mxu0  ;;  %vm989_vm13 = vcmp.eq.f32.partialorder %v988_v37, 8.507059e+37  ;;  %vm1107_vm5 = vweird.f32 %v4581_v53 }
 0x1a0   :  { %v4583_v8 = vadd.f32 %v995_v13, %v994_v17  ;;  %v1029_v13 = vld [vmem:[#allocation2 + $0x88] sm:$0xff]  ;;  %v1093_v17 = vand.u32 2147483648, %v4574_v24  ;;  %v991_v11 = vor.u32 1.1754944e-38, %v990_v3  ;;  %v1090_v59 = vsel %vm4596_vm12, %v4577_v10, %v1086_v41 }
 0x1a1   :  { %v1043_v23 = vadd.f32 %v1039_v48, %v1029_v13  ;;  %v1091_v48 = vand.u32 2147483647, %v4574_v24 }
 0x1a2   :  { %5842 = vst [vmem:[#allocation9_spill] sm:$0xff] %v4583_v8  ;;  %v3682_v12 = vpop.eup %3681 }
 0x1a3   :  { %v1062_v52 = vadd.f32 1.0, %v3682_v12  ;;  %v3684_v40 = vpop.eup %3683  ;;  %vm1092_vm0 = vcmp.eq.f32.partialorder %v1091_v48, 8.507059e+37  ;;  %v4650_v48 = vld [vmem:[%s5786_s3 + $0x68] sm:$0xff] }
 0x1a4   :  { %v980_v19 = vmul.f32 %v3684_v40, %v978_v16  ;;  %v4588_v35 = vpop.eup %3685  ;;  %vm985_vm7 = vweird.f32 %v3684_v40 }
 0x1a5   :  { %3687 = vrcp.f32 %v1062_v52  ;;  %v1041_v55 = vpop.f32.mrf.mxu2  ;;  %v1103_v56 = vmul.f32 %v4588_v35, %v4581_v53  ;;  %vm986_vm11 = vmor %vm984_vm9, %vm985_vm7  ;;  %v1072_v3 = vand.u32 2147483647, %v1062_v52  ;;  %vm1068_vm15 = vweird.f32 %v1062_v52 }
 0x1a6   :  { %v981_v60 = vsub.f32 1.0, %v980_v19  ;;  %3689 = vtanh.f32 %v4583_v8  ;;  %v1074_v19 = vand.u32 2147483648, %v1062_v52  ;;  %v1094_v8 = vor.u32 1.1754944e-38, %v1093_v17  ;;  %v4627_v17 = vld [vmem:[%s5786_s3 + $0x30] sm:$0xff] }
 0x1a7   :  { %3691 = vtanh.f32 %v1043_v23  ;;  %v1104_v51 = vsub.f32 1.0, %v1103_v56  ;;  %vm1073_vm3 = vcmp.eq.f32.partialorder %v1072_v3, 8.507059e+37  ;;  %vm1108_vm4 = vweird.f32 %v4588_v35  ;;  %v4633_v56 = vld [vmem:[%s5786_s3 + $0x70] sm:$0xff]  ;;  %v4678_v3 = vld [vmem:[%s5786_s3 + $0x58] sm:$0xff] }
 0x1a8   :  { %v982_v30 = vmul.f32 %v3684_v40, %v981_v60  ;;  %v1095_v37 = vsel %vm1092_vm0, %v1094_v8, %v1090_v59  ;;  %vm1109_vm6 = vmor %vm1107_vm5, %vm1108_vm4  ;;  %v4662_v59 = vld [vmem:[%s5786_s3 + $0x60] sm:$0xff] }
 0x1a9   :  { %v1105_v23 = vmul.f32 %v4588_v35, %v1104_v51  ;;  %v1117_v8 = vmul.f32 %v1095_v37, %v4504_v39  ;;  %v1113_v39 = vand.u32 2147483648, %v4581_v53  ;;  %v1350_v37 = vld [vmem:[#allocation2 + $0xd0] sm:$0xff] }
 0x1aa   :  { %v983_v27 = vadd.f32 %v3684_v40, %v982_v30 }
 0x1ab   :  { %v3688_v38 = vpop.eup %3687  ;;  %v1106_v51 = vadd.f32 %v4588_v35, %v1105_v23 }
 0x1ac   :  { %v1064_v34 = vmul.f32 %v3688_v38, %v1062_v52  ;;  %v987_v55 = vsel %vm986_vm11, %v3684_v40, %v983_v27  ;;  %v3690_v16 = vpop.eup %3689  ;;  %vm1069_vm14 = vweird.f32 %v3688_v38  ;;  %v1075_v40 = vor.u32 1.1754944e-38, %v1074_v19  ;;  %v4610_v27 = vld [vmem:[%s5786_s3 + $0x38] sm:$0xff] }
 0x1ad   :  { %v992_v60 = vsel %vm989_vm13, %v991_v11, %v987_v55  ;;  %vm1070_vm2 = vmor %vm1068_vm15, %vm1069_vm14  ;;  %v3692_v10 = vpop.eup %3691  ;;  %v1111_v11 = vand.u32 2147483647, %v4581_v53  ;;  %v1110_v12 = vsel %vm1109_vm6, %v4588_v35, %v1106_v51  ;;  %v1114_v55 = vor.u32 1.1754944e-38, %v1113_v39  ;;  %v4656_v35 = vld [vmem:[%s5786_s3 + $0x20] sm:$0xff] }
 0x1ae   :  { %v1065_v26 = vsub.f32 1.0, %v1064_v34  ;;  %v998_v13 = vmul.f32 %v3690_v16, %v992_v60 }
 0x1af   :  { %vm1112_vm7 = vcmp.eq.f32.partialorder %v1111_v11, 8.507059e+37 }
 0x1b0   :  { %v1066_v30 = vmul.f32 %v3688_v38, %v1065_v26  ;;  %v1123_v24 = vpack.c.bf16 %v998_v13, %v998_v13  ;;  %v4644_v26 = vld [vmem:[%s5786_s3 + $0x28] sm:$0xff]  ;;  %v1115_v16 = vsel %vm1112_vm7, %v1114_v55, %v1110_v12  ;;  %v4686_v13 = vld [vmem:[%s5786_s3 + $0x10] sm:$0xff] }
 0x1b1   :  { %v5846_v55 = vld [vmem:[#allocation7_spill] sm:$0xff] }
 0x1b2   :  { %v1067_v15 = vadd.f32 %v3688_v38, %v1066_v30  ;;  %3463 = vmatmul.msk.bf16.vlgmr.msrb.gmra.mxu1 %vm117_vm1, %v1123_v24  ;;  %3465 = vmatmul.msk.bf16.vlgmr.msrb.gmra.mxu3 %vm117_vm1, %v1123_v24  ;;  %v4672_v30 = vld [vmem:[%s5786_s3 + $0x18] sm:$0xff] }
 0x1b3   :  { %1325 = vmatpush.bf16.msrb.mxu1 %v4610_v27 }
 0x1b4   :  { %v1071_v34 = vsel %vm1070_vm2, %v3688_v38, %v1067_v15  ;;  %v4616_v15 = vld [vmem:[%s5786_s3 + $0x78] sm:$0xff] }
 0x1b5   :  { %v1076_v41 = vsel %vm1073_vm3, %v1075_v40, %v1071_v34  ;;  %1355 = vmatpush.bf16.msrb.mxu3 %v4616_v15 }
 0x1b6   :  { %v1118_v52 = vmul.f32 %v3692_v10, %v1076_v41 }
 0x1b7   :  { %1326 = vmatpush.bf16.msrb.mxu1 %v4627_v17 }
 0x1b8   :  { %v4620_v38 = vadd.f32 %v1118_v52, %v1117_v8  ;;  %v5845_v8 = vld [vmem:[#allocation8_spill] sm:$0xff] }
 0x1b9   :  { %1356 = vmatpush.bf16.msrb.mxu3 %v4633_v56 }
 0x1ba   :  { %3693 = vtanh.f32 %v4620_v38 }
 0x1bb   :  { %1327 = vmatpush.bf16.msrb.mxu1 %v4644_v26 }
 0x1bd   :  { %1357 = vmatpush.bf16.msrb.mxu3 %v4650_v48 }
 0x1bf   :  { %1328 = vmatpush.bf16.msrb.mxu1 %v4656_v35 }
 0x1c0   :  { %v3694_v53 = vpop.eup %3693 }
 0x1c1   :  { %v1121_v19 = vmul.f32 %v3694_v53, %v1115_v16  ;;  %1358 = vmatpush.bf16.msrb.mxu3 %v4662_v59 }
 0x1c2   :  { %3467 = vmatmul.msk.bf16.vlgmr.msra.gmra.mxu1 %vm117_vm1, %v1123_v24  ;;  %3469 = vmatmul.msk.bf16.vlgmr.msra.gmra.mxu3 %vm117_vm1, %v1123_v24  ;;  %v4692_v24 = vld [vmem:[%s5786_s3 + $0x50] sm:$0xff] }
 0x1c3   :  { %v1122_v60 = vpack.c.bf16 %v1121_v19, %v1121_v19  ;;  %1454 = vmatpush.bf16.msra.mxu1 %v4293_v4  ;;  %v4700_v4 = vld [vmem:[%s5786_s3 + $0x8] sm:$0xff] }
 0x1c5   :  { %3462 = vmatmul.msk.bf16.vlgmr.msrb.gmra.mxu0 %vm117_vm1, %v1122_v60  ;;  %3464 = vmatmul.msk.bf16.vlgmr.msrb.gmra.mxu2 %vm117_vm1, %v1122_v60 }
 0x1c6   :  { %1310 = vmatpush.bf16.msrb.mxu0 %v4672_v30  ;;  %1340 = vmatpush.bf16.msrb.mxu2 %v4678_v3 }
 0x1c7   :  { %1482 = vmatpush.bf16.msra.mxu3 %v4295_v5  ;;  %1455 = vmatpush.bf16.msra.mxu1 %v4305_v28  ;;  %v4706_v5 = vld [vmem:[%s5786_s3 + $0x48] sm:$0xff]  ;;  %v4714_v28 = vld [vmem:[%s5786_s3] sm:$0xff] }
 0x1ca   :  { %1311 = vmatpush.bf16.msrb.mxu0 %v4686_v13  ;;  %1341 = vmatpush.bf16.msrb.mxu2 %v4692_v24 }
 0x1cb   :  { %1483 = vmatpush.bf16.msra.mxu3 %v4307_v29  ;;  %1456 = vmatpush.bf16.msra.mxu1 %v4313_v32  ;;  %v4720_v29 = vld [vmem:[%s5786_s3 + $0x40] sm:$0xff] }
 0x1ce   :  { %1312 = vmatpush.bf16.msrb.mxu0 %v4700_v4  ;;  %1342 = vmatpush.bf16.msrb.mxu2 %v4706_v5 }
 0x1cf   :  { %1484 = vmatpush.bf16.msra.mxu3 %v4315_v36  ;;  %1457 = vmatpush.bf16.msra.mxu1 %v4325_v45 }
 0x1d2   :  { %1313 = vmatpush.bf16.msrb.mxu0 %v4714_v28  ;;  %1343 = vmatpush.bf16.msrb.mxu2 %v4720_v29 }
 0x1d3   :  { %1485 = vmatpush.bf16.msra.mxu3 %v4327_v46  ;;  %3474 = vmatmul.msk.bf16.vlgmr.msrb.gmra.mxu1 %vm117_vm1, %v1122_v60 }
 0x1d4   :  { %3476 = vmatmul.msk.bf16.vlgmr.msrb.gmra.mxu3 %vm117_vm1, %v1122_v60  ;;  %1510 = vmatpush.bf16.msrb.mxu1 %v4333_v49 }
 0x1d5   :  { %3466 = vmatmul.msk.bf16.vlgmr.msra.gmra.mxu0 %vm117_vm1, %v1122_v60  ;;  %3468 = vmatmul.msk.bf16.vlgmr.msra.gmra.mxu2 %vm117_vm1, %v1122_v60 }
 0x1d6   :  { %1437 = vmatpush.bf16.msra.mxu0 %v4380_v21  ;;  %1468 = vmatpush.bf16.msra.mxu2 %v4385_v22 }
 0x1d7   :  { %1538 = vmatpush.bf16.msrb.mxu3 %v4335_v50 }
 0x1d8   :  { %1511 = vmatpush.bf16.msrb.mxu1 %v4347_v57 }
 0x1da   :  { %1438 = vmatpush.bf16.msra.mxu0 %v4400_v33  ;;  %1469 = vmatpush.bf16.msra.mxu2 %v4405_v42 }
 0x1db   :  { %1539 = vmatpush.bf16.msrb.mxu3 %v4349_v58 }
 0x1dc   :  { %1512 = vmatpush.bf16.msrb.mxu1 %v4355_v61 }
 0x1de   :  { %1439 = vmatpush.bf16.msra.mxu0 %v4413_v44  ;;  %1470 = vmatpush.bf16.msra.mxu2 %v4418_v47 }
 0x1df   :  { %1540 = vmatpush.bf16.msrb.mxu3 %v4357_v62 }
 0x1e0   :  { %1513 = vmatpush.bf16.msrb.mxu1 %v4367_v7 }
 0x1e2   :  { %1440 = vmatpush.bf16.msra.mxu0 %v4427_v54  ;;  %1471 = vmatpush.bf16.msra.mxu2 %v4432_v18 }
 0x1e3   :  { %1541 = vmatpush.bf16.msrb.mxu3 %v4369_v20 }
 0x1e5   :  { %3473 = vmatmul.msk.bf16.vlgmr.msrb.gmra.mxu0 %vm117_vm1, %v1122_v60  ;;  %3475 = vmatmul.msk.bf16.vlgmr.msrb.gmra.mxu2 %vm117_vm1, %v1122_v60 }
 0x1e6   :  { %1496 = vmatpush.bf16.msrb.mxu0 %v4445_v25  ;;  %1524 = vmatpush.bf16.msrb.mxu2 %v4450_v63  ;;  %v1320_v25 = vld [vmem:[#allocation2 + $0x50] sm:$0xff] }
 0x1ea   :  { %1497 = vmatpush.bf16.msrb.mxu0 %v4459_v0  ;;  %1525 = vmatpush.bf16.msrb.mxu2 %v4464_v1 }
 0x1ee   :  { %1498 = vmatpush.bf16.msrb.mxu0 %v4476_v31  ;;  %1526 = vmatpush.bf16.msrb.mxu2 %v4481_v9 }
 0x1f2   :  { %1499 = vmatpush.bf16.msrb.mxu0 %v4492_v14  ;;  %1527 = vmatpush.bf16.msrb.mxu2 %v4497_v43 }
 0x22f   :  { %v1153_v32 = vpop.f32.mrf.mxu1 }
 0x235   :  { %v1181_v36 = vpop.f32.mrf.mxu3 }
 0x237   :  { %v1155_v45 = vpop.f32.mrf.mxu1 }
 0x23d   :  { %v1183_v46 = vpop.f32.mrf.mxu3 }
 0x23f   :  { %v1209_v49 = vpop.f32.mrf.mxu1 }
 0x242   :  { %v1136_v50 = vpop.f32.mrf.mxu0 }
 0x243   :  { %v1140_v57 = vadd.f32 %v4553_v6, %v1136_v50 }
 0x245   :  { %v1157_v58 = vadd.f32 %v1153_v32, %v1140_v57  ;;  %v1237_v62 = vpop.f32.mrf.mxu3 }
 0x247   :  { %v3470_v61 = vmul.f32 -1.442695, %v1157_v58  ;;  %v1211_v20 = vpop.f32.mrf.mxu1 }
 0x248   :  { %v1167_v7 = vpop.f32.mrf.mxu2 }
 0x249   :  { %3695 = vpow2.f32 %v3470_v61  ;;  %v1171_v21 = vadd.f32 %v4559_v2, %v1167_v7  ;;  %v1305_v7 = vld [vmem:[#allocation2 + $0x10] sm:$0xff] }
 0x24a   :  { %v1138_v22 = vpop.f32.mrf.mxu0 }
 0x24b   :  { %v1185_v33 = vadd.f32 %v1181_v36, %v1171_v21 }
 0x24d   :  { %v3471_v42 = vmul.f32 -1.442695, %v1185_v33  ;;  %v1239_v47 = vpop.f32.mrf.mxu3 }
 0x24f   :  { %v3696_v44 = vpop.eup %3695  ;;  %3697 = vpow2.f32 %v3471_v42 }
 0x250   :  { %v4757_v54 = vadd.f32 1.0, %v3696_v44  ;;  %v1169_v18 = vpop.f32.mrf.mxu2  ;;  %v1330_v63 = vpop.f32.mrf.mxu1 }
 0x251   :  { %v1334_v0 = vadd.f32 %v1330_v63, %v1320_v25 }
 0x252   :  { %3699 = vrcp.f32 %v4757_v54  ;;  %v1195_v1 = vpop.f32.mrf.mxu0  ;;  %vm1251_vm10 = vweird.f32 %v4757_v54  ;;  %v1257_v42 = vand.u32 2147483648, %v4757_v54 }
 0x253   :  { %v3478_v31 = vmul.f32 -1.442695, %v1334_v0  ;;  %v1199_v53 = vadd.f32 %v5846_v55, %v1195_v1 }
 0x255   :  { %v3698_v9 = vpop.eup %3697  ;;  %3701 = vpow2.f32 %v3478_v31  ;;  %v1213_v58 = vadd.f32 %v1209_v49, %v1199_v53  ;;  %v1255_v49 = vand.u32 2147483647, %v4757_v54 }
 0x256   :  { %v1264_v14 = vadd.f32 1.0, %v3698_v9 }
 0x257   :  { %v1360_v43 = vpop.f32.mrf.mxu3  ;;  %vm1256_vm15 = vcmp.eq.f32.partialorder %v1255_v49, 8.507059e+37 }
 0x258   :  { %v3700_v40 = vpop.eup %3699  ;;  %3703 = vrcp.f32 %v1264_v14  ;;  %v1223_v34 = vpop.f32.mrf.mxu2  ;;  %v1364_v23 = vadd.f32 %v1360_v43, %v1350_v37  ;;  %v1276_v61 = vand.u32 2147483648, %v1264_v14  ;;  %vm1270_vm11 = vweird.f32 %v1264_v14 }
 0x259   :  { %v1247_v10 = vmul.f32 %v3700_v40, %v4757_v54  ;;  %v1332_v41 = vpop.f32.mrf.mxu1  ;;  %v1227_v52 = vadd.f32 %v5845_v8, %v1223_v34  ;;  %vm1252_vm8 = vweird.f32 %v3700_v40  ;;  %v1258_v43 = vor.u32 1.1754944e-38, %v1257_v42 }
 0x25a   :  { %v1197_v51 = vpop.f32.mrf.mxu0  ;;  %v3479_v16 = vmul.f32 -1.442695, %v1364_v23  ;;  %vm4768_vm12 = vmor %vm1251_vm10, %vm1252_vm8  ;;  %v1277_v63 = vor.u32 1.1754944e-38, %v1276_v61  ;;  %v5849_v41 = vld [vmem:[#allocation9_spill] sm:$0xff] }
 0x25b   :  { %v1248_v39 = vsub.f32 1.0, %v1247_v10  ;;  %v1241_v11 = vadd.f32 %v1237_v62, %v1227_v52  ;;  %v3702_v12 = vpop.eup %3701  ;;  %v1274_v62 = vand.u32 2147483647, %v1264_v14 }
 0x25c   :  { %v4763_v32 = vadd.f32 1.0, %v3702_v12 }
 0x25d   :  { %v3472_v19 = vmul.f32 -1.442695, %v1241_v11  ;;  %v1249_v45 = vmul.f32 %v3700_v40, %v1248_v39  ;;  %vm1275_vm14 = vcmp.eq.f32.partialorder %v1274_v62, 8.507059e+37  ;;  %v1335_v62 = vld [vmem:[#allocation2 + $0x90] sm:$0xff] }
 0x25e   :  { %v3704_v60 = vpop.eup %3703  ;;  %vm1393_vm6 = vweird.f32 %v4763_v32 }
 0x25f   :  { %v1266_v36 = vmul.f32 %v3704_v60, %v1264_v14  ;;  %v1362_v46 = vpop.f32.mrf.mxu3  ;;  %3705 = vpow2.f32 %v3472_v19  ;;  %vm1271_vm9 = vweird.f32 %v3704_v60  ;;  %v1250_v22 = vadd.f32 %v3700_v40, %v1249_v45 }
 0x260   :  { %v1225_v50 = vpop.f32.mrf.mxu2  ;;  %3707 = vpow2.f32 %v3479_v16  ;;  %vm1272_vm13 = vmor %vm1270_vm11, %vm1271_vm9 }
 0x261   :  { %v1267_v57 = vsub.f32 1.0, %v1266_v36  ;;  %3709 = vrcp.f32 %v4763_v32  ;;  %v1254_v1 = vsel %vm4768_vm12, %v3700_v40, %v1250_v22 }
 0x262   :  { %v1315_v20 = vpop.f32.mrf.mxu0  ;;  %3711 = vtanh.f32 %v1213_v58  ;;  %v1259_v54 = vsel %vm1256_vm15, %v1258_v43, %v1254_v1  ;;  %v1397_v1 = vand.u32 2147483647, %v4763_v32 }
 0x263   :  { %v1268_v21 = vmul.f32 %v3704_v60, %v1267_v57  ;;  %v1319_v33 = vadd.f32 %v1315_v20, %v1305_v7 }
 0x264   :  { %vm1398_vm10 = vcmp.eq.f32.partialorder %v1397_v1, 8.507059e+37  ;;  %v4905_v1 = vld [vmem:[%s5787_s4 + $0x30] sm:$0xff] }
 0x265   :  { %v1269_v47 = vadd.f32 %v3704_v60, %v1268_v21  ;;  %v3477_v18 = vmul.f32 -1.442695, %v1319_v33  ;;  %v3706_v25 = vpop.eup %3705 }
 0x266   :  { %v3708_v0 = vpop.eup %3707  ;;  %v1284_v9 = vadd.f32 1.0, %v3706_v25 }
 0x267   :  { %v1273_v31 = vsel %vm1272_vm13, %v3704_v60, %v1269_v47  ;;  %v4775_v14 = vpop.eup %3709  ;;  %3713 = vpow2.f32 %v3477_v18  ;;  %v4780_v40 = vadd.f32 1.0, %v3708_v0  ;;  %v1399_v47 = vand.u32 2147483648, %v4763_v32 }
 0x268   :  { %v1278_v37 = vsel %vm1275_vm14, %v1277_v63, %v1273_v31  ;;  %v1345_v34 = vpop.f32.mrf.mxu2  ;;  %3715 = vrcp.f32 %v1284_v9  ;;  %v1389_v23 = vmul.f32 %v4775_v14, %v4763_v32  ;;  %v3712_v51 = vpop.eup %3711  ;;  %v1296_v50 = vand.u32 2147483648, %v1284_v9  ;;  %v4893_v63 = vld [vmem:[#allocation4 + $0x70] sm:$0xff] }
 0x269   :  { %v1300_v52 = vmul.f32 %v1278_v37, %v5849_v41  ;;  %v1301_v39 = vmul.f32 %v3712_v51, %v1259_v54  ;;  %3717 = vrcp.f32 %v4780_v40  ;;  %v1294_v58 = vand.u32 2147483647, %v1284_v9 }
 0x26a   :  { %v1317_v10 = vpop.f32.mrf.mxu0  ;;  %v1390_v53 = vsub.f32 1.0, %v1389_v23  ;;  %vm1290_vm2 = vweird.f32 %v1284_v9  ;;  %vm1394_vm3 = vweird.f32 %v4775_v14  ;;  %v1349_v21 = vadd.f32 %v1345_v34, %v1335_v62  ;;  %v4828_v62 = vld [vmem:[#allocation4 + $0x18] sm:$0xff] }
 0x26b   :  { %v4782_v16 = vadd.f32 %v1301_v39, %v1300_v52  ;;  %v1297_v33 = vor.u32 1.1754944e-38, %v1296_v50  ;;  %vm1295_vm5 = vcmp.eq.f32.partialorder %v1294_v58, 8.507059e+37  ;;  %vm4795_vm7 = vmor %vm1393_vm6, %vm1394_vm3  ;;  %v1400_v10 = vor.u32 1.1754944e-38, %v1399_v47  ;;  %v4881_v47 = vld [vmem:[%s5787_s4 + $0x18] sm:$0xff] }
 0x26c   :  { %v1391_v46 = vmul.f32 %v4775_v14, %v1390_v53  ;;  %vm1413_vm14 = vweird.f32 %v4780_v40 }
 0x26d   :  { %v3714_v11 = vpop.eup %3713 }
 0x26e   :  { %v3716_v12 = vpop.eup %3715  ;;  %v1368_v19 = vadd.f32 1.0, %v3714_v11  ;;  %v1392_v22 = vadd.f32 %v4775_v14, %v1391_v46 }
 0x26f   :  { %v1286_v60 = vmul.f32 %v3716_v12, %v1284_v9  ;;  %vm1291_vm0 = vweird.f32 %v3716_v12  ;;  %v4787_v61 = vpop.eup %3717 }
 0x270   :  { %v1347_v36 = vpop.f32.mrf.mxu2  ;;  %3719 = vrcp.f32 %v1368_v19  ;;  %vm1292_vm4 = vmor %vm1290_vm2, %vm1291_vm0  ;;  %v1409_v18 = vmul.f32 %v4787_v61, %v4780_v40  ;;  %v1380_v9 = vand.u32 2147483648, %v1368_v19  ;;  %v1396_v43 = vsel %vm4795_vm7, %v4775_v14, %v1392_v22  ;;  %v4851_v22 = vld [vmem:[#allocation4 + $0x28] sm:$0xff] }
 0x271   :  { %v1287_v45 = vsub.f32 1.0, %v1286_v60  ;;  %3721 = vtanh.f32 %v4782_v16  ;;  %v1378_v34 = vand.u32 2147483647, %v1368_v19  ;;  %vm1374_vm9 = vweird.f32 %v1368_v19 }
 0x272   :  { %3723 = vtanh.f32 %v1349_v21  ;;  %v1410_v23 = vsub.f32 1.0, %v1409_v18  ;;  %v1381_v32 = vor.u32 1.1754944e-38, %v1380_v9  ;;  %v1401_v52 = vsel %vm1398_vm10, %v1400_v10, %v1396_v43  ;;  %v4848_v21 = vld [vmem:[#allocation4 + $0x8] sm:$0xff]  ;;  %v4887_v18 = vld [vmem:[%s5787_s4 + $0x38] sm:$0xff]  ;;  %v4935_v10 = vld [vmem:[%s5787_s4] sm:$0xff] }
 0x273   :  { %v1288_v57 = vmul.f32 %v3716_v12, %v1287_v45  ;;  %vm1379_vm12 = vcmp.eq.f32.partialorder %v1378_v34, 8.507059e+37  ;;  %vm1414_vm13 = vweird.f32 %v4787_v61  ;;  %v1419_v36 = vand.u32 2147483648, %v4780_v40  ;;  %v4911_v9 = vld [vmem:[#allocation4 + $0x68] sm:$0xff]  ;;  %v4926_v34 = vld [vmem:[#allocation4 + $0x40] sm:$0xff]  ;;  %5856 = vst [vmem:[#allocation11_spill] sm:$0xff] %v4935_v10 }
 0x274   :  { %v1411_v39 = vmul.f32 %v4787_v61, %v1410_v23  ;;  %v1417_v45 = vand.u32 2147483647, %v4780_v40  ;;  %vm1415_vm15 = vmor %vm1413_vm14, %vm1414_vm13  ;;  %v4917_v43 = vld [vmem:[%s5787_s4 + $0x8] sm:$0xff]  ;;  %5854 = vst [vmem:[#allocation9_spill] sm:$0xff] %v4926_v34  ;;  %v4941_v23 = vld [vmem:[%s5787_s4 + $0x20] sm:$0xff] }
 0x275   :  { %v1289_v7 = vadd.f32 %v3716_v12, %v1288_v57  ;;  %v1420_v46 = vor.u32 1.1754944e-38, %v1419_v36  ;;  %5852 = vst [vmem:[#allocation8_spill] sm:$0xff] %v4917_v43 }
 0x276   :  { %v3720_v20 = vpop.eup %3719  ;;  %v1412_v60 = vadd.f32 %v4787_v61, %v1411_v39  ;;  %vm1418_vm0 = vcmp.eq.f32.partialorder %v1417_v45, 8.507059e+37  ;;  %5857 = vst [vmem:[#allocation12_spill] sm:$0xff] %v4941_v23  ;;  %v4981_v39 = vld [vmem:[%s5787_s4 + $0x68] sm:$0xff] }
 0x277   :  { %v1370_v42 = vmul.f32 %v3720_v20, %v1368_v19  ;;  %v1293_v44 = vsel %vm1292_vm4, %v3716_v12, %v1289_v7  ;;  %v3722_v49 = vpop.eup %3721  ;;  %vm1375_vm8 = vweird.f32 %v3720_v20  ;;  %v1423_v12 = vmul.f32 %v1401_v52, %v4620_v38  ;;  %v4840_v7 = vld [vmem:[#allocation4 + $0x10] sm:$0xff]  ;;  %5863 = vst [vmem:[#allocation18_spill] sm:$0xff] %v4981_v39 }
 0x278   :  { %v1298_v25 = vsel %vm1295_vm5, %v1297_v33, %v1293_v44  ;;  %vm1376_vm11 = vmor %vm1374_vm9, %vm1375_vm8  ;;  %v3724_v51 = vpop.eup %3723  ;;  %v1416_v38 = vsel %vm1415_vm15, %v4787_v61, %v1412_v60  ;;  %v4831_v61 = vld [vmem:[#allocation4 + $0x38] sm:$0xff]  ;;  %v4856_v33 = vld [vmem:[#allocation4] sm:$0xff] }
 0x279   :  { %v1371_v0 = vsub.f32 1.0, %v1370_v42  ;;  %v1304_v31 = vmul.f32 %v3722_v49, %v1298_v25  ;;  %v1421_v57 = vsel %vm1418_vm0, %v1420_v46, %v1416_v38  ;;  %v4859_v42 = vld [vmem:[#allocation4 + $0x20] sm:$0xff]  ;;  %v4868_v44 = vld [vmem:[#allocation4 + $0x58] sm:$0xff]  ;;  %v4890_v25 = vld [vmem:[#allocation4 + $0x50] sm:$0xff] }
 0x27a   :  { %v4871_v49 = vld [vmem:[#allocation4 + $0x78] sm:$0xff]  ;;  %v4963_v52 = vld [vmem:[%s5787_s4 + $0x50] sm:$0xff] }
 0x27b   :  { %v1372_v37 = vmul.f32 %v3720_v20, %v1371_v0  ;;  %v1429_v54 = vpack.c.bf16 %v1304_v31, %v1304_v31  ;;  %v4899_v0 = vld [vmem:[%s5787_s4 + $0x10] sm:$0xff]  ;;  %5860 = vst [vmem:[#allocation15_spill] sm:$0xff] %v4963_v52 }
 0x27c   :  { %v4908_v31 = vld [vmem:[#allocation4 + $0x48] sm:$0xff] }
 0x27d   :  { %v1373_v41 = vadd.f32 %v3720_v20, %v1372_v37  ;;  %3481 = vmatmul.msk.bf16.vlgmr.msra.gmra.mxu1 %vm117_vm1, %v1429_v54  ;;  %3483 = vmatmul.msk.bf16.vlgmr.msra.gmra.mxu3 %vm117_vm1, %v1429_v54  ;;  %v4923_v37 = vld [vmem:[%s5787_s4 + $0x28] sm:$0xff] }
 0x27e   :  { %1631 = vmatpush.bf16.msra.mxu1 %v4610_v27  ;;  %1661 = vmatpush.bf16.msra.mxu3 %v4616_v15  ;;  %5853 = vst [vmem:[#allocation7_spill] sm:$0xff] %v4923_v37 }
 0x27f   :  { %v1377_v14 = vsel %vm1376_vm11, %v3720_v20, %v1373_v41  ;;  %v4843_v20 = vld [vmem:[#allocation4 + $0x30] sm:$0xff] }
 0x280   :  { %v1382_v11 = vsel %vm1379_vm12, %v1381_v32, %v1377_v14  ;;  %v4951_v41 = vld [vmem:[%s5787_s4 + $0x58] sm:$0xff]  ;;  %v4969_v14 = vld [vmem:[%s5787_s4 + $0x70] sm:$0xff] }
 0x281   :  { %v1424_v53 = vmul.f32 %v3724_v51, %v1382_v11  ;;  %5858 = vst [vmem:[#allocation13_spill] sm:$0xff] %v4951_v41  ;;  %v4957_v32 = vld [vmem:[%s5787_s4 + $0x78] sm:$0xff]  ;;  %v4975_v51 = vld [vmem:[%s5787_s4 + $0x48] sm:$0xff]  ;;  %v4987_v11 = vld [vmem:[%s5787_s4 + $0x40] sm:$0xff] }
 0x282   :  { %1632 = vmatpush.bf16.msra.mxu1 %v4627_v17  ;;  %1662 = vmatpush.bf16.msra.mxu3 %v4633_v56  ;;  %5859 = vst [vmem:[#allocation14_spill] sm:$0xff] %v4957_v32 }
 0x283   :  { %v4811_v19 = vadd.f32 %v1424_v53, %v1423_v12  ;;  %5861 = vst [vmem:[#allocation16_spill] sm:$0xff] %v4969_v14  ;;  %v4993_v12 = vld [vmem:[%s5787_s4 + $0x60] sm:$0xff] }
 0x284   :  { %5862 = vst [vmem:[#allocation17_spill] sm:$0xff] %v4975_v51 }
 0x285   :  { %3725 = vtanh.f32 %v4811_v19  ;;  %5864 = vst [vmem:[#allocation19_spill] sm:$0xff] %v4987_v11 }
 0x286   :  { %1633 = vmatpush.bf16.msra.mxu1 %v4644_v26  ;;  %1663 = vmatpush.bf16.msra.mxu3 %v4650_v48  ;;  %5865 = vst [vmem:[#allocation20_spill] sm:$0xff] %v4993_v12 }
 0x28a   :  { %1634 = vmatpush.bf16.msra.mxu1 %v4656_v35  ;;  %1664 = vmatpush.bf16.msra.mxu3 %v4662_v59 }
 0x28b   :  { %v3726_v50 = vpop.eup %3725 }
 0x28c   :  { %v1427_v58 = vmul.f32 %v3726_v50, %v1421_v57 }
 0x28d   :  { %3485 = vmatmul.msk.bf16.vlgmr.msrb.gmra.mxu1 %vm117_vm1, %v1429_v54  ;;  %3487 = vmatmul.msk.bf16.vlgmr.msrb.gmra.mxu3 %vm117_vm1, %v1429_v54  ;;  %v4929_v54 = vld [vmem:[#allocation4 + $0x60] sm:$0xff] }
 0x28e   :  { %v4826_v40 = vpack.c.bf16 %v1427_v58, %v1427_v58  ;;  %1760 = vmatpush.bf16.msrb.mxu1 %v4828_v62  ;;  %1788 = vmatpush.bf16.msrb.mxu3 %v4831_v61  ;;  %5855 = vst [vmem:[#allocation10_spill] sm:$0xff] %v4929_v54 }
 0x290   :  { %3480 = vmatmul.msk.bf16.vlgmr.msra.gmra.mxu0 %vm117_vm1, %v4826_v40  ;;  %3482 = vmatmul.msk.bf16.vlgmr.msra.gmra.mxu2 %vm117_vm1, %v4826_v40 }
 0x291   :  { %1616 = vmatpush.bf16.msra.mxu0 %v4672_v30  ;;  %1646 = vmatpush.bf16.msra.mxu2 %v4678_v3 }
 0x292   :  { %1761 = vmatpush.bf16.msrb.mxu1 %v4840_v7  ;;  %1789 = vmatpush.bf16.msrb.mxu3 %v4843_v20 }
 0x295   :  { %1617 = vmatpush.bf16.msra.mxu0 %v4686_v13  ;;  %1647 = vmatpush.bf16.msra.mxu2 %v4692_v24 }
 0x296   :  { %1762 = vmatpush.bf16.msrb.mxu1 %v4848_v21  ;;  %1790 = vmatpush.bf16.msrb.mxu3 %v4851_v22 }
 0x299   :  { %1618 = vmatpush.bf16.msra.mxu0 %v4700_v4  ;;  %1648 = vmatpush.bf16.msra.mxu2 %v4706_v5 }
 0x29a   :  { %1763 = vmatpush.bf16.msrb.mxu1 %v4856_v33  ;;  %1791 = vmatpush.bf16.msrb.mxu3 %v4859_v42 }
 0x29d   :  { %3492 = vmatmul.msk.bf16.vlgmr.msra.gmra.mxu1 %vm117_vm1, %v4826_v40  ;;  %3494 = vmatmul.msk.bf16.vlgmr.msra.gmra.mxu3 %vm117_vm1, %v4826_v40 }
 0x29e   :  { %1619 = vmatpush.bf16.msra.mxu0 %v4714_v28  ;;  %1649 = vmatpush.bf16.msra.mxu2 %v4720_v29 }
 0x29f   :  { %1816 = vmatpush.bf16.msra.mxu1 %v4868_v44  ;;  %1844 = vmatpush.bf16.msra.mxu3 %v4871_v49 }
 0x2a0   :  { %3484 = vmatmul.msk.bf16.vlgmr.msrb.gmra.mxu0 %vm117_vm1, %v4826_v40  ;;  %3486 = vmatmul.msk.bf16.vlgmr.msrb.gmra.mxu2 %vm117_vm1, %v4826_v40 }
 0x2a2   :  { %1743 = vmatpush.bf16.msrb.mxu0 %v4881_v47  ;;  %1774 = vmatpush.bf16.msrb.mxu2 %v4887_v18 }
 0x2a3   :  { %1817 = vmatpush.bf16.msra.mxu1 %v4890_v25  ;;  %1845 = vmatpush.bf16.msra.mxu3 %v4893_v63 }
 0x2a6   :  { %1744 = vmatpush.bf16.msrb.mxu0 %v4899_v0  ;;  %1775 = vmatpush.bf16.msrb.mxu2 %v4905_v1 }
 0x2a7   :  { %1818 = vmatpush.bf16.msra.mxu1 %v4908_v31  ;;  %1846 = vmatpush.bf16.msra.mxu3 %v4911_v9 }
 0x2aa   :  { %1745 = vmatpush.bf16.msrb.mxu0 %v4917_v43  ;;  %1776 = vmatpush.bf16.msrb.mxu2 %v4923_v37 }
 0x2ab   :  { %1819 = vmatpush.bf16.msra.mxu1 %v4926_v34  ;;  %1847 = vmatpush.bf16.msra.mxu3 %v4929_v54 }
 0x2ae   :  { %1746 = vmatpush.bf16.msrb.mxu0 %v4935_v10  ;;  %1777 = vmatpush.bf16.msrb.mxu2 %v4941_v23 }
 0x2b0   :  { %3491 = vmatmul.msk.bf16.vlgmr.msra.gmra.mxu0 %vm117_vm1, %v4826_v40  ;;  %3493 = vmatmul.msk.bf16.vlgmr.msra.gmra.mxu2 %vm117_vm1, %v4826_v40 }
 0x2b2   :  { %1802 = vmatpush.bf16.msra.mxu0 %v4951_v41  ;;  %1830 = vmatpush.bf16.msra.mxu2 %v4957_v32 }
 0x2b6   :  { %1803 = vmatpush.bf16.msra.mxu0 %v4963_v52  ;;  %1831 = vmatpush.bf16.msra.mxu2 %v4969_v14 }
 0x2ba   :  { %1804 = vmatpush.bf16.msra.mxu0 %v4975_v51  ;;  %1832 = vmatpush.bf16.msra.mxu2 %v4981_v39 }
 0x2be   :  { %1805 = vmatpush.bf16.msra.mxu0 %v4987_v11  ;;  %1833 = vmatpush.bf16.msra.mxu2 %v4993_v12 }
 0x2fa   :  { %v1459_v53 = vpop.f32.mrf.mxu1 }
 0x300   :  { %v1487_v60 = vpop.f32.mrf.mxu3 }
 0x302   :  { %v1461_v36 = vpop.f32.mrf.mxu1 }
 0x303   :  { %v1626_v36 = vld [vmem:[#allocation2 + $0x58] sm:$0xff] }
 0x308   :  { %v1489_v45 = vpop.f32.mrf.mxu3 }
 0x30a   :  { %v1515_v38 = vpop.f32.mrf.mxu1 }
 0x30d   :  { %v1442_v46 = vpop.f32.mrf.mxu0 }
 0x30e   :  { %v1446_v50 = vadd.f32 %v4553_v6, %v1442_v46 }
 0x310   :  { %v1463_v57 = vadd.f32 %v1459_v53, %v1446_v50  ;;  %v1543_v58 = vpop.f32.mrf.mxu3 }
 0x312   :  { %v3488_v40 = vmul.f32 -1.442695, %v1463_v57  ;;  %v1517_v39 = vpop.f32.mrf.mxu1 }
 0x313   :  { %v1473_v11 = vpop.f32.mrf.mxu2 }
 0x314   :  { %3727 = vpow2.f32 %v3488_v40  ;;  %v1477_v51 = vadd.f32 %v4559_v2, %v1473_v11 }
 0x315   :  { %v1444_v14 = vpop.f32.mrf.mxu0 }
 0x316   :  { %v1491_v52 = vadd.f32 %v1487_v60, %v1477_v51 }
 0x318   :  { %v3489_v32 = vmul.f32 -1.442695, %v1491_v52  ;;  %v1545_v12 = vpop.f32.mrf.mxu3  ;;  %v1656_v52 = vld [vmem:[#allocation2 + $0xd8] sm:$0xff] }
 0x31a   :  { %v3728_v41 = vpop.eup %3727  ;;  %3729 = vpow2.f32 %v3489_v32  ;;  %v1636_v45 = vpop.f32.mrf.mxu1 }
 0x31b   :  { %v4998_v23 = vadd.f32 1.0, %v3728_v41  ;;  %v1640_v10 = vadd.f32 %v1636_v45, %v1626_v36  ;;  %v1475_v6 = vpop.f32.mrf.mxu2 }
 0x31d   :  { %3731 = vrcp.f32 %v4998_v23  ;;  %v3496_v53 = vmul.f32 -1.442695, %v1640_v10  ;;  %v1501_v39 = vpop.f32.mrf.mxu0  ;;  %vm1557_vm4 = vweird.f32 %v4998_v23 }
 0x31e   :  { %v1505_v10 = vadd.f32 %v5846_v55, %v1501_v39 }
 0x31f   :  { %3733 = vpow2.f32 %v3496_v53 }
 0x320   :  { %v3730_v46 = vpop.eup %3729  ;;  %v1666_v50 = vpop.f32.mrf.mxu3 }
 0x321   :  { %v1570_v2 = vadd.f32 1.0, %v3730_v46  ;;  %v1670_v12 = vadd.f32 %v1666_v50, %v1656_v52  ;;  %v1519_v50 = vadd.f32 %v1515_v38, %v1505_v10  ;;  %v1611_v52 = vld [vmem:[#allocation2 + $0x18] sm:$0xff] }
 0x322   :  { %v1638_v14 = vpop.f32.mrf.mxu1 }
 0x323   :  { %v3732_v51 = vpop.eup %3731  ;;  %3735 = vrcp.f32 %v1570_v2  ;;  %v1529_v11 = vpop.f32.mrf.mxu2  ;;  %v3497_v45 = vmul.f32 -1.442695, %v1670_v12  ;;  %v1563_v12 = vand.u32 2147483648, %v4998_v23  ;;  %vm1576_vm5 = vweird.f32 %v1570_v2 }
 0x324   :  { %v1553_v32 = vmul.f32 %v3732_v51, %v4998_v23  ;;  %v1533_v41 = vadd.f32 %v5845_v8, %v1529_v11  ;;  %v1582_v8 = vand.u32 2147483648, %v1570_v2  ;;  %vm1558_vm2 = vweird.f32 %v3732_v51 }
 0x325   :  { %v1503_v60 = vpop.f32.mrf.mxu0  ;;  %v3734_v57 = vpop.eup %3733  ;;  %vm5009_vm6 = vmor %vm1557_vm4, %vm1558_vm2  ;;  %v1564_v10 = vor.u32 1.1754944e-38, %v1563_v12 }
 0x326   :  { %v1554_v40 = vsub.f32 1.0, %v1553_v32  ;;  %v1547_v36 = vadd.f32 %v1543_v58, %v1533_v41  ;;  %v5004_v46 = vadd.f32 1.0, %v3734_v57  ;;  %v1580_v58 = vand.u32 2147483647, %v1570_v2 }
 0x327   :  { %v1583_v57 = vor.u32 1.1754944e-38, %v1582_v8 }
 0x328   :  { %v1668_v6 = vpop.f32.mrf.mxu3  ;;  %v3490_v14 = vmul.f32 -1.442695, %v1547_v36  ;;  %v1555_v34 = vmul.f32 %v3732_v51, %v1554_v40  ;;  %vm1581_vm8 = vcmp.eq.f32.partialorder %v1580_v58, 8.507059e+37  ;;  %vm1699_vm15 = vweird.f32 %v5004_v46 }
 0x329   :  { %v3736_v53 = vpop.eup %3735 }
 0x32a   :  { %v1572_v54 = vmul.f32 %v3736_v53, %v1570_v2  ;;  %3737 = vpow2.f32 %v3490_v14  ;;  %vm1577_vm3 = vweird.f32 %v3736_v53  ;;  %v1556_v11 = vadd.f32 %v3732_v51, %v1555_v34 }
 0x32b   :  { %v1531_v37 = vpop.f32.mrf.mxu2  ;;  %3739 = vpow2.f32 %v3497_v45  ;;  %vm1578_vm7 = vmor %vm1576_vm5, %vm1577_vm3 }
 0x32c   :  { %v1573_v43 = vsub.f32 1.0, %v1572_v54  ;;  %3741 = vrcp.f32 %v5004_v46  ;;  %v1561_v54 = vand.u32 2147483647, %v4998_v23  ;;  %v1560_v34 = vsel %vm5009_vm6, %v3732_v51, %v1556_v11 }
 0x32d   :  { %v1621_v55 = vpop.f32.mrf.mxu0  ;;  %3743 = vtanh.f32 %v1519_v50 }
 0x32e   :  { %v1574_v39 = vmul.f32 %v3736_v53, %v1573_v43  ;;  %v1625_v32 = vadd.f32 %v1621_v55, %v1611_v52  ;;  %vm1562_vm9 = vcmp.eq.f32.partialorder %v1561_v54, 8.507059e+37 }
 0x32f   :  { %v1565_v23 = vsel %vm1562_vm9, %v1564_v10, %v1560_v34  ;;  %v1641_v34 = vld [vmem:[#allocation2 + $0x98] sm:$0xff] }
 0x330   :  { %v1575_v38 = vadd.f32 %v3736_v53, %v1574_v39  ;;  %v3495_v41 = vmul.f32 -1.442695, %v1625_v32  ;;  %v3738_v60 = vpop.eup %3737 }
 0x331   :  { %v3740_v43 = vpop.eup %3739  ;;  %v1590_v36 = vadd.f32 1.0, %v3738_v60 }
 0x332   :  { %v1579_v40 = vsel %vm1578_vm7, %v3736_v53, %v1575_v38  ;;  %v5016_v2 = vpop.eup %3741  ;;  %3745 = vpow2.f32 %v3495_v41  ;;  %v5021_v51 = vadd.f32 1.0, %v3740_v43 }
 0x333   :  { %v1584_v45 = vsel %vm1581_vm8, %v1583_v57, %v1579_v40  ;;  %v1651_v6 = vpop.f32.mrf.mxu2  ;;  %3747 = vrcp.f32 %v1590_v36  ;;  %v1695_v50 = vmul.f32 %v5016_v2, %v5004_v46  ;;  %v3744_v52 = vpop.eup %3743  ;;  %v1600_v60 = vand.u32 2147483647, %v1590_v36 }
 0x334   :  { %v1606_v8 = vmul.f32 %v1584_v45, %v4782_v16  ;;  %v1607_v53 = vmul.f32 %v3744_v52, %v1565_v23  ;;  %3749 = vrcp.f32 %v5021_v51  ;;  %v1602_v16 = vand.u32 2147483648, %v1590_v36 }
 0x335   :  { %v1623_v14 = vpop.f32.mrf.mxu0  ;;  %v1696_v39 = vsub.f32 1.0, %v1695_v50  ;;  %vm1596_vm11 = vweird.f32 %v1590_v36  ;;  %vm1700_vm12 = vweird.f32 %v5016_v2  ;;  %v1655_v45 = vadd.f32 %v1651_v6, %v1641_v34 }
 0x336   :  { %v5023_v11 = vadd.f32 %v1607_v53, %v1606_v8  ;;  %v1603_v10 = vor.u32 1.1754944e-38, %v1602_v16  ;;  %vm1601_vm14 = vcmp.eq.f32.partialorder %v1600_v60, 8.507059e+37  ;;  %v1705_v52 = vand.u32 2147483648, %v5004_v46  ;;  %vm5036_vm0 = vmor %vm1699_vm15, %vm1700_vm12 }
 0x337   :  { %v1697_v38 = vmul.f32 %v5016_v2, %v1696_v39  ;;  %v1703_v6 = vand.u32 2147483647, %v5004_v46  ;;  %vm1719_vm8 = vweird.f32 %v5021_v51 }
 0x338   :  { %v3746_v58 = vpop.eup %3745 }
 0x339   :  { %v3748_v55 = vpop.eup %3747  ;;  %v1674_v32 = vadd.f32 1.0, %v3746_v58  ;;  %v1698_v23 = vadd.f32 %v5016_v2, %v1697_v38  ;;  %vm1704_vm4 = vcmp.eq.f32.partialorder %v1703_v6, 8.507059e+37 }
 0x33a   :  { %v1592_v12 = vmul.f32 %v3748_v55, %v1590_v36  ;;  %vm1597_vm10 = vweird.f32 %v3748_v55  ;;  %v5028_v57 = vpop.eup %3749 }
 0x33b   :  { %v1653_v37 = vpop.f32.mrf.mxu2  ;;  %3751 = vrcp.f32 %v1674_v32  ;;  %vm1598_vm13 = vmor %vm1596_vm11, %vm1597_vm10  ;;  %v1715_v36 = vmul.f32 %v5028_v57, %v5021_v51  ;;  %v1684_v38 = vand.u32 2147483647, %v1674_v32  ;;  %vm1680_vm3 = vweird.f32 %v1674_v32 }
 0x33c   :  { %v1593_v54 = vsub.f32 1.0, %v1592_v12  ;;  %3753 = vtanh.f32 %v5023_v11  ;;  %v1702_v37 = vsel %vm5036_vm0, %v5016_v2, %v1698_v23  ;;  %vm1720_vm7 = vweird.f32 %v5028_v57 }
 0x33d   :  { %3755 = vtanh.f32 %v1655_v45  ;;  %v1716_v60 = vsub.f32 1.0, %v1715_v36  ;;  %vm1685_vm6 = vcmp.eq.f32.partialorder %v1684_v38, 8.507059e+37  ;;  %vm1721_vm9 = vmor %vm1719_vm8, %vm1720_vm7  ;;  %v5883_v36 = vld [vmem:[#allocation20_spill] sm:$0xff] }
 0x33e   :  { %v1594_v41 = vmul.f32 %v3748_v55, %v1593_v54 }
 0x33f   :  { %v1717_v45 = vmul.f32 %v5028_v57, %v1716_v60 }
 0x340   :  { %v1595_v43 = vadd.f32 %v3748_v55, %v1594_v41  ;;  %v1706_v41 = vor.u32 1.1754944e-38, %v1705_v52 }
 0x341   :  { %v3752_v40 = vpop.eup %3751 }
 0x342   :  { %v1599_v14 = vsel %vm1598_vm13, %v3748_v55, %v1595_v43  ;;  %v1676_v50 = vmul.f32 %v3752_v40, %v1674_v32  ;;  %v3754_v8 = vpop.eup %3753  ;;  %v1686_v55 = vand.u32 2147483648, %v1674_v32  ;;  %vm1681_vm2 = vweird.f32 %v3752_v40 }
 0x343   :  { %v1604_v53 = vsel %vm1601_vm14, %v1603_v10, %v1599_v14  ;;  %vm1682_vm5 = vmor %vm1680_vm3, %vm1681_vm2  ;;  %v1707_v34 = vsel %vm1704_vm4, %v1706_v41, %v1702_v37  ;;  %v3756_v10 = vpop.eup %3755  ;;  %v5118_v37 = vld [vmem:[%s5789_s6] ss:$0 sm:$0xff] }
 0x344   :  { %v1677_v39 = vsub.f32 1.0, %v1676_v50  ;;  %v1610_v12 = vmul.f32 %v3754_v8, %v1604_v53  ;;  %v1687_v46 = vor.u32 1.1754944e-38, %v1686_v55  ;;  %v1729_v32 = vmul.f32 %v1707_v34, %v4811_v19 }
 0x345   :  { %v1718_v8 = vadd.f32 %v5028_v57, %v1717_v45 }
 0x346   :  { %v1678_v54 = vmul.f32 %v3752_v40, %v1677_v39  ;;  %v1735_v16 = vpack.c.bf16 %v1610_v12, %v1610_v12 }
 0x348   :  { %v1679_v43 = vadd.f32 %v3752_v40, %v1678_v54  ;;  %3499 = vmatmul.msk.bf16.vlgmr.msrb.gmra.mxu1 %vm117_vm1, %v1735_v16  ;;  %3501 = vmatmul.msk.bf16.vlgmr.msrb.gmra.mxu3 %vm117_vm1, %v1735_v16 }
 0x349   :  { %1937 = vmatpush.bf16.msrb.mxu1 %v4610_v27  ;;  %1967 = vmatpush.bf16.msrb.mxu3 %v4616_v15  ;;  %v1725_v27 = vand.u32 2147483648, %v5021_v51  ;;  %v1723_v15 = vand.u32 2147483647, %v5021_v51 }
 0x34a   :  { %v1683_v2 = vsel %vm1682_vm5, %v3752_v40, %v1679_v43 }
 0x34b   :  { %v1688_v23 = vsel %vm1685_vm6, %v1687_v46, %v1683_v2  ;;  %vm1724_vm10 = vcmp.eq.f32.partialorder %v1723_v15, 8.507059e+37  ;;  %v5124_v46 = vld [vmem:[%s5789_s6 + $0x1] ss:$0 sm:$0xff] }
 0x34c   :  { %v1730_v14 = vmul.f32 %v3756_v10, %v1688_v23 }
 0x34d   :  { %1938 = vmatpush.bf16.msrb.mxu1 %v4627_v17  ;;  %1968 = vmatpush.bf16.msrb.mxu3 %v4633_v56  ;;  %v1722_v17 = vsel %vm1721_vm9, %v5028_v57, %v1718_v8  ;;  %v1726_v56 = vor.u32 1.1754944e-38, %v1725_v27  ;;  %v5882_v57 = vld [vmem:[#allocation19_spill] sm:$0xff] }
 0x34e   :  { %v5052_v50 = vadd.f32 %v1730_v14, %v1729_v32  ;;  %v1932_v14 = vld [vmem:[#allocation2 + $0x60] sm:$0xff] }
 0x34f   :  { %v1727_v40 = vsel %vm1724_vm10, %v1726_v56, %v1722_v17 }
 0x350   :  { %3757 = vtanh.f32 %v5052_v50 }
 0x351   :  { %1939 = vmatpush.bf16.msrb.mxu1 %v4644_v26  ;;  %1969 = vmatpush.bf16.msrb.mxu3 %v4650_v48  ;;  %v5870_v26 = vld [vmem:[#allocation8_spill] sm:$0xff]  ;;  %v5871_v48 = vld [vmem:[#allocation7_spill] sm:$0xff] }
 0x355   :  { %1940 = vmatpush.bf16.msrb.mxu1 %v4656_v35  ;;  %1970 = vmatpush.bf16.msrb.mxu3 %v4662_v59  ;;  %v5872_v35 = vld [vmem:[#allocation9_spill] sm:$0xff]  ;;  %v5873_v59 = vld [vmem:[#allocation10_spill] sm:$0xff] }
 0x356   :  { %v3758_v19 = vpop.eup %3757 }
 0x357   :  { %v1733_v52 = vmul.f32 %v3758_v19, %v1727_v40 }
 0x358   :  { %3503 = vmatmul.msk.bf16.vlgmr.msra.gmra.mxu1 %vm117_vm1, %v1735_v16  ;;  %3505 = vmatmul.msk.bf16.vlgmr.msra.gmra.mxu3 %vm117_vm1, %v1735_v16 }
 0x359   :  { %v1734_v51 = vpack.c.bf16 %v1733_v52, %v1733_v52  ;;  %2066 = vmatpush.bf16.msra.mxu1 %v4828_v62  ;;  %2094 = vmatpush.bf16.msra.mxu3 %v4831_v61 }
 0x35b   :  { %3498 = vmatmul.msk.bf16.vlgmr.msrb.gmra.mxu0 %vm117_vm1, %v1734_v51  ;;  %3500 = vmatmul.msk.bf16.vlgmr.msrb.gmra.mxu2 %vm117_vm1, %v1734_v51 }
 0x35c   :  { %1922 = vmatpush.bf16.msrb.mxu0 %v4672_v30  ;;  %1952 = vmatpush.bf16.msrb.mxu2 %v4678_v3  ;;  %v5874_v30 = vld [vmem:[#allocation11_spill] sm:$0xff]  ;;  %v5875_v3 = vld [vmem:[#allocation12_spill] sm:$0xff] }
 0x35d   :  { %2067 = vmatpush.bf16.msra.mxu1 %v4840_v7  ;;  %2095 = vmatpush.bf16.msra.mxu3 %v4843_v20 }
 0x360   :  { %1923 = vmatpush.bf16.msrb.mxu0 %v4686_v13  ;;  %1953 = vmatpush.bf16.msrb.mxu2 %v4692_v24  ;;  %v5876_v13 = vld [vmem:[#allocation13_spill] sm:$0xff]  ;;  %v5877_v24 = vld [vmem:[#allocation14_spill] sm:$0xff] }
 0x361   :  { %2068 = vmatpush.bf16.msra.mxu1 %v4848_v21  ;;  %2096 = vmatpush.bf16.msra.mxu3 %v4851_v22 }
 0x364   :  { %1924 = vmatpush.bf16.msrb.mxu0 %v4700_v4  ;;  %1954 = vmatpush.bf16.msrb.mxu2 %v4706_v5  ;;  %v5878_v4 = vld [vmem:[#allocation15_spill] sm:$0xff]  ;;  %v5879_v5 = vld [vmem:[#allocation16_spill] sm:$0xff] }
 0x365   :  { %2069 = vmatpush.bf16.msra.mxu1 %v4856_v33  ;;  %2097 = vmatpush.bf16.msra.mxu3 %v4859_v42 }
 0x368   :  { %3510 = vmatmul.msk.bf16.vlgmr.msrb.gmra.mxu1 %vm117_vm1, %v1734_v51  ;;  %3512 = vmatmul.msk.bf16.vlgmr.msrb.gmra.mxu3 %vm117_vm1, %v1734_v51 }
 0x369   :  { %1925 = vmatpush.bf16.msrb.mxu0 %v4714_v28  ;;  %1955 = vmatpush.bf16.msrb.mxu2 %v4720_v29  ;;  %v5880_v28 = vld [vmem:[#allocation17_spill] sm:$0xff]  ;;  %v5881_v29 = vld [vmem:[#allocation18_spill] sm:$0xff] }
 0x36a   :  { %2122 = vmatpush.bf16.msrb.mxu1 %v4868_v44  ;;  %2150 = vmatpush.bf16.msrb.mxu3 %v4871_v49 }
 0x36b   :  { %3502 = vmatmul.msk.bf16.vlgmr.msra.gmra.mxu0 %vm117_vm1, %v1734_v51  ;;  %3504 = vmatmul.msk.bf16.vlgmr.msra.gmra.mxu2 %vm117_vm1, %v1734_v51 }
 0x36d   :  { %2049 = vmatpush.bf16.msra.mxu0 %v4881_v47  ;;  %2080 = vmatpush.bf16.msra.mxu2 %v4887_v18 }
 0x36e   :  { %2123 = vmatpush.bf16.msrb.mxu1 %v4890_v25  ;;  %2151 = vmatpush.bf16.msrb.mxu3 %v4893_v63 }
 0x371   :  { %2050 = vmatpush.bf16.msra.mxu0 %v4899_v0  ;;  %2081 = vmatpush.bf16.msra.mxu2 %v4905_v1 }
 0x372   :  { %2124 = vmatpush.bf16.msrb.mxu1 %v4908_v31  ;;  %2152 = vmatpush.bf16.msrb.mxu3 %v4911_v9 }
 0x375   :  { %2051 = vmatpush.bf16.msra.mxu0 %v5870_v26  ;;  %2082 = vmatpush.bf16.msra.mxu2 %v5871_v48 }
 0x376   :  { %2125 = vmatpush.bf16.msrb.mxu1 %v5872_v35  ;;  %2153 = vmatpush.bf16.msrb.mxu3 %v5873_v59 }
 0x379   :  { %2052 = vmatpush.bf16.msra.mxu0 %v5874_v30  ;;  %2083 = vmatpush.bf16.msra.mxu2 %v5875_v3 }
 0x37b   :  { %3509 = vmatmul.msk.bf16.vlgmr.msrb.gmra.mxu0 %vm117_vm1, %v1734_v51  ;;  %3511 = vmatmul.msk.bf16.vlgmr.msrb.gmra.mxu2 %vm117_vm1, %v1734_v51 }
 0x37d   :  { %2108 = vmatpush.bf16.msrb.mxu0 %v5876_v13  ;;  %2136 = vmatpush.bf16.msrb.mxu2 %v5877_v24 }
 0x381   :  { %2109 = vmatpush.bf16.msrb.mxu0 %v5878_v4  ;;  %2137 = vmatpush.bf16.msrb.mxu2 %v5879_v5 }
 0x385   :  { %2110 = vmatpush.bf16.msrb.mxu0 %v5880_v28  ;;  %2138 = vmatpush.bf16.msrb.mxu2 %v5881_v29 }
 0x389   :  { %2111 = vmatpush.bf16.msrb.mxu0 %v5882_v57  ;;  %2139 = vmatpush.bf16.msrb.mxu2 %v5883_v36 }
 0x3c5   :  { %v1765_v53 = vpop.f32.mrf.mxu1 }
 0x3cb   :  { %v1793_v58 = vpop.f32.mrf.mxu3 }
 0x3cd   :  { %v1767_v39 = vpop.f32.mrf.mxu1 }
 0x3ce   :  { %v1962_v39 = vld [vmem:[#allocation2 + $0xe0] sm:$0xff] }
 0x3d3   :  { %v1795_v6 = vpop.f32.mrf.mxu3 }
 0x3d5   :  { %v1821_v12 = vpop.f32.mrf.mxu1 }
 0x3d8   :  { %v1748_v55 = vpop.f32.mrf.mxu0 }
 0x3d9   :  { %v1752_v54 = vadd.f32 %v5118_v37, %v1748_v55 }
 0x3db   :  { %v1769_v38 = vadd.f32 %v1765_v53, %v1752_v54  ;;  %v1849_v16 = vpop.f32.mrf.mxu3 }
 0x3dd   :  { %v3506_v41 = vmul.f32 -1.442695, %v1769_v38  ;;  %v1823_v60 = vpop.f32.mrf.mxu1  ;;  %v5134_v38 = vld [vmem:[%s5789_s6 + $0x3] ss:$0 sm:$0xff] }
 0x3de   :  { %v1779_v43 = vpop.f32.mrf.mxu2 }
 0x3df   :  { %3759 = vpow2.f32 %v3506_v41  ;;  %v1783_v34 = vadd.f32 %v5124_v46, %v1779_v43 }
 0x3e0   :  { %v1750_v2 = vpop.f32.mrf.mxu0 }
 0x3e1   :  { %v1797_v10 = vadd.f32 %v1793_v58, %v1783_v34 }
 0x3e3   :  { %v3507_v45 = vmul.f32 -1.442695, %v1797_v10  ;;  %v1851_v23 = vpop.f32.mrf.mxu3  ;;  %v5140_v10 = vld [vmem:[%s5789_s6 + $0x2] ss:$0 sm:$0xff] }
 0x3e5   :  { %v3760_v32 = vpop.eup %3759  ;;  %3761 = vpow2.f32 %v3507_v45  ;;  %v1942_v8 = vpop.f32.mrf.mxu1 }
 0x3e6   :  { %v5127_v27 = vadd.f32 1.0, %v3760_v32  ;;  %v1946_v15 = vadd.f32 %v1942_v8, %v1932_v14  ;;  %v1781_v17 = vpop.f32.mrf.mxu2 }
 0x3e8   :  { %3763 = vrcp.f32 %v5127_v27  ;;  %v3514_v56 = vmul.f32 -1.442695, %v1946_v15  ;;  %v1807_v19 = vpop.f32.mrf.mxu0  ;;  %vm1863_vm13 = vweird.f32 %v5127_v27 }
 0x3e9   :  { %v1811_v45 = vadd.f32 %v5140_v10, %v1807_v19 }
 0x3ea   :  { %3765 = vpow2.f32 %v3514_v56 }
 0x3eb   :  { %v3762_v40 = vpop.eup %3761  ;;  %v1972_v52 = vpop.f32.mrf.mxu3 }
 0x3ec   :  { %v1876_v51 = vadd.f32 1.0, %v3762_v40  ;;  %v1976_v54 = vadd.f32 %v1972_v52, %v1962_v39 }
 0x3ed   :  { %v1944_v53 = vpop.f32.mrf.mxu1 }
 0x3ee   :  { %v3764_v58 = vpop.eup %3763  ;;  %3767 = vrcp.f32 %v1876_v51  ;;  %v1835_v6 = vpop.f32.mrf.mxu2  ;;  %v3515_v23 = vmul.f32 -1.442695, %v1976_v54  ;;  %v1825_v53 = vadd.f32 %v1821_v12, %v1811_v45  ;;  %v1886_v39 = vand.u32 2147483647, %v1876_v51 }
 0x3ef   :  { %v1859_v55 = vmul.f32 %v3764_v58, %v5127_v27  ;;  %v1839_v41 = vadd.f32 %v5134_v38, %v1835_v6  ;;  %vm1864_vm11 = vweird.f32 %v3764_v58  ;;  %v1917_v6 = vld [vmem:[#allocation2 + $0x20] sm:$0xff]  ;;  %vm1882_vm14 = vweird.f32 %v1876_v51 }
 0x3f0   :  { %v1809_v60 = vpop.f32.mrf.mxu0  ;;  %v3766_v43 = vpop.eup %3765  ;;  %vm5148_vm15 = vmor %vm1863_vm13, %vm1864_vm11  ;;  %v1867_v12 = vand.u32 2147483647, %v5127_v27  ;;  %vm1887_vm2 = vcmp.eq.f32.partialorder %v1886_v39, 8.507059e+37 }
 0x3f1   :  { %v1860_v34 = vsub.f32 1.0, %v1859_v55  ;;  %v1853_v2 = vadd.f32 %v1849_v16, %v1839_v41  ;;  %v5143_v8 = vadd.f32 1.0, %v3766_v43  ;;  %v1888_v16 = vand.u32 2147483648, %v1876_v51 }
 0x3f2   :  { %v1869_v60 = vand.u32 2147483648, %v5127_v27  ;;  %vm1868_vm3 = vcmp.eq.f32.partialorder %v1867_v12, 8.507059e+37 }
 0x3f3   :  { %v1974_v32 = vpop.f32.mrf.mxu3  ;;  %v3508_v15 = vmul.f32 -1.442695, %v1853_v2  ;;  %v1861_v56 = vmul.f32 %v3764_v58, %v1860_v34  ;;  %vm2005_vm9 = vweird.f32 %v5143_v8 }
 0x3f4   :  { %v3768_v14 = vpop.eup %3767 }
 0x3f5   :  { %v1878_v17 = vmul.f32 %v3768_v14, %v1876_v51  ;;  %3769 = vpow2.f32 %v3508_v15  ;;  %vm1883_vm12 = vweird.f32 %v3768_v14  ;;  %v1862_v54 = vadd.f32 %v3764_v58, %v1861_v56 }
 0x3f6   :  { %v1837_v40 = vpop.f32.mrf.mxu2  ;;  %3771 = vpow2.f32 %v3515_v23  ;;  %vm1884_vm0 = vmor %vm1882_vm14, %vm1883_vm12  ;;  %v1889_v23 = vor.u32 1.1754944e-38, %v1888_v16 }
 0x3f7   :  { %v1879_v52 = vsub.f32 1.0, %v1878_v17  ;;  %3773 = vrcp.f32 %v5143_v8  ;;  %v1866_v15 = vsel %vm5148_vm15, %v3764_v58, %v1862_v54  ;;  %v1870_v40 = vor.u32 1.1754944e-38, %v1869_v60 }
 0x3f8   :  { %v1927_v19 = vpop.f32.mrf.mxu0  ;;  %3775 = vtanh.f32 %v1825_v53 }
 0x3f9   :  { %v1880_v55 = vmul.f32 %v3768_v14, %v1879_v52  ;;  %v1931_v41 = vadd.f32 %v1927_v19, %v1917_v6  ;;  %v1871_v27 = vsel %vm1868_vm3, %v1870_v40, %v1866_v15  ;;  %v1947_v40 = vld [vmem:[#allocation2 + $0xa0] sm:$0xff] }
 0x3fb   :  { %v1881_v34 = vadd.f32 %v3768_v14, %v1880_v55  ;;  %v3513_v2 = vmul.f32 -1.442695, %v1931_v41  ;;  %v3770_v45 = vpop.eup %3769 }
 0x3fc   :  { %v3772_v32 = vpop.eup %3771  ;;  %v1896_v56 = vadd.f32 1.0, %v3770_v45 }
 0x3fd   :  { %v1885_v17 = vsel %vm1884_vm0, %v3768_v14, %v1881_v34  ;;  %v5155_v51 = vpop.eup %3773  ;;  %3777 = vpow2.f32 %v3513_v2  ;;  %v5160_v58 = vadd.f32 1.0, %v3772_v32 }
 0x3fe   :  { %v1890_v52 = vsel %vm1887_vm2, %v1889_v23, %v1885_v17  ;;  %v1957_v6 = vpop.f32.mrf.mxu2  ;;  %3779 = vrcp.f32 %v1896_v56  ;;  %v2001_v53 = vmul.f32 %v5155_v51, %v5143_v8  ;;  %v3776_v55 = vpop.eup %3775  ;;  %v1906_v32 = vand.u32 2147483647, %v1896_v56 }
 0x3ff   :  { %v1912_v16 = vmul.f32 %v1890_v52, %v5023_v11  ;;  %v1913_v14 = vmul.f32 %v3776_v55, %v1871_v27  ;;  %3781 = vrcp.f32 %v5160_v58  ;;  %v1908_v11 = vand.u32 2147483648, %v1896_v56 }
 0x400   :  { %v1929_v19 = vpop.f32.mrf.mxu0  ;;  %v2002_v41 = vsub.f32 1.0, %v2001_v53  ;;  %vm1902_vm5 = vweird.f32 %v1896_v56  ;;  %vm2006_vm6 = vweird.f32 %v5155_v51  ;;  %vm1907_vm8 = vcmp.eq.f32.partialorder %v1906_v32, 8.507059e+37 }
 0x401   :  { %v5162_v60 = vadd.f32 %v1913_v14, %v1912_v16  ;;  %v1909_v27 = vor.u32 1.1754944e-38, %v1908_v11  ;;  %v1961_v19 = vadd.f32 %v1957_v6, %v1947_v40  ;;  %vm5175_vm10 = vmor %vm2005_vm9, %vm2006_vm6  ;;  %v2009_v6 = vand.u32 2147483647, %v5143_v8 }
 0x402   :  { %v2003_v45 = vmul.f32 %v5155_v51, %v2002_v41  ;;  %vm2025_vm2 = vweird.f32 %v5160_v58 }
 0x403   :  { %v3778_v39 = vpop.eup %3777  ;;  %vm2010_vm13 = vcmp.eq.f32.partialorder %v2009_v6, 8.507059e+37  ;;  %v2029_v6 = vand.u32 2147483647, %v5160_v58 }
 0x404   :  { %v3780_v54 = vpop.eup %3779  ;;  %v1980_v43 = vadd.f32 1.0, %v3778_v39  ;;  %v2004_v53 = vadd.f32 %v5155_v51, %v2003_v45  ;;  %v2011_v39 = vand.u32 2147483648, %v5143_v8 }
 0x405   :  { %v1898_v12 = vmul.f32 %v3780_v54, %v1896_v56  ;;  %vm1903_vm4 = vweird.f32 %v3780_v54  ;;  %v5167_v15 = vpop.eup %3781 }
 0x406   :  { %v1959_v34 = vpop.f32.mrf.mxu2  ;;  %3783 = vrcp.f32 %v1980_v43  ;;  %vm1904_vm7 = vmor %vm1902_vm5, %vm1903_vm4  ;;  %v2021_v56 = vmul.f32 %v5167_v15, %v5160_v58  ;;  %v2008_v45 = vsel %vm5175_vm10, %v5155_v51, %v2004_v53  ;;  %vm1986_vm12 = vweird.f32 %v1980_v43  ;;  %v5188_v51 = vld [vmem:[%s5786_s3 + $0x38] sm:$0xff] }
 0x407   :  { %v1899_v2 = vsub.f32 1.0, %v1898_v12  ;;  %3785 = vtanh.f32 %v5162_v60  ;;  %v5208_v12 = vld [vmem:[%s5786_s3 + $0x70] sm:$0xff]  ;;  %vm2026_vm0 = vweird.f32 %v5167_v15  ;;  %vm2030_vm4 = vcmp.eq.f32.partialorder %v2029_v6, 8.507059e+37 }
 0x408   :  { %3787 = vtanh.f32 %v1961_v19  ;;  %v2022_v40 = vsub.f32 1.0, %v2021_v56  ;;  %v5194_v19 = vld [vmem:[%s5786_s3 + $0x78] sm:$0xff]  ;;  %vm2027_vm3 = vmor %vm2025_vm2, %vm2026_vm0 }
 0x409   :  { %v1900_v23 = vmul.f32 %v3780_v54, %v1899_v2 }
 0x40b   :  { %v1901_v17 = vadd.f32 %v3780_v54, %v1900_v23  ;;  %v1990_v23 = vand.u32 2147483647, %v1980_v43 }
 0x40c   :  { %v3784_v52 = vpop.eup %3783 }
 0x40d   :  { %v1905_v16 = vsel %vm1904_vm7, %v3780_v54, %v1901_v17  ;;  %v1982_v55 = vmul.f32 %v3784_v52, %v1980_v43  ;;  %v3786_v14 = vpop.eup %3785  ;;  %v1992_v54 = vand.u32 2147483648, %v1980_v43  ;;  %vm1987_vm11 = vweird.f32 %v3784_v52 }
 0x40e   :  { %v1910_v41 = vsel %vm1907_vm8, %v1909_v27, %v1905_v16  ;;  %v2012_v17 = vor.u32 1.1754944e-38, %v2011_v39  ;;  %vm1988_vm14 = vmor %vm1986_vm12, %vm1987_vm11  ;;  %vm1991_vm15 = vcmp.eq.f32.partialorder %v1990_v23, 8.507059e+37  ;;  %v3788_v53 = vpop.eup %3787  ;;  %v5241_v23 = vld [vmem:[%s5786_s3 + $0x60] sm:$0xff] }
 0x40f   :  { %v1983_v34 = vsub.f32 1.0, %v1982_v55  ;;  %v1916_v2 = vmul.f32 %v3786_v14, %v1910_v41  ;;  %v1993_v8 = vor.u32 1.1754944e-38, %v1992_v54  ;;  %v2023_v55 = vmul.f32 %v5167_v15, %v2022_v40  ;;  %v5202_v41 = vld [vmem:[%s5786_s3 + $0x30] sm:$0xff]  ;;  %v5228_v54 = vld [vmem:[%s5786_s3 + $0x68] sm:$0xff] }
 0x410   :  { %v2013_v16 = vsel %vm2010_vm13, %v2012_v17, %v2008_v45 }
 0x411   :  { %v1984_v11 = vmul.f32 %v3784_v52, %v1983_v34  ;;  %v2041_v32 = vpack.c.bf16 %v1916_v2, %v1916_v2  ;;  %v2035_v39 = vmul.f32 %v2013_v16, %v5052_v50  ;;  %v2024_v34 = vadd.f32 %v5167_v15, %v2023_v55  ;;  %v5222_v2 = vld [vmem:[%s5786_s3 + $0x28] sm:$0xff] }
 0x412   :  { %v2031_v50 = vand.u32 2147483648, %v5160_v58  ;;  %v5235_v58 = vld [vmem:[%s5786_s3 + $0x20] sm:$0xff] }
 0x413   :  { %v1985_v27 = vadd.f32 %v3784_v52, %v1984_v11  ;;  %3517 = vmatmul.msk.bf16.vlgmr.msra.gmra.mxu1 %vm117_vm1, %v2041_v32  ;;  %3519 = vmatmul.msk.bf16.vlgmr.msra.gmra.mxu3 %vm117_vm1, %v2041_v32  ;;  %v2028_v45 = vsel %vm2027_vm3, %v5167_v15, %v2024_v34 }
 0x414   :  { %2243 = vmatpush.bf16.msra.mxu1 %v5188_v51  ;;  %2273 = vmatpush.bf16.msra.mxu3 %v5194_v19  ;;  %v2032_v11 = vor.u32 1.1754944e-38, %v2031_v50 }
 0x415   :  { %v1989_v43 = vsel %vm1988_vm14, %v3784_v52, %v1985_v27 }
 0x416   :  { %v1994_v14 = vsel %vm1991_vm15, %v1993_v8, %v1989_v43  ;;  %v2033_v40 = vsel %vm2030_vm4, %v2032_v11, %v2028_v45  ;;  %v5253_v8 = vld [vmem:[%s5786_s3 + $0x18] sm:$0xff] }
 0x417   :  { %v2036_v56 = vmul.f32 %v3788_v53, %v1994_v14  ;;  %v2268_v14 = vld [vmem:[#allocation2 + $0xe8] sm:$0xff] }
 0x418   :  { %2244 = vmatpush.bf16.msra.mxu1 %v5202_v41  ;;  %2274 = vmatpush.bf16.msra.mxu3 %v5208_v12 }
 0x419   :  { %v5211_v52 = vadd.f32 %v2036_v56, %v2035_v39 }
 0x41b   :  { %3789 = vtanh.f32 %v5211_v52 }
 0x41c   :  { %2245 = vmatpush.bf16.msra.mxu1 %v5222_v2  ;;  %2275 = vmatpush.bf16.msra.mxu3 %v5228_v54 }
 0x420   :  { %2246 = vmatpush.bf16.msra.mxu1 %v5235_v58  ;;  %2276 = vmatpush.bf16.msra.mxu3 %v5241_v23 }
 0x421   :  { %v3790_v17 = vpop.eup %3789 }
 0x422   :  { %v2039_v27 = vmul.f32 %v3790_v17, %v2033_v40 }
 0x423   :  { %3521 = vmatmul.msk.bf16.vlgmr.msrb.gmra.mxu1 %vm117_vm1, %v2041_v32  ;;  %3523 = vmatmul.msk.bf16.vlgmr.msrb.gmra.mxu3 %vm117_vm1, %v2041_v32  ;;  %v5259_v32 = vld [vmem:[%s5786_s3 + $0x58] sm:$0xff] }
 0x424   :  { %v2040_v15 = vpack.c.bf16 %v2039_v27, %v2039_v27  ;;  %2372 = vmatpush.bf16.msrb.mxu1 %v4828_v62  ;;  %2400 = vmatpush.bf16.msrb.mxu3 %v4831_v61  ;;  %v5267_v62 = vld [vmem:[%s5786_s3 + $0x10] sm:$0xff] }
 0x425   :  { %v5273_v61 = vld [vmem:[%s5786_s3 + $0x50] sm:$0xff] }
 0x426   :  { %3516 = vmatmul.msk.bf16.vlgmr.msra.gmra.mxu0 %vm117_vm1, %v2040_v15  ;;  %3518 = vmatmul.msk.bf16.vlgmr.msra.gmra.mxu2 %vm117_vm1, %v2040_v15 }
 0x427   :  { %2228 = vmatpush.bf16.msra.mxu0 %v5253_v8  ;;  %2258 = vmatpush.bf16.msra.mxu2 %v5259_v32 }
 0x428   :  { %2373 = vmatpush.bf16.msrb.mxu1 %v4840_v7  ;;  %2401 = vmatpush.bf16.msrb.mxu3 %v4843_v20  ;;  %v5281_v7 = vld [vmem:[%s5786_s3 + $0x8] sm:$0xff] }
 0x429   :  { %v5287_v20 = vld [vmem:[%s5786_s3 + $0x48] sm:$0xff] }
 0x42b   :  { %2229 = vmatpush.bf16.msra.mxu0 %v5267_v62  ;;  %2259 = vmatpush.bf16.msra.mxu2 %v5273_v61 }
 0x42c   :  { %2374 = vmatpush.bf16.msrb.mxu1 %v4848_v21  ;;  %2402 = vmatpush.bf16.msrb.mxu3 %v4851_v22  ;;  %v5297_v21 = vld [vmem:[%s5786_s3] sm:$0xff] }
 0x42d   :  { %v5303_v22 = vld [vmem:[%s5786_s3 + $0x40] sm:$0xff] }
 0x42f   :  { %2230 = vmatpush.bf16.msra.mxu0 %v5281_v7  ;;  %2260 = vmatpush.bf16.msra.mxu2 %v5287_v20 }
 0x430   :  { %2375 = vmatpush.bf16.msrb.mxu1 %v4856_v33  ;;  %2403 = vmatpush.bf16.msrb.mxu3 %v4859_v42 }
 0x433   :  { %3528 = vmatmul.msk.bf16.vlgmr.msra.gmra.mxu1 %vm117_vm1, %v2040_v15  ;;  %3530 = vmatmul.msk.bf16.vlgmr.msra.gmra.mxu3 %vm117_vm1, %v2040_v15 }
 0x434   :  { %2231 = vmatpush.bf16.msra.mxu0 %v5297_v21  ;;  %2261 = vmatpush.bf16.msra.mxu2 %v5303_v22 }
 0x435   :  { %2428 = vmatpush.bf16.msra.mxu1 %v4868_v44  ;;  %2456 = vmatpush.bf16.msra.mxu3 %v4871_v49 }
 0x436   :  { %3520 = vmatmul.msk.bf16.vlgmr.msrb.gmra.mxu0 %vm117_vm1, %v2040_v15  ;;  %3522 = vmatmul.msk.bf16.vlgmr.msrb.gmra.mxu2 %vm117_vm1, %v2040_v15 }
 0x438   :  { %2355 = vmatpush.bf16.msrb.mxu0 %v4881_v47  ;;  %2386 = vmatpush.bf16.msrb.mxu2 %v4887_v18 }
 0x439   :  { %2429 = vmatpush.bf16.msra.mxu1 %v4890_v25  ;;  %2457 = vmatpush.bf16.msra.mxu3 %v4893_v63 }
 0x43c   :  { %2356 = vmatpush.bf16.msrb.mxu0 %v4899_v0  ;;  %2387 = vmatpush.bf16.msrb.mxu2 %v4905_v1 }
 0x43d   :  { %2430 = vmatpush.bf16.msra.mxu1 %v4908_v31  ;;  %2458 = vmatpush.bf16.msra.mxu3 %v4911_v9 }
 0x440   :  { %2357 = vmatpush.bf16.msrb.mxu0 %v5870_v26  ;;  %2388 = vmatpush.bf16.msrb.mxu2 %v5871_v48 }
 0x441   :  { %2431 = vmatpush.bf16.msra.mxu1 %v5872_v35  ;;  %2459 = vmatpush.bf16.msra.mxu3 %v5873_v59 }
 0x444   :  { %2358 = vmatpush.bf16.msrb.mxu0 %v5874_v30  ;;  %2389 = vmatpush.bf16.msrb.mxu2 %v5875_v3 }
 0x446   :  { %3527 = vmatmul.msk.bf16.vlgmr.msra.gmra.mxu0 %vm117_vm1, %v2040_v15  ;;  %3529 = vmatmul.msk.bf16.vlgmr.msra.gmra.mxu2 %vm117_vm1, %v2040_v15 }
 0x448   :  { %2414 = vmatpush.bf16.msra.mxu0 %v5876_v13  ;;  %2442 = vmatpush.bf16.msra.mxu2 %v5877_v24  ;;  %v2238_v13 = vld [vmem:[#allocation2 + $0x68] sm:$0xff] }
 0x44c   :  { %2415 = vmatpush.bf16.msra.mxu0 %v5878_v4  ;;  %2443 = vmatpush.bf16.msra.mxu2 %v5879_v5 }
 0x450   :  { %2416 = vmatpush.bf16.msra.mxu0 %v5880_v28  ;;  %2444 = vmatpush.bf16.msra.mxu2 %v5881_v29 }
 0x454   :  { %2417 = vmatpush.bf16.msra.mxu0 %v5882_v57  ;;  %2445 = vmatpush.bf16.msra.mxu2 %v5883_v36 }
 0x490   :  { %v2071_v33 = vpop.f32.mrf.mxu1 }
 0x496   :  { %v2099_v42 = vpop.f32.mrf.mxu3 }
 0x498   :  { %v2073_v44 = vpop.f32.mrf.mxu1 }
 0x49e   :  { %v2101_v49 = vpop.f32.mrf.mxu3 }
 0x4a0   :  { %v2127_v47 = vpop.f32.mrf.mxu1 }
 0x4a3   :  { %v2054_v18 = vpop.f32.mrf.mxu0 }
 0x4a4   :  { %v2058_v25 = vadd.f32 %v5118_v37, %v2054_v18 }
 0x4a6   :  { %v2075_v63 = vadd.f32 %v2071_v33, %v2058_v25  ;;  %v2155_v0 = vpop.f32.mrf.mxu3 }
 0x4a8   :  { %v3524_v1 = vmul.f32 -1.442695, %v2075_v63  ;;  %v2129_v31 = vpop.f32.mrf.mxu1 }
 0x4a9   :  { %v2085_v9 = vpop.f32.mrf.mxu2 }
 0x4aa   :  { %3791 = vpow2.f32 %v3524_v1  ;;  %v2089_v26 = vadd.f32 %v5124_v46, %v2085_v9  ;;  %v2223_v9 = vld [vmem:[#allocation2 + $0x28] sm:$0xff] }
 0x4ab   :  { %v2056_v48 = vpop.f32.mrf.mxu0 }
 0x4ac   :  { %v2103_v35 = vadd.f32 %v2099_v42, %v2089_v26 }
 0x4ae   :  { %v3525_v59 = vmul.f32 -1.442695, %v2103_v35  ;;  %v2157_v30 = vpop.f32.mrf.mxu3 }
 0x4b0   :  { %v3792_v3 = vpop.eup %3791  ;;  %3793 = vpow2.f32 %v3525_v59  ;;  %v2248_v24 = vpop.f32.mrf.mxu1 }
 0x4b1   :  { %v5336_v4 = vadd.f32 1.0, %v3792_v3  ;;  %v2252_v5 = vadd.f32 %v2248_v24, %v2238_v13  ;;  %v2087_v28 = vpop.f32.mrf.mxu2 }
 0x4b3   :  { %3795 = vrcp.f32 %v5336_v4  ;;  %v3532_v29 = vmul.f32 -1.442695, %v2252_v5  ;;  %v2113_v57 = vpop.f32.mrf.mxu0  ;;  %vm2169_vm7 = vweird.f32 %v5336_v4  ;;  %v2175_v30 = vand.u32 2147483648, %v5336_v4 }
 0x4b4   :  { %v2117_v40 = vadd.f32 %v5140_v10, %v2113_v57 }
 0x4b5   :  { %3797 = vpow2.f32 %v3532_v29 }
 0x4b6   :  { %v3794_v36 = vpop.eup %3793  ;;  %v2278_v16 = vpop.f32.mrf.mxu3  ;;  %v2131_v1 = vadd.f32 %v2127_v47, %v2117_v40  ;;  %v2173_v47 = vand.u32 2147483647, %v5336_v4 }
 0x4b7   :  { %v2182_v43 = vadd.f32 1.0, %v3794_v36  ;;  %v2282_v34 = vadd.f32 %v2278_v16, %v2268_v14 }
 0x4b8   :  { %v2250_v53 = vpop.f32.mrf.mxu1  ;;  %vm2174_vm12 = vcmp.eq.f32.partialorder %v2173_v47, 8.507059e+37 }
 0x4b9   :  { %v3796_v55 = vpop.eup %3795  ;;  %3799 = vrcp.f32 %v2182_v43  ;;  %v2141_v39 = vpop.f32.mrf.mxu2  ;;  %v3533_v27 = vmul.f32 -1.442695, %v2282_v34  ;;  %v2194_v31 = vand.u32 2147483648, %v2182_v43  ;;  %vm2188_vm8 = vweird.f32 %v2182_v43 }
 0x4ba   :  { %v2165_v56 = vmul.f32 %v3796_v55, %v5336_v4  ;;  %v2145_v50 = vadd.f32 %v5134_v38, %v2141_v39  ;;  %vm2170_vm5 = vweird.f32 %v3796_v55  ;;  %v2176_v53 = vor.u32 1.1754944e-38, %v2175_v30 }
 0x4bb   :  { %v2115_v6 = vpop.f32.mrf.mxu0  ;;  %v3798_v45 = vpop.eup %3797  ;;  %vm5347_vm9 = vmor %vm2169_vm7, %vm2170_vm5  ;;  %v2195_v28 = vor.u32 1.1754944e-38, %v2194_v31 }
 0x4bc   :  { %v2166_v11 = vsub.f32 1.0, %v2165_v56  ;;  %v2159_v17 = vadd.f32 %v2155_v0, %v2145_v50  ;;  %v5342_v42 = vadd.f32 1.0, %v3798_v45  ;;  %v2192_v0 = vand.u32 2147483647, %v2182_v43 }
 0x4be   :  { %v2280_v15 = vpop.f32.mrf.mxu3  ;;  %v3526_v44 = vmul.f32 -1.442695, %v2159_v17  ;;  %v2167_v18 = vmul.f32 %v3796_v55, %v2166_v11  ;;  %vm2193_vm11 = vcmp.eq.f32.partialorder %v2192_v0, 8.507059e+37  ;;  %v2253_v0 = vld [vmem:[#allocation2 + $0xa8] sm:$0xff]  ;;  %vm2311_vm3 = vweird.f32 %v5342_v42 }
 0x4bf   :  { %v3800_v33 = vpop.eup %3799  ;;  %v2317_v47 = vand.u32 2147483648, %v5342_v42 }
 0x4c0   :  { %v2184_v49 = vmul.f32 %v3800_v33, %v2182_v43  ;;  %3801 = vpow2.f32 %v3526_v44  ;;  %vm2189_vm6 = vweird.f32 %v3800_v33  ;;  %v2168_v35 = vadd.f32 %v3796_v55, %v2167_v18 }
 0x4c1   :  { %v2143_v25 = vpop.f32.mrf.mxu2  ;;  %3803 = vpow2.f32 %v3533_v27  ;;  %vm2190_vm10 = vmor %vm2188_vm8, %vm2189_vm6 }
 0x4c2   :  { %v2185_v63 = vsub.f32 1.0, %v2184_v49  ;;  %3805 = vrcp.f32 %v5342_v42  ;;  %v2172_v57 = vsel %vm5347_vm9, %v3796_v55, %v2168_v35 }
 0x4c3   :  { %v2233_v26 = vpop.f32.mrf.mxu0  ;;  %3807 = vtanh.f32 %v2131_v1  ;;  %v2177_v4 = vsel %vm2174_vm12, %v2176_v53, %v2172_v57 }
 0x4c4   :  { %v2186_v48 = vmul.f32 %v3800_v33, %v2185_v63  ;;  %v2237_v59 = vadd.f32 %v2233_v26, %v2223_v9 }
 0x4c6   :  { %v2187_v13 = vadd.f32 %v3800_v33, %v2186_v48  ;;  %v3531_v24 = vmul.f32 -1.442695, %v2237_v59  ;;  %v3802_v5 = vpop.eup %3801 }
 0x4c7   :  { %v3804_v29 = vpop.eup %3803  ;;  %v2202_v16 = vadd.f32 1.0, %v3802_v5  ;;  %v5472_v5 = vld [vmem:[#allocation4 + $0x70] sm:$0xff] }
 0x4c8   :  { %v2191_v36 = vsel %vm2190_vm10, %v3800_v33, %v2187_v13  ;;  %v5354_v43 = vpop.eup %3805  ;;  %3809 = vpow2.f32 %v3531_v24  ;;  %v5359_v55 = vadd.f32 1.0, %v3804_v29  ;;  %v2315_v29 = vand.u32 2147483647, %v5342_v42 }
 0x4c9   :  { %v2196_v14 = vsel %vm2193_vm11, %v2195_v28, %v2191_v36  ;;  %v2263_v39 = vpop.f32.mrf.mxu2  ;;  %3811 = vrcp.f32 %v2202_v16  ;;  %v2307_v34 = vmul.f32 %v5354_v43, %v5342_v42  ;;  %v3808_v6 = vpop.eup %3807  ;;  %v2212_v63 = vand.u32 2147483647, %v2202_v16 }
 0x4ca   :  { %v2218_v50 = vmul.f32 %v2196_v14, %v5162_v60  ;;  %v2219_v45 = vmul.f32 %v3808_v6, %v2177_v4  ;;  %3813 = vrcp.f32 %v5359_v55  ;;  %v2214_v60 = vand.u32 2147483648, %v2202_v16 }
 0x4cb   :  { %v2235_v56 = vpop.f32.mrf.mxu0  ;;  %v2308_v40 = vsub.f32 1.0, %v2307_v34  ;;  %vm2208_vm14 = vweird.f32 %v2202_v16  ;;  %vm2312_vm15 = vweird.f32 %v5354_v43  ;;  %v2267_v48 = vadd.f32 %v2263_v39, %v2253_v0  ;;  %v5419_v0 = vld [vmem:[#allocation4 + $0x10] sm:$0xff] }
 0x4cc   :  { %v5361_v27 = vadd.f32 %v2219_v45, %v2218_v50  ;;  %v2215_v26 = vor.u32 1.1754944e-38, %v2214_v60  ;;  %vm2213_vm2 = vcmp.eq.f32.partialorder %v2212_v63, 8.507059e+37  ;;  %vm5374_vm4 = vmor %vm2311_vm3, %vm2312_vm15  ;;  %v2318_v4 = vor.u32 1.1754944e-38, %v2317_v47  ;;  %v5460_v47 = vld [vmem:[%s5787_s4 + $0x18] sm:$0xff] }
 0x4cd   :  { %v2309_v18 = vmul.f32 %v5354_v43, %v2308_v40  ;;  %vm2316_vm7 = vcmp.eq.f32.partialorder %v2315_v29, 8.507059e+37  ;;  %vm2331_vm11 = vweird.f32 %v5359_v55  ;;  %v5484_v29 = vld [vmem:[%s5787_s4 + $0x30] sm:$0xff] }
 0x4ce   :  { %v3810_v11 = vpop.eup %3809 }
 0x4cf   :  { %v3812_v17 = vpop.eup %3811  ;;  %v2286_v15 = vadd.f32 1.0, %v3810_v11  ;;  %v2310_v35 = vadd.f32 %v5354_v43, %v2309_v18 }
 0x4d0   :  { %v2204_v33 = vmul.f32 %v3812_v17, %v2202_v16  ;;  %vm2209_vm13 = vweird.f32 %v3812_v17  ;;  %v5366_v1 = vpop.eup %3813 }
 0x4d1   :  { %v2265_v44 = vpop.f32.mrf.mxu2  ;;  %3815 = vrcp.f32 %v2286_v15  ;;  %vm2210_vm0 = vmor %vm2208_vm14, %vm2209_vm13  ;;  %v2327_v13 = vmul.f32 %v5366_v1, %v5359_v55  ;;  %v2298_v36 = vand.u32 2147483648, %v2286_v15  ;;  %v2314_v16 = vsel %vm5374_vm4, %v5354_v43, %v2310_v35  ;;  %v5435_v35 = vld [vmem:[#allocation4] sm:$0xff] }
 0x4d2   :  { %v2205_v49 = vsub.f32 1.0, %v2204_v33  ;;  %3817 = vtanh.f32 %v5361_v27  ;;  %v2296_v14 = vand.u32 2147483647, %v2286_v15  ;;  %vm2292_vm6 = vweird.f32 %v2286_v15 }
 0x4d3   :  { %3819 = vtanh.f32 %v2267_v48  ;;  %v2328_v56 = vsub.f32 1.0, %v2327_v13  ;;  %v2299_v42 = vor.u32 1.1754944e-38, %v2298_v36  ;;  %v2319_v50 = vsel %vm2316_vm7, %v2318_v4, %v2314_v16  ;;  %v5430_v48 = vld [vmem:[#allocation4 + $0x28] sm:$0xff]  ;;  %v5466_v13 = vld [vmem:[%s5787_s4 + $0x38] sm:$0xff]  ;;  %v5514_v4 = vld [vmem:[%s5787_s4] sm:$0xff] }
 0x4d4   :  { %v2206_v25 = vmul.f32 %v3812_v17, %v2205_v49  ;;  %vm2297_vm9 = vcmp.eq.f32.partialorder %v2296_v14, 8.507059e+37  ;;  %vm2332_vm10 = vweird.f32 %v5366_v1  ;;  %v2337_v44 = vand.u32 2147483648, %v5359_v55  ;;  %v5490_v36 = vld [vmem:[#allocation4 + $0x68] sm:$0xff]  ;;  %v5505_v14 = vld [vmem:[#allocation4 + $0x40] sm:$0xff]  ;;  %5896 = vst [vmem:[#allocation11_spill] sm:$0xff] %v5514_v4 }
 0x4d5   :  { %v2329_v45 = vmul.f32 %v5366_v1, %v2328_v56  ;;  %v2335_v49 = vand.u32 2147483647, %v5359_v55  ;;  %vm2333_vm12 = vmor %vm2331_vm11, %vm2332_vm10  ;;  %v5496_v16 = vld [vmem:[%s5787_s4 + $0x8] sm:$0xff]  ;;  %5894 = vst [vmem:[#allocation9_spill] sm:$0xff] %v5505_v14  ;;  %v5520_v56 = vld [vmem:[%s5787_s4 + $0x20] sm:$0xff] }
 0x4d6   :  { %v2207_v31 = vadd.f32 %v3812_v17, %v2206_v25  ;;  %v2338_v18 = vor.u32 1.1754944e-38, %v2337_v44  ;;  %5892 = vst [vmem:[#allocation8_spill] sm:$0xff] %v5496_v16 }
 0x4d7   :  { %v3816_v9 = vpop.eup %3815  ;;  %v2330_v33 = vadd.f32 %v5366_v1, %v2329_v45  ;;  %vm2336_vm13 = vcmp.eq.f32.partialorder %v2335_v49, 8.507059e+37  ;;  %5897 = vst [vmem:[#allocation12_spill] sm:$0xff] %v5520_v56  ;;  %v5560_v45 = vld [vmem:[%s5787_s4 + $0x68] sm:$0xff] }
 0x4d8   :  { %v2211_v59 = vsel %vm2210_vm0, %v3812_v17, %v2207_v31  ;;  %v2288_v30 = vmul.f32 %v3816_v9, %v2286_v15  ;;  %v3818_v3 = vpop.eup %3817  ;;  %vm2293_vm5 = vweird.f32 %v3816_v9  ;;  %v2341_v17 = vmul.f32 %v2319_v50, %v5211_v52  ;;  %v5407_v31 = vld [vmem:[#allocation4 + $0x18] sm:$0xff]  ;;  %v5542_v50 = vld [vmem:[%s5787_s4 + $0x50] sm:$0xff]  ;;  %5903 = vst [vmem:[#allocation18_spill] sm:$0xff] %v5560_v45 }
 0x4d9   :  { %v2216_v24 = vsel %vm2213_vm2, %v2215_v26, %v2211_v59  ;;  %vm2294_vm8 = vmor %vm2292_vm6, %vm2293_vm5  ;;  %v3820_v6 = vpop.eup %3819  ;;  %v2334_v52 = vsel %vm2333_vm12, %v5366_v1, %v2330_v33  ;;  %v5410_v1 = vld [vmem:[#allocation4 + $0x38] sm:$0xff]  ;;  %v5427_v26 = vld [vmem:[#allocation4 + $0x8] sm:$0xff]  ;;  %5900 = vst [vmem:[#allocation15_spill] sm:$0xff] %v5542_v50 }
 0x4da   :  { %v2289_v28 = vsub.f32 1.0, %v2288_v30  ;;  %v2222_v57 = vmul.f32 %v3818_v3, %v2216_v24  ;;  %v2339_v25 = vsel %vm2336_vm13, %v2338_v18, %v2334_v52  ;;  %v5438_v59 = vld [vmem:[#allocation4 + $0x20] sm:$0xff]  ;;  %v5447_v30 = vld [vmem:[#allocation4 + $0x58] sm:$0xff]  ;;  %v5469_v24 = vld [vmem:[#allocation4 + $0x50] sm:$0xff] }
 0x4db   :  { %v5450_v3 = vld [vmem:[#allocation4 + $0x78] sm:$0xff] }
 0x4dc   :  { %v2290_v53 = vmul.f32 %v3816_v9, %v2289_v28  ;;  %v2347_v39 = vpack.c.bf16 %v2222_v57, %v2222_v57  ;;  %v5478_v28 = vld [vmem:[%s5787_s4 + $0x10] sm:$0xff] }
 0x4dd   :  { %v5487_v57 = vld [vmem:[#allocation4 + $0x48] sm:$0xff] }
 0x4de   :  { %v2291_v34 = vadd.f32 %v3816_v9, %v2290_v53  ;;  %3535 = vmatmul.msk.bf16.vlgmr.msrb.gmra.mxu1 %vm117_vm1, %v2347_v39  ;;  %3537 = vmatmul.msk.bf16.vlgmr.msrb.gmra.mxu3 %vm117_vm1, %v2347_v39  ;;  %v5502_v53 = vld [vmem:[%s5787_s4 + $0x28] sm:$0xff] }
 0x4df   :  { %2549 = vmatpush.bf16.msrb.mxu1 %v5188_v51  ;;  %2579 = vmatpush.bf16.msrb.mxu3 %v5194_v19  ;;  %5893 = vst [vmem:[#allocation7_spill] sm:$0xff] %v5502_v53 }
 0x4e0   :  { %v2295_v43 = vsel %vm2294_vm8, %v3816_v9, %v2291_v34  ;;  %v5422_v9 = vld [vmem:[#allocation4 + $0x30] sm:$0xff] }
 0x4e1   :  { %v2300_v11 = vsel %vm2297_vm9, %v2299_v42, %v2295_v43  ;;  %v5530_v34 = vld [vmem:[%s5787_s4 + $0x58] sm:$0xff]  ;;  %v5548_v43 = vld [vmem:[%s5787_s4 + $0x70] sm:$0xff] }
 0x4e2   :  { %v2342_v40 = vmul.f32 %v3820_v6, %v2300_v11  ;;  %5898 = vst [vmem:[#allocation13_spill] sm:$0xff] %v5530_v34  ;;  %v5536_v42 = vld [vmem:[%s5787_s4 + $0x78] sm:$0xff]  ;;  %v5554_v6 = vld [vmem:[%s5787_s4 + $0x48] sm:$0xff]  ;;  %v5566_v11 = vld [vmem:[%s5787_s4 + $0x40] sm:$0xff] }
 0x4e3   :  { %2550 = vmatpush.bf16.msrb.mxu1 %v5202_v41  ;;  %2580 = vmatpush.bf16.msrb.mxu3 %v5208_v12  ;;  %5899 = vst [vmem:[#allocation14_spill] sm:$0xff] %v5536_v42 }
 0x4e4   :  { %v5390_v15 = vadd.f32 %v2342_v40, %v2341_v17  ;;  %5901 = vst [vmem:[#allocation16_spill] sm:$0xff] %v5548_v43  ;;  %v5572_v17 = vld [vmem:[%s5787_s4 + $0x60] sm:$0xff] }
 0x4e5   :  { %5902 = vst [vmem:[#allocation17_spill] sm:$0xff] %v5554_v6 }
 0x4e6   :  { %3821 = vtanh.f32 %v5390_v15  ;;  %5904 = vst [vmem:[#allocation19_spill] sm:$0xff] %v5566_v11 }
 0x4e7   :  { %2551 = vmatpush.bf16.msrb.mxu1 %v5222_v2  ;;  %2581 = vmatpush.bf16.msrb.mxu3 %v5228_v54  ;;  %5905 = vst [vmem:[#allocation20_spill] sm:$0xff] %v5572_v17 }
 0x4eb   :  { %2552 = vmatpush.bf16.msrb.mxu1 %v5235_v58  ;;  %2582 = vmatpush.bf16.msrb.mxu3 %v5241_v23 }
 0x4ec   :  { %v3822_v60 = vpop.eup %3821 }
 0x4ed   :  { %v2345_v63 = vmul.f32 %v3822_v60, %v2339_v25 }
 0x4ee   :  { %3539 = vmatmul.msk.bf16.vlgmr.msra.gmra.mxu1 %vm117_vm1, %v2347_v39  ;;  %3541 = vmatmul.msk.bf16.vlgmr.msra.gmra.mxu3 %vm117_vm1, %v2347_v39  ;;  %v5508_v39 = vld [vmem:[#allocation4 + $0x60] sm:$0xff] }
 0x4ef   :  { %v5405_v55 = vpack.c.bf16 %v2345_v63, %v2345_v63  ;;  %2678 = vmatpush.bf16.msra.mxu1 %v5407_v31  ;;  %2706 = vmatpush.bf16.msra.mxu3 %v5410_v1  ;;  %5895 = vst [vmem:[#allocation10_spill] sm:$0xff] %v5508_v39 }
 0x4f1   :  { %3534 = vmatmul.msk.bf16.vlgmr.msrb.gmra.mxu0 %vm117_vm1, %v5405_v55  ;;  %3536 = vmatmul.msk.bf16.vlgmr.msrb.gmra.mxu2 %vm117_vm1, %v5405_v55 }
 0x4f2   :  { %2534 = vmatpush.bf16.msrb.mxu0 %v5253_v8  ;;  %2564 = vmatpush.bf16.msrb.mxu2 %v5259_v32 }
 0x4f3   :  { %2679 = vmatpush.bf16.msra.mxu1 %v5419_v0  ;;  %2707 = vmatpush.bf16.msra.mxu3 %v5422_v9 }
 0x4f6   :  { %2535 = vmatpush.bf16.msrb.mxu0 %v5267_v62  ;;  %2565 = vmatpush.bf16.msrb.mxu2 %v5273_v61 }
 0x4f7   :  { %2680 = vmatpush.bf16.msra.mxu1 %v5427_v26  ;;  %2708 = vmatpush.bf16.msra.mxu3 %v5430_v48 }
 0x4fa   :  { %2536 = vmatpush.bf16.msrb.mxu0 %v5281_v7  ;;  %2566 = vmatpush.bf16.msrb.mxu2 %v5287_v20 }
 0x4fb   :  { %2681 = vmatpush.bf16.msra.mxu1 %v5435_v35  ;;  %2709 = vmatpush.bf16.msra.mxu3 %v5438_v59 }
 0x4fe   :  { %3546 = vmatmul.msk.bf16.vlgmr.msrb.gmra.mxu1 %vm117_vm1, %v5405_v55  ;;  %3548 = vmatmul.msk.bf16.vlgmr.msrb.gmra.mxu3 %vm117_vm1, %v5405_v55 }
 0x4ff   :  { %2537 = vmatpush.bf16.msrb.mxu0 %v5297_v21  ;;  %2567 = vmatpush.bf16.msrb.mxu2 %v5303_v22 }
 0x500   :  { %2734 = vmatpush.bf16.msrb.mxu1 %v5447_v30  ;;  %2762 = vmatpush.bf16.msrb.mxu3 %v5450_v3 }
 0x501   :  { %3538 = vmatmul.msk.bf16.vlgmr.msra.gmra.mxu0 %vm117_vm1, %v5405_v55  ;;  %3540 = vmatmul.msk.bf16.vlgmr.msra.gmra.mxu2 %vm117_vm1, %v5405_v55 }
 0x503   :  { %2661 = vmatpush.bf16.msra.mxu0 %v5460_v47  ;;  %2692 = vmatpush.bf16.msra.mxu2 %v5466_v13 }
 0x504   :  { %2735 = vmatpush.bf16.msrb.mxu1 %v5469_v24  ;;  %2763 = vmatpush.bf16.msrb.mxu3 %v5472_v5 }
 0x507   :  { %2662 = vmatpush.bf16.msra.mxu0 %v5478_v28  ;;  %2693 = vmatpush.bf16.msra.mxu2 %v5484_v29 }
 0x508   :  { %2736 = vmatpush.bf16.msrb.mxu1 %v5487_v57  ;;  %2764 = vmatpush.bf16.msrb.mxu3 %v5490_v36 }
 0x50b   :  { %2663 = vmatpush.bf16.msra.mxu0 %v5496_v16  ;;  %2694 = vmatpush.bf16.msra.mxu2 %v5502_v53 }
 0x50c   :  { %2737 = vmatpush.bf16.msrb.mxu1 %v5505_v14  ;;  %2765 = vmatpush.bf16.msrb.mxu3 %v5508_v39 }
 0x50f   :  { %2664 = vmatpush.bf16.msra.mxu0 %v5514_v4  ;;  %2695 = vmatpush.bf16.msra.mxu2 %v5520_v56 }
 0x511   :  { %3545 = vmatmul.msk.bf16.vlgmr.msrb.gmra.mxu0 %vm117_vm1, %v5405_v55  ;;  %3547 = vmatmul.msk.bf16.vlgmr.msrb.gmra.mxu2 %vm117_vm1, %v5405_v55 }
 0x513   :  { %2720 = vmatpush.bf16.msrb.mxu0 %v5530_v34  ;;  %2748 = vmatpush.bf16.msrb.mxu2 %v5536_v42 }
 0x517   :  { %2721 = vmatpush.bf16.msrb.mxu0 %v5542_v50  ;;  %2749 = vmatpush.bf16.msrb.mxu2 %v5548_v43 }
 0x51b   :  { %2722 = vmatpush.bf16.msrb.mxu0 %v5554_v6  ;;  %2750 = vmatpush.bf16.msrb.mxu2 %v5560_v45 }
 0x51f   :  { %2723 = vmatpush.bf16.msrb.mxu0 %v5566_v11  ;;  %2751 = vmatpush.bf16.msrb.mxu2 %v5572_v17 }
 0x55b   :  { %v2377_v40 = vpop.f32.mrf.mxu1 }
 0x561   :  { %v2405_v33 = vpop.f32.mrf.mxu3 }
 0x563   :  { %v2379_v44 = vpop.f32.mrf.mxu1 }
 0x564   :  { %v2544_v44 = vld [vmem:[#allocation2 + $0x70] sm:$0xff] }
 0x569   :  { %v2407_v49 = vpop.f32.mrf.mxu3 }
 0x56b   :  { %v2433_v52 = vpop.f32.mrf.mxu1 }
 0x56e   :  { %v2360_v18 = vpop.f32.mrf.mxu0 }
 0x56f   :  { %v2364_v60 = vadd.f32 %v5118_v37, %v2360_v18 }
 0x571   :  { %v2381_v25 = vadd.f32 %v2377_v40, %v2364_v60  ;;  %v2461_v63 = vpop.f32.mrf.mxu3 }
 0x573   :  { %v3542_v55 = vmul.f32 -1.442695, %v2381_v25  ;;  %v2435_v6 = vpop.f32.mrf.mxu1 }
 0x574   :  { %v2391_v11 = vpop.f32.mrf.mxu2 }
 0x575   :  { %3823 = vpow2.f32 %v3542_v55  ;;  %v2395_v45 = vadd.f32 %v5124_v46, %v2391_v11 }
 0x576   :  { %v2362_v50 = vpop.f32.mrf.mxu0 }
 0x577   :  { %v2409_v43 = vadd.f32 %v2405_v33, %v2395_v45 }
 0x579   :  { %v3543_v34 = vmul.f32 -1.442695, %v2409_v43  ;;  %v2463_v17 = vpop.f32.mrf.mxu3  ;;  %v2574_v43 = vld [vmem:[#allocation2 + $0xf0] sm:$0xff] }
 0x57b   :  { %v3824_v42 = vpop.eup %3823  ;;  %3825 = vpow2.f32 %v3543_v34  ;;  %v2554_v49 = vpop.f32.mrf.mxu1 }
 0x57c   :  { %v5577_v4 = vadd.f32 1.0, %v3824_v42  ;;  %v2558_v56 = vadd.f32 %v2554_v49, %v2544_v44  ;;  %v2393_v37 = vpop.f32.mrf.mxu2 }
 0x57e   :  { %3827 = vrcp.f32 %v5577_v4  ;;  %v3550_v40 = vmul.f32 -1.442695, %v2558_v56  ;;  %v2419_v6 = vpop.f32.mrf.mxu0  ;;  %vm2475_vm0 = vweird.f32 %v5577_v4 }
 0x57f   :  { %v2423_v56 = vadd.f32 %v5140_v10, %v2419_v6 }
 0x580   :  { %3829 = vpow2.f32 %v3550_v40 }
 0x581   :  { %v3826_v18 = vpop.eup %3825  ;;  %v2584_v60 = vpop.f32.mrf.mxu3 }
 0x582   :  { %v2488_v46 = vadd.f32 1.0, %v3826_v18  ;;  %v2588_v17 = vadd.f32 %v2584_v60, %v2574_v43  ;;  %v2437_v60 = vadd.f32 %v2433_v52, %v2423_v56  ;;  %v2529_v43 = vld [vmem:[#allocation2 + $0x30] sm:$0xff] }
 0x583   :  { %v2556_v50 = vpop.f32.mrf.mxu1 }
 0x584   :  { %v3828_v45 = vpop.eup %3827  ;;  %3831 = vrcp.f32 %v2488_v46  ;;  %v2447_v11 = vpop.f32.mrf.mxu2  ;;  %v3551_v49 = vmul.f32 -1.442695, %v2588_v17  ;;  %v2481_v17 = vand.u32 2147483648, %v5577_v4  ;;  %vm2494_vm2 = vweird.f32 %v2488_v46 }
 0x585   :  { %v2471_v34 = vmul.f32 %v3828_v45, %v5577_v4  ;;  %v2451_v42 = vadd.f32 %v5134_v38, %v2447_v11  ;;  %v2500_v38 = vand.u32 2147483648, %v2488_v46  ;;  %vm2476_vm14 = vweird.f32 %v3828_v45 }
 0x586   :  { %v2421_v33 = vpop.f32.mrf.mxu0  ;;  %v3830_v25 = vpop.eup %3829  ;;  %vm5588_vm3 = vmor %vm2475_vm0, %vm2476_vm14  ;;  %v2482_v56 = vor.u32 1.1754944e-38, %v2481_v17 }
 0x587   :  { %v2472_v55 = vsub.f32 1.0, %v2471_v34  ;;  %v2465_v44 = vadd.f32 %v2461_v63, %v2451_v42  ;;  %v5583_v18 = vadd.f32 1.0, %v3830_v25  ;;  %v2498_v63 = vand.u32 2147483647, %v2488_v46 }
 0x588   :  { %v2501_v25 = vor.u32 1.1754944e-38, %v2500_v38 }
 0x589   :  { %v2586_v37 = vpop.f32.mrf.mxu3  ;;  %v3544_v50 = vmul.f32 -1.442695, %v2465_v44  ;;  %v2473_v14 = vmul.f32 %v3828_v45, %v2472_v55  ;;  %vm2499_vm5 = vcmp.eq.f32.partialorder %v2498_v63, 8.507059e+37  ;;  %vm2617_vm12 = vweird.f32 %v5583_v18 }
 0x58a   :  { %v3832_v40 = vpop.eup %3831 }
 0x58b   :  { %v2490_v39 = vmul.f32 %v3832_v40, %v2488_v46  ;;  %3833 = vpow2.f32 %v3544_v50  ;;  %vm2495_vm15 = vweird.f32 %v3832_v40  ;;  %v2474_v11 = vadd.f32 %v3828_v45, %v2473_v14 }
 0x58c   :  { %v2449_v16 = vpop.f32.mrf.mxu2  ;;  %3835 = vpow2.f32 %v3551_v49  ;;  %vm2496_vm4 = vmor %vm2494_vm2, %vm2495_vm15 }
 0x58d   :  { %v2491_v53 = vsub.f32 1.0, %v2490_v39  ;;  %3837 = vrcp.f32 %v5583_v18  ;;  %v2479_v39 = vand.u32 2147483647, %v5577_v4  ;;  %v2478_v14 = vsel %vm5588_vm3, %v3828_v45, %v2474_v11 }
 0x58e   :  { %v2539_v10 = vpop.f32.mrf.mxu0  ;;  %3839 = vtanh.f32 %v2437_v60 }
 0x58f   :  { %v2492_v6 = vmul.f32 %v3832_v40, %v2491_v53  ;;  %v2543_v34 = vadd.f32 %v2539_v10, %v2529_v43  ;;  %vm2480_vm6 = vcmp.eq.f32.partialorder %v2479_v39, 8.507059e+37 }
 0x590   :  { %v2483_v4 = vsel %vm2480_vm6, %v2482_v56, %v2478_v14  ;;  %v2559_v14 = vld [vmem:[#allocation2 + $0xb0] sm:$0xff] }
 0x591   :  { %v2493_v52 = vadd.f32 %v3832_v40, %v2492_v6  ;;  %v3549_v42 = vmul.f32 -1.442695, %v2543_v34  ;;  %v3834_v33 = vpop.eup %3833 }
 0x592   :  { %v3836_v53 = vpop.eup %3835  ;;  %v2508_v44 = vadd.f32 1.0, %v3834_v33 }
 0x593   :  { %v2497_v55 = vsel %vm2496_vm4, %v3832_v40, %v2493_v52  ;;  %v5595_v46 = vpop.eup %3837  ;;  %3841 = vpow2.f32 %v3549_v42  ;;  %v5600_v45 = vadd.f32 1.0, %v3836_v53 }
 0x594   :  { %v2502_v49 = vsel %vm2499_vm5, %v2501_v25, %v2497_v55  ;;  %v2569_v37 = vpop.f32.mrf.mxu2  ;;  %3843 = vrcp.f32 %v2508_v44  ;;  %v2613_v60 = vmul.f32 %v5595_v46, %v5583_v18  ;;  %v3840_v43 = vpop.eup %3839  ;;  %v2518_v33 = vand.u32 2147483647, %v2508_v44 }
 0x595   :  { %v2524_v38 = vmul.f32 %v2502_v49, %v5361_v27  ;;  %v2525_v40 = vmul.f32 %v3840_v43, %v2483_v4  ;;  %3845 = vrcp.f32 %v5600_v45  ;;  %v2520_v27 = vand.u32 2147483648, %v2508_v44 }
 0x596   :  { %v2541_v50 = vpop.f32.mrf.mxu0  ;;  %v2614_v6 = vsub.f32 1.0, %v2613_v60  ;;  %vm2514_vm8 = vweird.f32 %v2508_v44  ;;  %vm2618_vm9 = vweird.f32 %v5595_v46  ;;  %v2573_v49 = vadd.f32 %v2569_v37, %v2559_v14 }
 0x597   :  { %v5602_v11 = vadd.f32 %v2525_v40, %v2524_v38  ;;  %v2521_v56 = vor.u32 1.1754944e-38, %v2520_v27  ;;  %vm2519_vm11 = vcmp.eq.f32.partialorder %v2518_v33, 8.507059e+37  ;;  %v2623_v43 = vand.u32 2147483648, %v5583_v18  ;;  %vm5615_vm13 = vmor %vm2617_vm12, %vm2618_vm9 }
 0x598   :  { %v2615_v52 = vmul.f32 %v5595_v46, %v2614_v6  ;;  %v2621_v37 = vand.u32 2147483647, %v5583_v18  ;;  %vm2637_vm5 = vweird.f32 %v5600_v45 }
 0x599   :  { %v3842_v63 = vpop.eup %3841 }
 0x59a   :  { %v3844_v10 = vpop.eup %3843  ;;  %v2592_v34 = vadd.f32 1.0, %v3842_v63  ;;  %v2616_v4 = vadd.f32 %v5595_v46, %v2615_v52  ;;  %vm2622_vm0 = vcmp.eq.f32.partialorder %v2621_v37, 8.507059e+37 }
 0x59b   :  { %v2510_v17 = vmul.f32 %v3844_v10, %v2508_v44  ;;  %vm2515_vm7 = vweird.f32 %v3844_v10  ;;  %v5607_v25 = vpop.eup %3845 }
 0x59c   :  { %v2571_v16 = vpop.f32.mrf.mxu2  ;;  %3847 = vrcp.f32 %v2592_v34  ;;  %vm2516_vm10 = vmor %vm2514_vm8, %vm2515_vm7  ;;  %v2633_v44 = vmul.f32 %v5607_v25, %v5600_v45  ;;  %v2602_v52 = vand.u32 2147483647, %v2592_v34  ;;  %vm2598_vm15 = vweird.f32 %v2592_v34 }
 0x59d   :  { %v2511_v39 = vsub.f32 1.0, %v2510_v17  ;;  %3849 = vtanh.f32 %v5602_v11  ;;  %v2620_v16 = vsel %vm5615_vm13, %v5595_v46, %v2616_v4  ;;  %vm2638_vm4 = vweird.f32 %v5607_v25 }
 0x59e   :  { %3851 = vtanh.f32 %v2573_v49  ;;  %v2634_v33 = vsub.f32 1.0, %v2633_v44  ;;  %vm2603_vm3 = vcmp.eq.f32.partialorder %v2602_v52, 8.507059e+37  ;;  %vm2639_vm6 = vmor %vm2637_vm5, %vm2638_vm4 }
 0x59f   :  { %v2512_v42 = vmul.f32 %v3844_v10, %v2511_v39 }
 0x5a0   :  { %v2635_v49 = vmul.f32 %v5607_v25, %v2634_v33 }
 0x5a1   :  { %v2513_v53 = vadd.f32 %v3844_v10, %v2512_v42  ;;  %v2624_v42 = vor.u32 1.1754944e-38, %v2623_v43 }
 0x5a2   :  { %v3848_v55 = vpop.eup %3847 }
 0x5a3   :  { %v2517_v50 = vsel %vm2516_vm10, %v3844_v10, %v2513_v53  ;;  %v2594_v60 = vmul.f32 %v3848_v55, %v2592_v34  ;;  %v3850_v38 = vpop.eup %3849  ;;  %v2604_v10 = vand.u32 2147483648, %v2592_v34  ;;  %vm2599_vm14 = vweird.f32 %v3848_v55 }
 0x5a4   :  { %v2522_v40 = vsel %vm2519_vm11, %v2521_v56, %v2517_v50  ;;  %vm2600_vm2 = vmor %vm2598_vm15, %vm2599_vm14  ;;  %v2625_v14 = vsel %vm2622_vm0, %v2624_v42, %v2620_v16  ;;  %v3852_v56 = vpop.eup %3851 }
 0x5a5   :  { %v2595_v6 = vsub.f32 1.0, %v2594_v60  ;;  %v2528_v17 = vmul.f32 %v3850_v38, %v2522_v40  ;;  %v2605_v18 = vor.u32 1.1754944e-38, %v2604_v10  ;;  %v2647_v34 = vmul.f32 %v2625_v14, %v5390_v15  ;;  %v2880_v14 = vld [vmem:[#allocation2 + $0xf8] sm:$0xff] }
 0x5a6   :  { %v2636_v38 = vadd.f32 %v5607_v25, %v2635_v49 }
 0x5a7   :  { %v2596_v39 = vmul.f32 %v3848_v55, %v2595_v6  ;;  %v2653_v27 = vpack.c.bf16 %v2528_v17, %v2528_v17  ;;  %v2850_v6 = vld [vmem:[#allocation2 + $0x78] sm:$0xff] }
 0x5a9   :  { %v2597_v53 = vadd.f32 %v3848_v55, %v2596_v39  ;;  %3553 = vmatmul.msk.bf16.vlgmr.msra.gmra.mxu1 %vm117_vm1, %v2653_v27  ;;  %3555 = vmatmul.msk.bf16.vlgmr.msra.gmra.mxu3 %vm117_vm1, %v2653_v27 }
 0x5aa   :  { %2855 = vmatpush.bf16.msra.mxu1 %v5188_v51  ;;  %2885 = vmatpush.bf16.msra.mxu3 %v5194_v19  ;;  %v2643_v51 = vand.u32 2147483648, %v5600_v45  ;;  %v2641_v19 = vand.u32 2147483647, %v5600_v45 }
 0x5ab   :  { %v2601_v46 = vsel %vm2600_vm2, %v3848_v55, %v2597_v53 }
 0x5ac   :  { %v2606_v4 = vsel %vm2603_vm3, %v2605_v18, %v2601_v46  ;;  %vm2642_vm7 = vcmp.eq.f32.partialorder %v2641_v19, 8.507059e+37 }
 0x5ad   :  { %v2648_v50 = vmul.f32 %v3852_v56, %v2606_v4  ;;  %v5713_v4 = vld [vmem:[%s5789_s6 + $0x3] ss:$0 sm:$0xff] }
 0x5ae   :  { %2856 = vmatpush.bf16.msra.mxu1 %v5202_v41  ;;  %2886 = vmatpush.bf16.msra.mxu3 %v5208_v12  ;;  %v2640_v41 = vsel %vm2639_vm6, %v5607_v25, %v2636_v38  ;;  %v2644_v12 = vor.u32 1.1754944e-38, %v2643_v51 }
 0x5af   :  { %v5631_v60 = vadd.f32 %v2648_v50, %v2647_v34 }
 0x5b0   :  { %v2645_v55 = vsel %vm2642_vm7, %v2644_v12, %v2640_v41  ;;  %v5719_v41 = vld [vmem:[%s5789_s6 + $0x2] ss:$0 sm:$0xff] }
 0x5b1   :  { %3853 = vtanh.f32 %v5631_v60 }
 0x5b2   :  { %2857 = vmatpush.bf16.msra.mxu1 %v5222_v2  ;;  %2887 = vmatpush.bf16.msra.mxu3 %v5228_v54  ;;  %v5910_v2 = vld [vmem:[#allocation7_spill] sm:$0xff]  ;;  %v5911_v54 = vld [vmem:[#allocation8_spill] sm:$0xff] }
 0x5b6   :  { %2858 = vmatpush.bf16.msra.mxu1 %v5235_v58  ;;  %2888 = vmatpush.bf16.msra.mxu3 %v5241_v23  ;;  %v5912_v58 = vld [vmem:[#allocation9_spill] sm:$0xff]  ;;  %v5913_v23 = vld [vmem:[#allocation10_spill] sm:$0xff] }
 0x5b7   :  { %v3854_v15 = vpop.eup %3853 }
 0x5b8   :  { %v2651_v43 = vmul.f32 %v3854_v15, %v2645_v55 }
 0x5b9   :  { %3557 = vmatmul.msk.bf16.vlgmr.msrb.gmra.mxu1 %vm117_vm1, %v2653_v27  ;;  %3559 = vmatmul.msk.bf16.vlgmr.msrb.gmra.mxu3 %vm117_vm1, %v2653_v27 }
 0x5ba   :  { %v2652_v45 = vpack.c.bf16 %v2651_v43, %v2651_v43  ;;  %2984 = vmatpush.bf16.msrb.mxu1 %v5407_v31  ;;  %3012 = vmatpush.bf16.msrb.mxu3 %v5410_v1  ;;  %v5922_v31 = vld [vmem:[#allocation20_spill] sm:$0xff]  ;;  %v5923_v1 = vld [vmem:[#allocation19_spill] sm:$0xff] }
 0x5bc   :  { %3552 = vmatmul.msk.bf16.vlgmr.msra.gmra.mxu0 %vm117_vm1, %v2652_v45  ;;  %3554 = vmatmul.msk.bf16.vlgmr.msra.gmra.mxu2 %vm117_vm1, %v2652_v45 }
 0x5bd   :  { %2840 = vmatpush.bf16.msra.mxu0 %v5253_v8  ;;  %2870 = vmatpush.bf16.msra.mxu2 %v5259_v32  ;;  %v5914_v8 = vld [vmem:[#allocation12_spill] sm:$0xff]  ;;  %v5915_v32 = vld [vmem:[#allocation11_spill] sm:$0xff] }
 0x5be   :  { %2985 = vmatpush.bf16.msrb.mxu1 %v5419_v0  ;;  %3013 = vmatpush.bf16.msrb.mxu3 %v5422_v9 }
 0x5c1   :  { %2841 = vmatpush.bf16.msra.mxu0 %v5267_v62  ;;  %2871 = vmatpush.bf16.msra.mxu2 %v5273_v61  ;;  %v5916_v62 = vld [vmem:[#allocation14_spill] sm:$0xff]  ;;  %v5917_v61 = vld [vmem:[#allocation13_spill] sm:$0xff] }
 0x5c2   :  { %2986 = vmatpush.bf16.msrb.mxu1 %v5427_v26  ;;  %3014 = vmatpush.bf16.msrb.mxu3 %v5430_v48 }
 0x5c5   :  { %2842 = vmatpush.bf16.msra.mxu0 %v5281_v7  ;;  %2872 = vmatpush.bf16.msra.mxu2 %v5287_v20  ;;  %v5918_v7 = vld [vmem:[#allocation16_spill] sm:$0xff]  ;;  %v5919_v20 = vld [vmem:[#allocation15_spill] sm:$0xff] }
 0x5c6   :  { %2987 = vmatpush.bf16.msrb.mxu1 %v5435_v35  ;;  %3015 = vmatpush.bf16.msrb.mxu3 %v5438_v59 }
 0x5c9   :  { %3564 = vmatmul.msk.bf16.vlgmr.msra.gmra.mxu1 %vm117_vm1, %v2652_v45  ;;  %3566 = vmatmul.msk.bf16.vlgmr.msra.gmra.mxu3 %vm117_vm1, %v2652_v45 }
 0x5ca   :  { %2843 = vmatpush.bf16.msra.mxu0 %v5297_v21  ;;  %2873 = vmatpush.bf16.msra.mxu2 %v5303_v22  ;;  %v5920_v21 = vld [vmem:[#allocation18_spill] sm:$0xff]  ;;  %v5921_v22 = vld [vmem:[#allocation17_spill] sm:$0xff] }
 0x5cb   :  { %3040 = vmatpush.bf16.msra.mxu1 %v5447_v30  ;;  %3068 = vmatpush.bf16.msra.mxu3 %v5450_v3  ;;  %v5697_v30 = vld [vmem:[%s5789_s6] ss:$0 sm:$0xff] }
 0x5cc   :  { %3556 = vmatmul.msk.bf16.vlgmr.msrb.gmra.mxu0 %vm117_vm1, %v2652_v45  ;;  %3558 = vmatmul.msk.bf16.vlgmr.msrb.gmra.mxu2 %vm117_vm1, %v2652_v45 }
 0x5ce   :  { %2998 = vmatpush.bf16.msrb.mxu2 %v5466_v13  ;;  %2967 = vmatpush.bf16.msrb.mxu0 %v5460_v47 }
 0x5cf   :  { %3041 = vmatpush.bf16.msra.mxu1 %v5469_v24  ;;  %3069 = vmatpush.bf16.msra.mxu3 %v5472_v5 }
 0x5d2   :  { %2999 = vmatpush.bf16.msrb.mxu2 %v5484_v29  ;;  %2968 = vmatpush.bf16.msrb.mxu0 %v5478_v28  ;;  %v5703_v29 = vld [vmem:[%s5789_s6 + $0x1] ss:$0 sm:$0xff] }
 0x5d3   :  { %3042 = vmatpush.bf16.msra.mxu1 %v5487_v57  ;;  %3070 = vmatpush.bf16.msra.mxu3 %v5490_v36 }
 0x5d6   :  { %3000 = vmatpush.bf16.msrb.mxu2 %v5910_v2  ;;  %2969 = vmatpush.bf16.msrb.mxu0 %v5911_v54 }
 0x5d7   :  { %3043 = vmatpush.bf16.msra.mxu1 %v5912_v58  ;;  %3071 = vmatpush.bf16.msra.mxu3 %v5913_v23 }
 0x5da   :  { %3001 = vmatpush.bf16.msrb.mxu2 %v5914_v8  ;;  %2970 = vmatpush.bf16.msrb.mxu0 %v5915_v32 }
 0x5dc   :  { %3563 = vmatmul.msk.bf16.vlgmr.msra.gmra.mxu0 %vm117_vm1, %v2652_v45  ;;  %3565 = vmatmul.msk.bf16.vlgmr.msra.gmra.mxu2 %vm117_vm1, %v2652_v45 }
 0x5de   :  { %3054 = vmatpush.bf16.msra.mxu2 %v5916_v62  ;;  %3026 = vmatpush.bf16.msra.mxu0 %v5917_v61 }
 0x5e2   :  { %3055 = vmatpush.bf16.msra.mxu2 %v5918_v7  ;;  %3027 = vmatpush.bf16.msra.mxu0 %v5919_v20  ;;  %v2835_v7 = vld [vmem:[#allocation2 + $0x38] sm:$0xff] }
 0x5e6   :  { %3056 = vmatpush.bf16.msra.mxu2 %v5920_v21  ;;  %3028 = vmatpush.bf16.msra.mxu0 %v5921_v22 }
 0x5ea   :  { %3057 = vmatpush.bf16.msra.mxu2 %v5922_v31  ;;  %3029 = vmatpush.bf16.msra.mxu0 %v5923_v1 }
 0x626   :  { %v2683_v0 = vpop.f32.mrf.mxu1 }
 0x62c   :  { %v2711_v9 = vpop.f32.mrf.mxu3 }
 0x62e   :  { %v2685_v26 = vpop.f32.mrf.mxu1 }
 0x634   :  { %v2713_v48 = vpop.f32.mrf.mxu3 }
 0x636   :  { %v2739_v35 = vpop.f32.mrf.mxu1 }
 0x639   :  { %v2666_v59 = vpop.f32.mrf.mxu0 }
 0x63a   :  { %v2670_v3 = vadd.f32 %v5697_v30, %v2666_v59 }
 0x63c   :  { %v2687_v47 = vadd.f32 %v2683_v0, %v2670_v3  ;;  %v2767_v13 = vpop.f32.mrf.mxu3 }
 0x63e   :  { %v3560_v24 = vmul.f32 -1.442695, %v2687_v47  ;;  %v2741_v5 = vpop.f32.mrf.mxu1 }
 0x63f   :  { %v2697_v28 = vpop.f32.mrf.mxu2 }
 0x640   :  { %3855 = vpow2.f32 %v3560_v24  ;;  %v2701_v57 = vadd.f32 %v5703_v29, %v2697_v28 }
 0x641   :  { %v2668_v36 = vpop.f32.mrf.mxu0 }
 0x642   :  { %v2715_v25 = vadd.f32 %v2711_v9, %v2701_v57 }
 0x644   :  { %v3561_v44 = vmul.f32 -1.442695, %v2715_v25  ;;  %v2769_v40 = vpop.f32.mrf.mxu3 }
 0x646   :  { %v3856_v63 = vpop.eup %3855  ;;  %3857 = vpow2.f32 %v3561_v44  ;;  %v2860_v37 = vpop.f32.mrf.mxu1 }
 0x647   :  { %v5706_v17 = vadd.f32 1.0, %v3856_v63  ;;  %v2864_v10 = vadd.f32 %v2860_v37, %v2850_v6  ;;  %v2699_v16 = vpop.f32.mrf.mxu2 }
 0x649   :  { %3859 = vrcp.f32 %v5706_v17  ;;  %v3568_v39 = vmul.f32 -1.442695, %v2864_v10  ;;  %v2725_v52 = vpop.f32.mrf.mxu0  ;;  %vm2781_vm10 = vweird.f32 %v5706_v17  ;;  %v2787_v1 = vand.u32 2147483648, %v5706_v17 }
 0x64a   :  { %v2729_v12 = vadd.f32 %v5719_v41, %v2725_v52  ;;  %v2785_v9 = vand.u32 2147483647, %v5706_v17 }
 0x64b   :  { %3861 = vpow2.f32 %v3568_v39  ;;  %v2788_v28 = vor.u32 1.1754944e-38, %v2787_v1 }
 0x64c   :  { %v3858_v27 = vpop.eup %3857  ;;  %v2890_v42 = vpop.f32.mrf.mxu3  ;;  %v2743_v32 = vadd.f32 %v2739_v35, %v2729_v12  ;;  %vm2786_vm15 = vcmp.eq.f32.partialorder %v2785_v9, 8.507059e+37 }
 0x64d   :  { %v2794_v33 = vadd.f32 1.0, %v3858_v27  ;;  %v2894_v49 = vadd.f32 %v2890_v42, %v2880_v14 }
 0x64e   :  { %v2862_v53 = vpop.f32.mrf.mxu1 }
 0x64f   :  { %v3860_v18 = vpop.eup %3859  ;;  %3863 = vrcp.f32 %v2794_v33  ;;  %v2753_v46 = vpop.f32.mrf.mxu2  ;;  %v3569_v15 = vmul.f32 -1.442695, %v2894_v49  ;;  %v2806_v62 = vand.u32 2147483648, %v2794_v33  ;;  %v2804_v61 = vand.u32 2147483647, %v2794_v33 }
 0x650   :  { %v2777_v56 = vmul.f32 %v3860_v18, %v5706_v17  ;;  %v2757_v34 = vadd.f32 %v5713_v4, %v2753_v46  ;;  %vm2782_vm8 = vweird.f32 %v3860_v18  ;;  %vm2800_vm11 = vweird.f32 %v2794_v33 }
 0x651   :  { %v2727_v50 = vpop.f32.mrf.mxu0  ;;  %v3862_v38 = vpop.eup %3861  ;;  %vm5727_vm12 = vmor %vm2781_vm10, %vm2782_vm8  ;;  %v2807_v59 = vor.u32 1.1754944e-38, %v2806_v62  ;;  %vm2805_vm14 = vcmp.eq.f32.partialorder %v2804_v61, 8.507059e+37 }
 0x652   :  { %v2778_v51 = vsub.f32 1.0, %v2777_v56  ;;  %v2771_v19 = vadd.f32 %v2767_v13, %v2757_v34  ;;  %v5722_v45 = vadd.f32 1.0, %v3862_v38  ;;  %v2865_v34 = vld [vmem:[#allocation2 + $0xb8] sm:$0xff] }
 0x654   :  { %v2892_v55 = vpop.f32.mrf.mxu3  ;;  %v3562_v2 = vmul.f32 -1.442695, %v2771_v19  ;;  %v2779_v58 = vmul.f32 %v3860_v18, %v2778_v51  ;;  %vm2923_vm6 = vweird.f32 %v5722_v45 }
 0x655   :  { %v3864_v43 = vpop.eup %3863 }
 0x656   :  { %v2796_v54 = vmul.f32 %v3864_v43, %v2794_v33  ;;  %3865 = vpow2.f32 %v3562_v2  ;;  %vm2801_vm9 = vweird.f32 %v3864_v43  ;;  %v2780_v22 = vadd.f32 %v3860_v18, %v2779_v58 }
 0x657   :  { %v2755_v23 = vpop.f32.mrf.mxu2  ;;  %3867 = vpow2.f32 %v3569_v15  ;;  %vm2802_vm13 = vmor %vm2800_vm11, %vm2801_vm9 }
 0x658   :  { %v2797_v8 = vsub.f32 1.0, %v2796_v54  ;;  %3869 = vrcp.f32 %v5722_v45  ;;  %v2784_v47 = vsel %vm5727_vm12, %v3860_v18, %v2780_v22 }
 0x659   :  { %v2845_v20 = vpop.f32.mrf.mxu0  ;;  %3871 = vtanh.f32 %v2743_v32  ;;  %v2789_v25 = vsel %vm2786_vm15, %v2788_v28, %v2784_v47 }
 0x65a   :  { %v2798_v21 = vmul.f32 %v3864_v43, %v2797_v8  ;;  %v2849_v31 = vadd.f32 %v2845_v20, %v2835_v7  ;;  %v2927_v8 = vand.u32 2147483647, %v5722_v45 }
 0x65c   :  { %v2799_v26 = vadd.f32 %v3864_v43, %v2798_v21  ;;  %v3567_v48 = vmul.f32 -1.442695, %v2849_v31  ;;  %v3866_v35 = vpop.eup %3865  ;;  %vm2928_vm10 = vcmp.eq.f32.partialorder %v2927_v8, 8.507059e+37 }
 0x65d   :  { %v3868_v3 = vpop.eup %3867  ;;  %v2814_v24 = vadd.f32 1.0, %v3866_v35 }
 0x65e   :  { %v2803_v13 = vsel %vm2802_vm13, %v3864_v43, %v2799_v26  ;;  %v5734_v5 = vpop.eup %3869  ;;  %3873 = vpow2.f32 %v3567_v48  ;;  %v5739_v37 = vadd.f32 1.0, %v3868_v3  ;;  %v2929_v43 = vand.u32 2147483648, %v5722_v45 }
 0x65f   :  { %v2808_v57 = vsel %vm2805_vm14, %v2807_v59, %v2803_v13  ;;  %v2875_v36 = vpop.f32.mrf.mxu2  ;;  %3875 = vrcp.f32 %v2814_v24  ;;  %v2919_v40 = vmul.f32 %v5734_v5, %v5722_v45  ;;  %v3872_v6 = vpop.eup %3871  ;;  %v2824_v46 = vand.u32 2147483647, %v2814_v24 }
 0x660   :  { %v2830_v63 = vmul.f32 %v2808_v57, %v5602_v11  ;;  %v2831_v17 = vmul.f32 %v3872_v6, %v2789_v25  ;;  %3877 = vrcp.f32 %v5739_v37  ;;  %v2826_v11 = vand.u32 2147483648, %v2814_v24 }
 0x661   :  { %v2847_v44 = vpop.f32.mrf.mxu0  ;;  %v2920_v39 = vsub.f32 1.0, %v2919_v40  ;;  %vm2820_vm2 = vweird.f32 %v2814_v24  ;;  %vm2924_vm3 = vweird.f32 %v5734_v5  ;;  %v2879_v51 = vadd.f32 %v2875_v36, %v2865_v34 }
 0x662   :  { %v5741_v52 = vadd.f32 %v2831_v17, %v2830_v63  ;;  %v2827_v38 = vor.u32 1.1754944e-38, %v2826_v11  ;;  %vm2825_vm5 = vcmp.eq.f32.partialorder %v2824_v46, 8.507059e+37  ;;  %vm5751_vm7 = vmor %vm2923_vm6, %vm2924_vm3  ;;  %v2930_v22 = vor.u32 1.1754944e-38, %v2929_v43 }
 0x663   :  { %v2921_v18 = vmul.f32 %v5734_v5, %v2920_v39  ;;  %vm2943_vm14 = vweird.f32 %v5739_v37 }
 0x664   :  { %v3874_v10 = vpop.eup %3873 }
 0x665   :  { %v3876_v16 = vpop.eup %3875  ;;  %v2898_v27 = vadd.f32 1.0, %v3874_v10  ;;  %v2922_v19 = vadd.f32 %v5734_v5, %v2921_v18 }
 0x666   :  { %v2816_v42 = vmul.f32 %v3876_v16, %v2814_v24  ;;  %vm2821_vm0 = vweird.f32 %v3876_v16  ;;  %v3878_v56 = vpop.eup %3877  ;;  %v2949_v24 = vand.u32 2147483648, %v5739_v37 }
 0x667   :  { %v2877_v33 = vpop.f32.mrf.mxu2  ;;  %3879 = vrcp.f32 %v2898_v27  ;;  %vm2822_vm4 = vmor %vm2820_vm2, %vm2821_vm0  ;;  %v2939_v2 = vmul.f32 %v3878_v56, %v5739_v37  ;;  %v2910_v62 = vand.u32 2147483648, %v2898_v27  ;;  %v2926_v61 = vsel %vm5751_vm7, %v5734_v5, %v2922_v19 }
 0x668   :  { %v2817_v53 = vsub.f32 1.0, %v2816_v42  ;;  %3881 = vtanh.f32 %v5741_v52  ;;  %v2908_v20 = vand.u32 2147483647, %v2898_v27  ;;  %vm2904_vm9 = vweird.f32 %v2898_v27 }
 0x669   :  { %3883 = vtanh.f32 %v2879_v51  ;;  %v2940_v31 = vsub.f32 1.0, %v2939_v2  ;;  %v2911_v45 = vor.u32 1.1754944e-38, %v2910_v62  ;;  %v2931_v0 = vsel %vm2928_vm10, %v2930_v22, %v2926_v61 }
 0x66a   :  { %v2818_v14 = vmul.f32 %v3876_v16, %v2817_v53  ;;  %vm2909_vm12 = vcmp.eq.f32.partialorder %v2908_v20, 8.507059e+37  ;;  %v2953_v59 = vmul.f32 %v2931_v0, %v5631_v60  ;;  %vm2944_vm13 = vweird.f32 %v3878_v56 }
 0x66b   :  { %v2941_v48 = vmul.f32 %v3878_v56, %v2940_v31  ;;  %v2947_v5 = vand.u32 2147483647, %v5739_v37  ;;  %vm2945_vm15 = vmor %vm2943_vm14, %vm2944_vm13  ;;  %v2950_v57 = vor.u32 1.1754944e-38, %v2949_v24  ;;  %vm3154_vm14 = vcmask 7168  }
 0x66c   :  { %v2819_v49 = vadd.f32 %v3876_v16, %v2818_v14 }
 0x66d   :  { %v3880_v50 = vpop.eup %3879  ;;  %v2942_v13 = vadd.f32 %v3878_v56, %v2941_v48  ;;  %vm2948_vm0 = vcmp.eq.f32.partialorder %v2947_v5, 8.507059e+37 }
 0x66e   :  { %v2823_v12 = vsel %vm2822_vm4, %v3876_v16, %v2819_v49  ;;  %v2900_v15 = vmul.f32 %v3880_v50, %v2898_v27  ;;  %v3882_v55 = vpop.eup %3881  ;;  %vm2905_vm8 = vweird.f32 %v3880_v50 }
 0x66f   :  { %v2828_v54 = vsel %vm2825_vm5, %v2827_v38, %v2823_v12  ;;  %vm2906_vm11 = vmor %vm2904_vm9, %vm2905_vm8  ;;  %v3884_v26 = vpop.eup %3883  ;;  %v2946_v28 = vsel %vm2945_vm15, %v3878_v56, %v2942_v13 }
 0x670   :  { %v2901_v23 = vsub.f32 1.0, %v2900_v15  ;;  %v2834_v32 = vmul.f32 %v3882_v55, %v2828_v54  ;;  %v2951_v25 = vsel %vm2948_vm0, %v2950_v57, %v2946_v28 }
 0x672   :  { %v2902_v7 = vmul.f32 %v3880_v50, %v2901_v23  ;;  %v2959_v21 = vpack.c.bf16 %v2834_v32, %v2834_v32 }
 0x674   :  { %v2903_v1 = vadd.f32 %v3880_v50, %v2902_v7  ;;  %3571 = vmatmul.msk.bf16.vlgmr.msrb.gmra.mxu1 %vm117_vm1, %v2959_v21  ;;  %3573 = vmatmul.msk.bf16.vlgmr.msrb.gmra.mxu3 %vm117_vm1, %v2959_v21 }
 0x676   :  { %v2907_v9 = vsel %vm2906_vm11, %v3880_v50, %v2903_v1 }
 0x677   :  { %v2912_v35 = vsel %vm2909_vm12, %v2911_v45, %v2907_v9 }
 0x678   :  { %v2954_v3 = vmul.f32 %v3884_v26, %v2912_v35 }
 0x67a   :  { %v2955_v47 = vadd.f32 %v2954_v3, %v2953_v59 }
 0x67c   :  { %3885 = vtanh.f32 %v2955_v47 }
 0x682   :  { %v3886_v36 = vpop.eup %3885 }
 0x683   :  { %v2957_v44 = vmul.f32 %v3886_v36, %v2951_v25 }
 0x684   :  { %3575 = vmatmul.msk.bf16.vlgmr.msra.gmra.mxu1 %vm117_vm1, %v2959_v21  ;;  %3577 = vmatmul.msk.bf16.vlgmr.msra.gmra.mxu3 %vm117_vm1, %v2959_v21 }
 0x685   :  { %v2958_v60 = vpack.c.bf16 %v2957_v44, %v2957_v44 }
 0x687   :  { %3570 = vmatmul.msk.bf16.vlgmr.msrb.gmra.mxu0 %vm117_vm1, %v2958_v60  ;;  %3572 = vmatmul.msk.bf16.vlgmr.msrb.gmra.mxu2 %vm117_vm1, %v2958_v60 }
 0x697   :  { %3574 = vmatmul.msk.bf16.vlgmr.msra.gmra.mxu0 %vm117_vm1, %v2958_v60  ;;  %3576 = vmatmul.msk.bf16.vlgmr.msra.gmra.mxu2 %vm117_vm1, %v2958_v60 }
 0x6f1   :  { %v2989_v40 = vpop.f32.mrf.mxu1 }
 0x6f7   :  { %v3017_v63 = vpop.f32.mrf.mxu3 }
 0x6f9   :  { %v2991_v6 = vpop.f32.mrf.mxu1 }
 0x6ff   :  { %v3019_v37 = vpop.f32.mrf.mxu3 }
 0x701   :  { %v3045_v17 = vpop.f32.mrf.mxu1 }
 0x704   :  { %v2972_v10 = vpop.f32.mrf.mxu0 }
 0x705   :  { %v2976_v16 = vadd.f32 %v5697_v30, %v2972_v10 }
 0x707   :  { %v2993_v39 = vadd.f32 %v2989_v40, %v2976_v16  ;;  %v3073_v27 = vpop.f32.mrf.mxu3 }
 0x709   :  { %v3578_v42 = vmul.f32 -1.442695, %v2993_v39  ;;  %v3047_v33 = vpop.f32.mrf.mxu1 }
 0x70a   :  { %v3003_v53 = vpop.f32.mrf.mxu2 }
 0x70b   :  { %3887 = vpow2.f32 %v3578_v42  ;;  %v3007_v18 = vadd.f32 %v5703_v29, %v3003_v53 }
 0x70c   :  { %v2974_v11 = vpop.f32.mrf.mxu0 }
 0x70d   :  { %v3021_v14 = vadd.f32 %v3017_v63, %v3007_v18 }
 0x70f   :  { %v3579_v46 = vmul.f32 -1.442695, %v3021_v14  ;;  %v3075_v56 = vpop.f32.mrf.mxu3 }
 0x711   :  { %v3888_v49 = vpop.eup %3887  ;;  %3889 = vpow2.f32 %v3579_v46 }
 0x712   :  { %v3081_v34 = vadd.f32 1.0, %v3888_v49  ;;  %v3005_v50 = vpop.f32.mrf.mxu2 }
 0x714   :  { %3891 = vrcp.f32 %v3081_v34  ;;  %v3031_v38 = vpop.f32.mrf.mxu0  ;;  %v3093_v31 = vand.u32 2147483648, %v3081_v34  ;;  %vm3087_vm4 = vweird.f32 %v3081_v34  ;;  %v3091_v1 = vand.u32 2147483647, %v3081_v34 }
 0x715   :  { %v3035_v54 = vadd.f32 %v5719_v41, %v3031_v38 }
 0x716   :  { %v3094_v48 = vor.u32 1.1754944e-38, %v3093_v31  ;;  %vm3092_vm9 = vcmp.eq.f32.partialorder %v3091_v1, 8.507059e+37 }
 0x717   :  { %v3890_v51 = vpop.eup %3889  ;;  %v3049_v7 = vadd.f32 %v3045_v17, %v3035_v54 }
 0x718   :  { %v3100_v30 = vadd.f32 1.0, %v3890_v51 }
 0x71a   :  { %v3892_v19 = vpop.eup %3891  ;;  %3893 = vrcp.f32 %v3100_v30  ;;  %v3059_v12 = vpop.f32.mrf.mxu2  ;;  %v3112_v20 = vand.u32 2147483648, %v3100_v30  ;;  %vm3106_vm5 = vweird.f32 %v3100_v30 }
 0x71b   :  { %v3083_v15 = vmul.f32 %v3892_v19, %v3081_v34  ;;  %v3063_v55 = vadd.f32 %v5713_v4, %v3059_v12  ;;  %vm3088_vm2 = vweird.f32 %v3892_v19  ;;  %v3110_v4 = vand.u32 2147483647, %v3100_v30 }
 0x71c   :  { %v3033_v43 = vpop.f32.mrf.mxu0  ;;  %vm3089_vm6 = vmor %vm3087_vm4, %vm3088_vm2  ;;  %v3113_v0 = vor.u32 1.1754944e-38, %v3112_v20 }
 0x71d   :  { %v3084_v29 = vsub.f32 1.0, %v3083_v15  ;;  %v3077_v2 = vadd.f32 %v3073_v27, %v3063_v55  ;;  %vm3111_vm8 = vcmp.eq.f32.partialorder %v3110_v4, 8.507059e+37  ;;  %v3646_v27 = vld [vmem:[#allocation3] ss:$0 sm:$0xff] }
 0x71f   :  { %v3580_v58 = vmul.f32 -1.442695, %v3077_v2  ;;  %v3085_v8 = vmul.f32 %v3892_v19, %v3084_v29 }
 0x720   :  { %v3894_v23 = vpop.eup %3893 }
 0x721   :  { %v3102_v32 = vmul.f32 %v3894_v23, %v3100_v30  ;;  %3895 = vpow2.f32 %v3580_v58  ;;  %v3086_v21 = vadd.f32 %v3892_v19, %v3085_v8  ;;  %vm3107_vm3 = vweird.f32 %v3894_v23 }
 0x722   :  { %v3061_v62 = vpop.f32.mrf.mxu2  ;;  %3897 = vtanh.f32 %v3049_v7  ;;  %vm3108_vm7 = vmor %vm3106_vm5, %vm3107_vm3 }
 0x723   :  { %v3103_v61 = vsub.f32 1.0, %v3102_v32  ;;  %v3090_v9 = vsel %vm3089_vm6, %v3892_v19, %v3086_v21 }
 0x724   :  { %v3095_v3 = vsel %vm3092_vm9, %v3094_v48, %v3090_v9 }
 0x725   :  { %v3104_v22 = vmul.f32 %v3894_v23, %v3103_v61 }
 0x727   :  { %v3896_v45 = vpop.eup %3895  ;;  %v3105_v41 = vadd.f32 %v3894_v23, %v3104_v22 }
 0x728   :  { %v3120_v26 = vadd.f32 1.0, %v3896_v45  ;;  %v3898_v13 = vpop.eup %3897 }
 0x729   :  { %v3109_v35 = vsel %vm3108_vm7, %v3894_v23, %v3105_v41  ;;  %v3137_v24 = vmul.f32 %v3898_v13, %v3095_v3 }
 0x72a   :  { %3899 = vrcp.f32 %v3120_v26  ;;  %v3114_v59 = vsel %vm3111_vm8, %v3113_v0, %v3109_v35  ;;  %v3132_v25 = vand.u32 2147483648, %v3120_v26  ;;  %v3130_v60 = vand.u32 2147483647, %v3120_v26 }
 0x72b   :  { %v3136_v47 = vmul.f32 %v3114_v59, %v5741_v52  ;;  %vm3126_vm11 = vweird.f32 %v3120_v26  ;;  %v3645_v52 = vld [vmem:[%s5790_s7] ss:$0 sm:$0xff] }
 0x72c   :  { %v3133_v63 = vor.u32 1.1754944e-38, %v3132_v25  ;;  %vm3131_vm13 = vcmp.eq.f32.partialorder %v3130_v60, 8.507059e+37 }
 0x72d   :  { %v3138_v28 = vadd.f32 %v3137_v24, %v3136_v47 }
 0x72f   :  { %3901 = vtanh.f32 %v3138_v28 }
 0x730   :  { %v3900_v5 = vpop.eup %3899 }
 0x731   :  { %v3122_v57 = vmul.f32 %v3900_v5, %v3120_v26  ;;  %vm3127_vm10 = vweird.f32 %v3900_v5 }
 0x732   :  { %vm3128_vm12 = vmor %vm3126_vm11, %vm3127_vm10 }
 0x733   :  { %v3123_v36 = vsub.f32 1.0, %v3122_v57 }
 0x735   :  { %v3124_v44 = vmul.f32 %v3900_v5, %v3123_v36  ;;  %v3902_v37 = vpop.eup %3901 }
 0x737   :  { %v3125_v40 = vadd.f32 %v3900_v5, %v3124_v44 }
 0x739   :  { %v3129_v6 = vsel %vm3128_vm12, %v3900_v5, %v3125_v40 }
 0x73a   :  { %v3134_v17 = vsel %vm3131_vm13, %v3133_v63, %v3129_v6 }
 0x73b   :  { %v3140_v10 = vmul.f32 %v3902_v37, %v3134_v17 }
 0x73d   :  { %v3145_v16 = vmul.f32 %v3645_v52, %v3140_v10 }
 0x73f   :  { %v3146_v39 = vsel %vm117_vm1, %v3145_v16, 0.0 }
 0x740   :  { %3147 = vadd.xlane.f32.xlu0 %v3146_v39 }
 0x7b3   :  { %v3148_v42 = vpop.xlane.xlu0 %3147 }
 0x7b4   :  { %v3153_v33 = vadd.f32 %v3646_v27, %v3148_v42 }
 0x7b6   :  { %3155 = vst.msk [vmem:[%s5792_s9] sm:$0xff] %vm3154_vm14, %v3153_v33 }
 0x7b7   :  { %3160 = vsyncpa [#allocation5], 1 }

</bundles_post_ra>
